<compile_context>
chip_gen: v5e
topology: v5e:2x2
jax: 0.10.0
libtpu: 0.0.40
codegen_flags: <defaults>
</compile_context>

<pallas_src>
import functools

import jax
import jax.numpy as jnp
from jax import lax
from jax.experimental import pallas as pl
from jax.experimental.pallas import tpu as pltpu

COMPUTE_DTYPE = jnp.bfloat16  # MXU-native matmul-operand / activation-storage dtype.


def _silu_f32(y):
    """SiLU(y) = y * sigmoid(y); the reciprocal goes to the EUP approx path."""
    return y * pl.reciprocal(1.0 + jnp.exp(-y), approx=True)


# ----------------------------- kernel bodies --------------------------------

def _stem1_kernel(x_ref, w_ref, b_ref, m_ref, o_ref, *, width, n_rows):
    """Fused stem1 (3x3/s2 conv+BN+SiLU) + F.pad, as a 4-tap conv on a space-to-depth slab."""
    offs = (0, 1, width, width + 1)
    cout = w_ref.shape[-1]
    acc = jnp.zeros((n_rows, cout), jnp.float32)
    for t, off in enumerate(offs):
        acc += jnp.dot(x_ref[pl.ds(off, n_rows), :], w_ref[t],
                       preferred_element_type=jnp.float32)
    y = _silu_f32(acc + b_ref[...].astype(jnp.float32))
    o_ref[...] = (y * m_ref[...]).astype(o_ref.dtype)


def _stem2_pool_kernel(x_ref, w2a_ref, b2a_ref, w2b_ref, b2b_ref, m_ref,
                       o1_ref, o2_ref, z_ref, *, width, n_rows, n_rows_z):
    """Fused stem2a + F.pad + stem2b + MaxPool2d(2,1) from one load of the padded stem1 output.

    x_ref holds the row-major flattened (width=`width`) padded stem1 output plus zero halo rows.
    o1_ref <- maxpool branch, o2_ref <- stem2b branch; both are zeroed outside the valid region
    so they can be consumed directly as stem3's zero-padded input (no crop / concat needed)."""
    offs = (0, 1, width, width + 1)

    # stem2a + right/bottom zero pad, on an extended grid so stem2b's taps stay in-bounds.
    c_mid = w2a_ref.shape[-1]
    acc = jnp.zeros((n_rows_z, c_mid), jnp.float32)
    for t, off in enumerate(offs):
        acc += jnp.dot(x_ref[pl.ds(off, n_rows_z), :], w2a_ref[t],
                       preferred_element_type=jnp.float32)
    z = _silu_f32(acc + b2a_ref[...].astype(jnp.float32)) * m_ref[pl.ds(0, n_rows_z), :]
    z_ref[...] = z.astype(z_ref.dtype)

    mask = m_ref[pl.ds(0, n_rows), :]

    # stem2b on the padded stem2a output held in VMEM scratch.
    cout = w2b_ref.shape[-1]
    acc2 = jnp.zeros((n_rows, cout), jnp.float32)
    for t, off in enumerate(offs):
        acc2 += jnp.dot(z_ref[pl.ds(off, n_rows), :], w2b_ref[t],
                        preferred_element_type=jnp.float32)
    y2 = _silu_f32(acc2 + b2b_ref[...].astype(jnp.float32)) * mask
    o2_ref[...] = y2.astype(o2_ref.dtype)

    # MaxPool2d(kernel=2, stride=1, ceil_mode=True) on the padded stem1 output.
    y1 = x_ref[pl.ds(0, n_rows), :].astype(jnp.float32)
    for off in offs[1:]:
        y1 = jnp.maximum(y1, x_ref[pl.ds(off, n_rows), :].astype(jnp.float32))
    o1_ref[...] = (y1 * mask).astype(o1_ref.dtype)


def _stem34_kernel(x1_ref, x2_ref, w3a_ref, w3b_ref, b3_ref, w4_ref, b4_ref, o_ref,
                   *, width, n_rows):
    """Fused stem3 (3x3/s2 conv over cat([pool, stem2b])) + stem4 (1x1 conv).

    The concat is never materialized: the two branches arrive as separate space-to-depth
    slabs and the split stem3 weight is accumulated over both."""
    offs = (0, 1, width, width + 1)
    c_mid = w3a_ref.shape[-1]
    acc = jnp.zeros((n_rows, c_mid), jnp.float32)
    for t, off in enumerate(offs):
        acc += jnp.dot(x1_ref[pl.ds(off, n_rows), :], w3a_ref[t],
                       preferred_element_type=jnp.float32)
        acc += jnp.dot(x2_ref[pl.ds(off, n_rows), :], w3b_ref[t],
                       preferred_element_type=jnp.float32)
    y3 = _silu_f32(acc + b3_ref[...].astype(jnp.float32))
    y4 = jnp.dot(y3.astype(w4_ref.dtype), w4_ref[...], preferred_element_type=jnp.float32)
    o_ref[...] = _silu_f32(y4 + b4_ref[...].astype(jnp.float32)).astype(o_ref.dtype)


# ------------------------------ layout / weight glue -------------------------

def _space_to_depth_slab(x_nhwc, halo_rows):
    """(N,Hp,Wp,C) -> per-image flat slab (N, Hs*Ws + halo_rows, 4C) of the 2x2 space-to-depth
    image (channel order (py, px, c)).  Pure layout glue, ~1x data (no im2col blow-up)."""
    n, hp, wp, c = x_nhwc.shape
    hp2, wp2 = hp + (hp % 2), wp + (wp % 2)
    x = jnp.pad(x_nhwc, ((0, 0), (0, hp2 - hp), (0, wp2 - wp), (0, 0)))
    hs, ws = hp2 // 2, wp2 // 2
    x = x.reshape(n, hs, 2, ws, 2, c)
    x = jnp.transpose(x, (0, 1, 3, 2, 4, 5)).reshape(n, hs * ws, 4 * c)
    x = jnp.pad(x, ((0, 0), (0, halo_rows), (0, 0)))
    return x, hs, ws


def _fold_s2_weights(w_oihw):
    """(Co,Ci,3,3) stride-2 conv weight -> (4, 4*Ci, Co) tap weights over s2d channels."""
    co, ci, kh, kw = w_oihw.shape
    assert kh == 3 and kw == 3
    w = jnp.transpose(w_oihw, (2, 3, 1, 0))                  # (ky, kx, ci, co)
    out = jnp.zeros((2, 2, 2, 2, ci, co), w.dtype)           # (dy, dx, py, px, ci, co)
    for ky in range(3):
        for kx in range(3):
            dy, py = divmod(ky, 2)
            dx, px = divmod(kx, 2)
            out = out.at[dy, dx, py, px].set(w[ky, kx])
    return out.reshape(4, 4 * ci, co)                        # tap index = dy*2 + dx


def _fold_s1_weights(w_oihw):
    """(Co,Ci,2,2) stride-1 conv weight -> (4, Ci, Co) tap weights, tap index = dy*2 + dx."""
    co, ci, kh, kw = w_oihw.shape
    assert kh == 2 and kw == 2
    return jnp.transpose(w_oihw, (2, 3, 1, 0)).reshape(4, ci, co)


def _flat_valid_mask(length, width, rows_valid, cols_valid):
    """(length,1) f32 mask over a row-major grid of `width`: 1 inside the valid corner,
    0 elsewhere (implements the right/bottom zero padding of F.pad / stem3's conv pad)."""
    idx = jnp.arange(length)
    r, c = idx // width, idx % width
    return ((r < rows_valid) & (c < cols_valid)).astype(jnp.float32).reshape(length, 1)


# ------------------------------- HGStem forward ------------------------------

def hgstem_forward(x_nchw, params):
    n, c1, h, w = x_nchw.shape
    cm = params["stem1"]["w"].shape[0]
    cmh = params["stem2a"]["w"].shape[0]
    c2 = params["stem4"]["w"].shape[0]

    ho1, wo1 = (h - 1) // 2 + 1, (w - 1) // 2 + 1   # stem1 output size
    hq, wq = ho1 + 1, wo1 + 1                       # F.pad'ed stem1 grid (= s2d grid of padded x)
    pq = hq * wq
    pa = pq + 2 * (wq + 1)                          # kernel-A output rows (incl. zero halo for B)
    pa_in = pa + wq + 1                             # kernel-A input slab rows per image
    pz = pq + wq + 1                                # extended stem2a grid (stem2b taps in-bounds)

    x = jnp.transpose(x_nchw, (0, 2, 3, 1)).astype(COMPUTE_DTYPE)   # NCHW -> NHWC
    xp = jnp.pad(x, ((0, 0), (1, 1), (1, 1), (0, 0)))               # stem1's conv padding
    s1_in, hs, ws = _space_to_depth_slab(xp, pa_in - pq)
    assert (hs, ws) == (hq, wq)

    mask = _flat_valid_mask(pa, wq, ho1, wo1)
    par = pltpu.CompilerParams(dimension_semantics=("parallel",))

    # ---- kernel A: stem1 + F.pad ------------------------------------------------------------
    w1 = _fold_s2_weights(params["stem1"]["w"]).astype(COMPUTE_DTYPE)
    b1 = params["stem1"]["b"].reshape(1, cm).astype(jnp.float32)
    xpad_slab = pl.pallas_call(
        functools.partial(_stem1_kernel, width=wq, n_rows=pa),
        out_shape=jax.ShapeDtypeStruct((n, pa, cm), COMPUTE_DTYPE),
        grid=(n,),
        in_specs=[pl.BlockSpec((None, pa_in, 4 * c1), lambda i: (i, 0, 0)),
                  pl.BlockSpec((4, 4 * c1, cm), lambda i: (0, 0, 0)),
                  pl.BlockSpec((1, cm), lambda i: (0, 0)),
                  pl.BlockSpec((pa, 1), lambda i: (0, 0))],
        out_specs=pl.BlockSpec((None, pa, cm), lambda i: (i, 0, 0)),
        compiler_params=par,
    )(s1_in, w1, b1, mask)

    # ---- kernel B: stem2a + F.pad + stem2b + maxpool ------------------------------------------
    w2a = _fold_s1_weights(params["stem2a"]["w"]).astype(COMPUTE_DTYPE)
    b2a = params["stem2a"]["b"].reshape(1, cmh).astype(jnp.float32)
    w2b = _fold_s1_weights(params["stem2b"]["w"]).astype(COMPUTE_DTYPE)
    b2b = params["stem2b"]["b"].reshape(1, cm).astype(jnp.float32)
    x1_slab, x2_slab = pl.pallas_call(
        functools.partial(_stem2_pool_kernel, width=wq, n_rows=pq, n_rows_z=pz),
        out_shape=(jax.ShapeDtypeStruct((n, pq, cm), COMPUTE_DTYPE),
                   jax.ShapeDtypeStruct((n, pq, cm), COMPUTE_DTYPE)),
        grid=(n,),
        in_specs=[pl.BlockSpec((None, pa, cm), lambda i: (i, 0, 0)),
                  pl.BlockSpec((4, cm, cmh), lambda i: (0, 0, 0)),
                  pl.BlockSpec((1, cmh), lambda i: (0, 0)),
                  pl.BlockSpec((4, cmh, cm), lambda i: (0, 0, 0)),
                  pl.BlockSpec((1, cm), lambda i: (0, 0)),
                  pl.BlockSpec((pa, 1), lambda i: (0, 0))],
        out_specs=(pl.BlockSpec((None, pq, cm), lambda i: (i, 0, 0)),
                   pl.BlockSpec((None, pq, cm), lambda i: (i, 0, 0))),
        scratch_shapes=[pltpu.VMEM((pz, cmh), COMPUTE_DTYPE)],
        compiler_params=par,
    )(xpad_slab, w2a, b2a, w2b, b2b, mask)

    # ---- kernel C: stem3 (on the never-materialized concat) + stem4 ---------------------------
    ho3, wo3 = (ho1 - 1) // 2 + 1, (wo1 - 1) // 2 + 1
    hs3 = (ho1 + 2 + (ho1 % 2)) // 2
    ws3 = (wo1 + 2 + (wo1 % 2)) // 2
    pg3 = hs3 * ws3
    pc_in = pg3 + ws3 + 1

    def _branch_slab(slab):
        # (n, pq, cm), row-major (hq, wq) grid; right/bottom zeros already present (mask),
        # add the left/top zero row/col -> stem3's zero-padded input, then space-to-depth.
        v = slab.reshape(n, hq, wq, cm)
        v = jnp.pad(v, ((0, 0), (1, 0), (1, 0), (0, 0)))
        s, h3, w3_ = _space_to_depth_slab(v, pc_in - pg3)
        assert (h3, w3_) == (hs3, ws3)
        return s

    x1s = _branch_slab(x1_slab)
    x2s = _branch_slab(x2_slab)

    w3a = _fold_s2_weights(params["stem3"]["w"][:, :cm]).astype(COMPUTE_DTYPE)
    w3b = _fold_s2_weights(params["stem3"]["w"][:, cm:]).astype(COMPUTE_DTYPE)
    b3 = params["stem3"]["b"].reshape(1, cm).astype(jnp.float32)
    w4 = params["stem4"]["w"].reshape(c2, cm).T.astype(COMPUTE_DTYPE)
    b4 = params["stem4"]["b"].reshape(1, c2).astype(jnp.float32)

    out_ext = pl.pallas_call(
        functools.partial(_stem34_kernel, width=ws3, n_rows=pg3),
        out_shape=jax.ShapeDtypeStruct((n, pg3, c2), jnp.float32),
        grid=(n,),
        in_specs=[pl.BlockSpec((None, pc_in, 4 * cm), lambda i: (i, 0, 0)),
                  pl.BlockSpec((None, pc_in, 4 * cm), lambda i: (i, 0, 0)),
                  pl.BlockSpec((4, 4 * cm, cm), lambda i: (0, 0, 0)),
                  pl.BlockSpec((4, 4 * cm, cm), lambda i: (0, 0, 0)),
                  pl.BlockSpec((1, cm), lambda i: (0, 0)),
                  pl.BlockSpec((cm, c2), lambda i: (0, 0)),
                  pl.BlockSpec((1, c2), lambda i: (0, 0))],
        out_specs=pl.BlockSpec((None, pg3, c2), lambda i: (i, 0, 0)),
        compiler_params=par,
    )(x1s, x2s, w3a, w3b, b3, w4, b4)

    out = out_ext.reshape(n, hs3, ws3, c2)[:, :ho3, :wo3, :]
    return jnp.transpose(out, (0, 3, 1, 2))                  # NHWC -> NCHW


# ---------------------------- parameter generation ---------------------------

def init_hgstem_params(key, c1, cm, c2, bn_eps=1e-5):
    """Synthetic HGStem parameters; BatchNorm folded into the conv weights (eval mode)."""
    def fold_conv_bn(k, cin, cout, ksz):
        kw_, kg, kb, km, kv = jax.random.split(k, 5)
        wt = jax.random.normal(kw_, (cout, cin, ksz, ksz), jnp.float32)
        wt = wt / jnp.sqrt(float(cin * ksz * ksz))
        gamma = jax.random.uniform(kg, (cout,), jnp.float32, 0.5, 1.5)
        beta = 0.1 * jax.random.normal(kb, (cout,), jnp.float32)
        mean = 0.1 * jax.random.normal(km, (cout,), jnp.float32)
        var = jax.random.uniform(kv, (cout,), jnp.float32, 0.5, 1.5)
        scale = gamma / jnp.sqrt(var + bn_eps)
        return {"w": wt * scale[:, None, None, None], "b": beta - mean * scale}

    k1, k2a, k2b, k3, k4 = jax.random.split(key, 5)
    return {"stem1": fold_conv_bn(k1, c1, cm, 3),
            "stem2a": fold_conv_bn(k2a, cm, cm // 2, 2),
            "stem2b": fold_conv_bn(k2b, cm // 2, cm, 2),
            "stem3": fold_conv_bn(k3, cm * 2, cm, 3),
            "stem4": fold_conv_bn(k4, cm, c2, 1)}


# ----------------------------- pure-JAX reference ----------------------------

def _ref_hgstem(x_nchw, params):
    def conv(x, wt, b, stride, pad):
        y = lax.conv_general_dilated(
            x, wt, window_strides=(stride, stride),
            padding=[(pad, pad), (pad, pad)],
            dimension_numbers=("NCHW", "OIHW", "NCHW"))
        return y + b.reshape(1, -1, 1, 1)

    def silu(v):
        return v * jax.nn.sigmoid(v)

    x = silu(conv(x_nchw, params["stem1"]["w"], params["stem1"]["b"], 2, 1))
    x = jnp.pad(x, ((0, 0), (0, 0), (0, 1), (0, 1)))
    x2 = silu(conv(x, params["stem2a"]["w"], params["stem2a"]["b"], 1, 0))
    x2 = jnp.pad(x2, ((0, 0), (0, 0), (0, 1), (0, 1)))
    x2 = silu(conv(x2, params["stem2b"]["w"], params["stem2b"]["b"], 1, 0))
    x1 = lax.reduce_window(x, -jnp.inf, lax.max, (1, 1, 2, 2), (1, 1, 1, 1), "VALID")
    x = jnp.concatenate([x1, x2], axis=1)
    x = silu(conv(x, params["stem3"]["w"], params["stem3"]["b"], 2, 1))
    x = silu(conv(x, params["stem4"]["w"], params["stem4"]["b"], 1, 0))
    return x


if __name__ == "__main__":
    key = jax.random.PRNGKey(0)
    kx, kp = jax.random.split(key)

    N, C1, H, W = 2, 3, 16, 16
    CM, C2 = 16, 32

    x = jax.random.normal(kx, (N, C1, H, W), jnp.float32)
    params = init_hgstem_params(kp, C1, CM, C2)

    out = jax.jit(hgstem_forward)(x, params)
    out = jax.block_until_ready(out)

    Ho1, Wo1 = (H - 1) // 2 + 1, (W - 1) // 2 + 1
    Ho3, Wo3 = (Ho1 - 1) // 2 + 1, (Wo1 - 1) // 2 + 1
    assert out.shape == (N, C2, Ho3, Wo3), out.shape

    ref = _ref_hgstem(x, params)
    max_err = float(jnp.max(jnp.abs(out - ref)))
    # bf16 matmul operands + approx-reciprocal SiLU epilogue -> bf16-level tolerance vs f32 ref.
    assert jnp.allclose(out, ref, rtol=5e-2, atol=5e-2), max_err

    print("KERNEL_OK")
</pallas_src>

<mosaic_0001>
module attributes {stable_mosaic.version = 11 : i64} {
  func.func @_stem2_pool_kernel(%arg0: i32, %arg1: memref<1x101x16xbf16, #tpu.memory_space<vmem>>, %arg2: memref<4x16x8xbf16, #tpu.memory_space<vmem>>, %arg3: memref<1x8xf32, #tpu.memory_space<vmem>>, %arg4: memref<4x8x16xbf16, #tpu.memory_space<vmem>>, %arg5: memref<1x16xf32, #tpu.memory_space<vmem>>, %arg6: memref<101x1xf32, #tpu.memory_space<vmem>>, %arg7: memref<1x81x16xbf16, #tpu.memory_space<vmem>>, %arg8: memref<1x81x16xbf16, #tpu.memory_space<vmem>>, %arg9: memref<91x8xbf16, #tpu.memory_space<vmem>>) attributes {dimension_semantics = [#tpu.dimension_semantics<parallel>], iteration_bounds = array<i64: 2>, scalar_prefetch = 0 : i64, scratch_operands = 1 : i64, tpu.core_type = #tpu.core_type<tc>, window_params = [{transform_indices = @transform_0, window_bounds = array<i64: 1, 101, 16>}, {pipeline_mode = #tpu.pipeline_mode<synchronous>, transform_indices = @transform_1, window_bounds = array<i64: 4, 16, 8>}, {pipeline_mode = #tpu.pipeline_mode<synchronous>, transform_indices = @transform_2, window_bounds = array<i64: 1, 8>}, {pipeline_mode = #tpu.pipeline_mode<synchronous>, transform_indices = @transform_3, window_bounds = array<i64: 4, 8, 16>}, {pipeline_mode = #tpu.pipeline_mode<synchronous>, transform_indices = @transform_4, window_bounds = array<i64: 1, 16>}, {pipeline_mode = #tpu.pipeline_mode<synchronous>, transform_indices = @transform_5, window_bounds = array<i64: 101, 1>}, {transform_indices = @transform_6, window_bounds = array<i64: 1, 81, 16>}, {transform_indices = @transform_7, window_bounds = array<i64: 1, 81, 16>}]} {
    %cst = arith.constant 0.000000e+00 : f32
    %0 = vector.broadcast %cst : f32 to vector<91x8xf32>
    %c0 = arith.constant 0 : index
    %c0_0 = arith.constant 0 : index
    %c0_1 = arith.constant 0 : index
    %1 = vector.load %arg1[%c0, %c0_0, %c0_1] : memref<1x101x16xbf16, #tpu.memory_space<vmem>>, vector<1x91x16xbf16>
    %2 = vector.shape_cast %1 : vector<1x91x16xbf16> to vector<91x16xbf16>
    %c0_2 = arith.constant 0 : index
    %c0_3 = arith.constant 0 : index
    %c0_4 = arith.constant 0 : index
    %3 = vector.load %arg2[%c0_2, %c0_3, %c0_4] : memref<4x16x8xbf16, #tpu.memory_space<vmem>>, vector<1x16x8xbf16>
    %4 = vector.shape_cast %3 : vector<1x16x8xbf16> to vector<16x8xbf16>
    %cst_5 = arith.constant dense<0.000000e+00> : vector<91x8xf32>
    %5 = tpu.matmul %2, %4, %cst_5 {dimension_numbers = #tpu.dot_dimension_numbers<[1], [0], [0], [1], [0, 0, 1, 1], [], []>} : vector<91x16xbf16>, vector<16x8xbf16>, vector<91x8xf32> -> vector<91x8xf32>
    %6 = arith.addf %0, %5 : vector<91x8xf32>
    %c0_6 = arith.constant 0 : index
    %c1 = arith.constant 1 : index
    %c0_7 = arith.constant 0 : index
    %7 = vector.load %arg1[%c0_6, %c1, %c0_7] : memref<1x101x16xbf16, #tpu.memory_space<vmem>>, vector<1x91x16xbf16>
    %8 = vector.shape_cast %7 : vector<1x91x16xbf16> to vector<91x16xbf16>
    %c1_8 = arith.constant 1 : index
    %c0_9 = arith.constant 0 : index
    %c0_10 = arith.constant 0 : index
    %9 = vector.load %arg2[%c1_8, %c0_9, %c0_10] : memref<4x16x8xbf16, #tpu.memory_space<vmem>>, vector<1x16x8xbf16>
    %10 = vector.shape_cast %9 : vector<1x16x8xbf16> to vector<16x8xbf16>
    %cst_11 = arith.constant dense<0.000000e+00> : vector<91x8xf32>
    %11 = tpu.matmul %8, %10, %cst_11 {dimension_numbers = #tpu.dot_dimension_numbers<[1], [0], [0], [1], [0, 0, 1, 1], [], []>} : vector<91x16xbf16>, vector<16x8xbf16>, vector<91x8xf32> -> vector<91x8xf32>
    %12 = arith.addf %6, %11 : vector<91x8xf32>
    %c0_12 = arith.constant 0 : index
    %c9 = arith.constant 9 : index
    %c0_13 = arith.constant 0 : index
    %13 = vector.load %arg1[%c0_12, %c9, %c0_13] : memref<1x101x16xbf16, #tpu.memory_space<vmem>>, vector<1x91x16xbf16>
    %14 = vector.shape_cast %13 : vector<1x91x16xbf16> to vector<91x16xbf16>
    %c2 = arith.constant 2 : index
    %c0_14 = arith.constant 0 : index
    %c0_15 = arith.constant 0 : index
    %15 = vector.load %arg2[%c2, %c0_14, %c0_15] : memref<4x16x8xbf16, #tpu.memory_space<vmem>>, vector<1x16x8xbf16>
    %16 = vector.shape_cast %15 : vector<1x16x8xbf16> to vector<16x8xbf16>
    %cst_16 = arith.constant dense<0.000000e+00> : vector<91x8xf32>
    %17 = tpu.matmul %14, %16, %cst_16 {dimension_numbers = #tpu.dot_dimension_numbers<[1], [0], [0], [1], [0, 0, 1, 1], [], []>} : vector<91x16xbf16>, vector<16x8xbf16>, vector<91x8xf32> -> vector<91x8xf32>
    %18 = arith.addf %12, %17 : vector<91x8xf32>
    %c0_17 = arith.constant 0 : index
    %c10 = arith.constant 10 : index
    %c0_18 = arith.constant 0 : index
    %19 = vector.load %arg1[%c0_17, %c10, %c0_18] : memref<1x101x16xbf16, #tpu.memory_space<vmem>>, vector<1x91x16xbf16>
    %20 = vector.shape_cast %19 : vector<1x91x16xbf16> to vector<91x16xbf16>
    %c3 = arith.constant 3 : index
    %c0_19 = arith.constant 0 : index
    %c0_20 = arith.constant 0 : index
    %21 = vector.load %arg2[%c3, %c0_19, %c0_20] : memref<4x16x8xbf16, #tpu.memory_space<vmem>>, vector<1x16x8xbf16>
    %22 = vector.shape_cast %21 : vector<1x16x8xbf16> to vector<16x8xbf16>
    %cst_21 = arith.constant dense<0.000000e+00> : vector<91x8xf32>
    %23 = tpu.matmul %20, %22, %cst_21 {dimension_numbers = #tpu.dot_dimension_numbers<[1], [0], [0], [1], [0, 0, 1, 1], [], []>} : vector<91x16xbf16>, vector<16x8xbf16>, vector<91x8xf32> -> vector<91x8xf32>
    %24 = arith.addf %18, %23 : vector<91x8xf32>
    %c0_22 = arith.constant 0 : index
    %c0_23 = arith.constant 0 : index
    %25 = vector.load %arg3[%c0_22, %c0_23] : memref<1x8xf32, #tpu.memory_space<vmem>>, vector<1x8xf32>
    %26 = vector.broadcast %25 : vector<1x8xf32> to vector<91x8xf32>
    %27 = arith.addf %24, %26 : vector<91x8xf32>
    %cst_24 = arith.constant 0.000000e+00 : f32
    %28 = vector.broadcast %cst_24 : f32 to vector<91x8xf32>
    %29 = arith.subf %28, %27 : vector<91x8xf32>
    %30 = math.exp %29 : vector<91x8xf32>
    %cst_25 = arith.constant 1.000000e+00 : f32
    %31 = vector.broadcast %cst_25 : f32 to vector<91x8xf32>
    %32 = arith.addf %31, %30 : vector<91x8xf32>
    %33 = tpu.reciprocal %32 {approx = true} : vector<91x8xf32> -> vector<91x8xf32>
    %34 = arith.mulf %27, %33 : vector<91x8xf32>
    %c0_26 = arith.constant 0 : index
    %c0_27 = arith.constant 0 : index
    %35 = vector.load %arg6[%c0_26, %c0_27] : memref<101x1xf32, #tpu.memory_space<vmem>>, vector<91x1xf32>
    %36 = vector.broadcast %35 : vector<91x1xf32> to vector<91x8xf32>
    %37 = arith.mulf %34, %36 : vector<91x8xf32>
    %38 = arith.truncf %37 : vector<91x8xf32> to vector<91x8xbf16>
    %c0_28 = arith.constant 0 : index
    %c0_29 = arith.constant 0 : index
    %39 = vector.load %arg9[%c0_28, %c0_29] : memref<91x8xbf16, #tpu.memory_space<vmem>>, vector<91x8xbf16>
    tpu.vector_store %arg9[%c0_28, %c0_29], %38 {strides = array<i32>} : memref<91x8xbf16, #tpu.memory_space<vmem>>, vector<91x8xbf16>,
    %c0_30 = arith.constant 0 : index
    %c0_31 = arith.constant 0 : index
    %40 = vector.load %arg6[%c0_30, %c0_31] : memref<101x1xf32, #tpu.memory_space<vmem>>, vector<81x1xf32>
    %cst_32 = arith.constant 0.000000e+00 : f32
    %41 = vector.broadcast %cst_32 : f32 to vector<81x16xf32>
    %c0_33 = arith.constant 0 : index
    %c0_34 = arith.constant 0 : index
    %42 = vector.load %arg9[%c0_33, %c0_34] : memref<91x8xbf16, #tpu.memory_space<vmem>>, vector<81x8xbf16>
    %c0_35 = arith.constant 0 : index
    %c0_36 = arith.constant 0 : index
    %c0_37 = arith.constant 0 : index
    %43 = vector.load %arg4[%c0_35, %c0_36, %c0_37] : memref<4x8x16xbf16, #tpu.memory_space<vmem>>, vector<1x8x16xbf16>
    %44 = vector.shape_cast %43 : vector<1x8x16xbf16> to vector<8x16xbf16>
    %cst_38 = arith.constant dense<0.000000e+00> : vector<81x16xf32>
    %45 = tpu.matmul %42, %44, %cst_38 {dimension_numbers = #tpu.dot_dimension_numbers<[1], [0], [0], [1], [0, 0, 1, 1], [], []>} : vector<81x8xbf16>, vector<8x16xbf16>, vector<81x16xf32> -> vector<81x16xf32>
    %46 = arith.addf %41, %45 : vector<81x16xf32>
    %c1_39 = arith.constant 1 : index
    %c0_40 = arith.constant 0 : index
    %47 = vector.load %arg9[%c1_39, %c0_40] : memref<91x8xbf16, #tpu.memory_space<vmem>>, vector<81x8xbf16>
    %c1_41 = arith.constant 1 : index
    %c0_42 = arith.constant 0 : index
    %c0_43 = arith.constant 0 : index
    %48 = vector.load %arg4[%c1_41, %c0_42, %c0_43] : memref<4x8x16xbf16, #tpu.memory_space<vmem>>, vector<1x8x16xbf16>
    %49 = vector.shape_cast %48 : vector<1x8x16xbf16> to vector<8x16xbf16>
    %cst_44 = arith.constant dense<0.000000e+00> : vector<81x16xf32>
    %50 = tpu.matmul %47, %49, %cst_44 {dimension_numbers = #tpu.dot_dimension_numbers<[1], [0], [0], [1], [0, 0, 1, 1], [], []>} : vector<81x8xbf16>, vector<8x16xbf16>, vector<81x16xf32> -> vector<81x16xf32>
    %51 = arith.addf %46, %50 : vector<81x16xf32>
    %c9_45 = arith.constant 9 : index
    %c0_46 = arith.constant 0 : index
    %52 = vector.load %arg9[%c9_45, %c0_46] : memref<91x8xbf16, #tpu.memory_space<vmem>>, vector<81x8xbf16>
    %c2_47 = arith.constant 2 : index
    %c0_48 = arith.constant 0 : index
    %c0_49 = arith.constant 0 : index
    %53 = vector.load %arg4[%c2_47, %c0_48, %c0_49] : memref<4x8x16xbf16, #tpu.memory_space<vmem>>, vector<1x8x16xbf16>
    %54 = vector.shape_cast %53 : vector<1x8x16xbf16> to vector<8x16xbf16>
    %cst_50 = arith.constant dense<0.000000e+00> : vector<81x16xf32>
    %55 = tpu.matmul %52, %54, %cst_50 {dimension_numbers = #tpu.dot_dimension_numbers<[1], [0], [0], [1], [0, 0, 1, 1], [], []>} : vector<81x8xbf16>, vector<8x16xbf16>, vector<81x16xf32> -> vector<81x16xf32>
    %56 = arith.addf %51, %55 : vector<81x16xf32>
    %c10_51 = arith.constant 10 : index
    %c0_52 = arith.constant 0 : index
    %57 = vector.load %arg9[%c10_51, %c0_52] : memref<91x8xbf16, #tpu.memory_space<vmem>>, vector<81x8xbf16>
    %c3_53 = arith.constant 3 : index
    %c0_54 = arith.constant 0 : index
    %c0_55 = arith.constant 0 : index
    %58 = vector.load %arg4[%c3_53, %c0_54, %c0_55] : memref<4x8x16xbf16, #tpu.memory_space<vmem>>, vector<1x8x16xbf16>
    %59 = vector.shape_cast %58 : vector<1x8x16xbf16> to vector<8x16xbf16>
    %cst_56 = arith.constant dense<0.000000e+00> : vector<81x16xf32>
    %60 = tpu.matmul %57, %59, %cst_56 {dimension_numbers = #tpu.dot_dimension_numbers<[1], [0], [0], [1], [0, 0, 1, 1], [], []>} : vector<81x8xbf16>, vector<8x16xbf16>, vector<81x16xf32> -> vector<81x16xf32>
    %61 = arith.addf %56, %60 : vector<81x16xf32>
    %c0_57 = arith.constant 0 : index
    %c0_58 = arith.constant 0 : index
    %62 = vector.load %arg5[%c0_57, %c0_58] : memref<1x16xf32, #tpu.memory_space<vmem>>, vector<1x16xf32>
    %63 = vector.broadcast %62 : vector<1x16xf32> to vector<81x16xf32>
    %64 = arith.addf %61, %63 : vector<81x16xf32>
    %cst_59 = arith.constant 0.000000e+00 : f32
    %65 = vector.broadcast %cst_59 : f32 to vector<81x16xf32>
    %66 = arith.subf %65, %64 : vector<81x16xf32>
    %67 = math.exp %66 : vector<81x16xf32>
    %cst_60 = arith.constant 1.000000e+00 : f32
    %68 = vector.broadcast %cst_60 : f32 to vector<81x16xf32>
    %69 = arith.addf %68, %67 : vector<81x16xf32>
    %70 = tpu.reciprocal %69 {approx = true} : vector<81x16xf32> -> vector<81x16xf32>
    %71 = arith.mulf %64, %70 : vector<81x16xf32>
    %72 = vector.broadcast %40 : vector<81x1xf32> to vector<81x16xf32>
    %73 = arith.mulf %71, %72 : vector<81x16xf32>
    %74 = arith.truncf %73 : vector<81x16xf32> to vector<81x16xbf16>
    %c0_61 = arith.constant 0 : index
    %c0_62 = arith.constant 0 : index
    %c0_63 = arith.constant 0 : index
    %75 = vector.load %arg8[%c0_61, %c0_62, %c0_63] : memref<1x81x16xbf16, #tpu.memory_space<vmem>>, vector<1x81x16xbf16>
    %76 = vector.shape_cast %75 : vector<1x81x16xbf16> to vector<81x16xbf16>
    %77 = vector.shape_cast %74 : vector<81x16xbf16> to vector<1x81x16xbf16>
    tpu.vector_store %arg8[%c0_61, %c0_62, %c0_63], %77 {strides = array<i32>} : memref<1x81x16xbf16, #tpu.memory_space<vmem>>, vector<1x81x16xbf16>,
    %c0_64 = arith.constant 0 : index
    %c0_65 = arith.constant 0 : index
    %c0_66 = arith.constant 0 : index
    %78 = vector.load %arg1[%c0_64, %c0_65, %c0_66] : memref<1x101x16xbf16, #tpu.memory_space<vmem>>, vector<1x81x16xbf16>
    %79 = vector.shape_cast %78 : vector<1x81x16xbf16> to vector<81x16xbf16>
    %80 = arith.extf %79 : vector<81x16xbf16> to vector<81x16xf32>
    %c0_67 = arith.constant 0 : index
    %c1_68 = arith.constant 1 : index
    %c0_69 = arith.constant 0 : index
    %81 = vector.load %arg1[%c0_67, %c1_68, %c0_69] : memref<1x101x16xbf16, #tpu.memory_space<vmem>>, vector<1x81x16xbf16>
    %82 = vector.shape_cast %81 : vector<1x81x16xbf16> to vector<81x16xbf16>
    %83 = arith.extf %82 : vector<81x16xbf16> to vector<81x16xf32>
    %84 = arith.maximumf %80, %83 : vector<81x16xf32>
    %c0_70 = arith.constant 0 : index
    %c9_71 = arith.constant 9 : index
    %c0_72 = arith.constant 0 : index
    %85 = vector.load %arg1[%c0_70, %c9_71, %c0_72] : memref<1x101x16xbf16, #tpu.memory_space<vmem>>, vector<1x81x16xbf16>
    %86 = vector.shape_cast %85 : vector<1x81x16xbf16> to vector<81x16xbf16>
    %87 = arith.extf %86 : vector<81x16xbf16> to vector<81x16xf32>
    %88 = arith.maximumf %84, %87 : vector<81x16xf32>
    %c0_73 = arith.constant 0 : index
    %c10_74 = arith.constant 10 : index
    %c0_75 = arith.constant 0 : index
    %89 = vector.load %arg1[%c0_73, %c10_74, %c0_75] : memref<1x101x16xbf16, #tpu.memory_space<vmem>>, vector<1x81x16xbf16>
    %90 = vector.shape_cast %89 : vector<1x81x16xbf16> to vector<81x16xbf16>
    %91 = arith.extf %90 : vector<81x16xbf16> to vector<81x16xf32>
    %92 = arith.maximumf %88, %91 : vector<81x16xf32>
    %93 = vector.broadcast %40 : vector<81x1xf32> to vector<81x16xf32>
    %94 = arith.mulf %92, %93 : vector<81x16xf32>
    %95 = arith.truncf %94 : vector<81x16xf32> to vector<81x16xbf16>
    %c0_76 = arith.constant 0 : index
    %c0_77 = arith.constant 0 : index
    %c0_78 = arith.constant 0 : index
    %96 = vector.load %arg7[%c0_76, %c0_77, %c0_78] : memref<1x81x16xbf16, #tpu.memory_space<vmem>>, vector<1x81x16xbf16>
    %97 = vector.shape_cast %96 : vector<1x81x16xbf16> to vector<81x16xbf16>
    %98 = vector.shape_cast %95 : vector<81x16xbf16> to vector<1x81x16xbf16>
    tpu.vector_store %arg7[%c0_76, %c0_77, %c0_78], %98 {strides = array<i32>} : memref<1x81x16xbf16, #tpu.memory_space<vmem>>, vector<1x81x16xbf16>,
    return
  }
  func.func @transform_0(%arg0: i32) -> (i32, i32, i32) {
    %c0_i32 = arith.constant 0 : i32
    %c0_i32_0 = arith.constant 0 : i32
    %c0_i32_1 = arith.constant 0 : i32
    return %arg0, %c0_i32, %c0_i32_0 : i32, i32, i32
  }
  func.func @transform_1(%arg0: i32) -> (i32, i32, i32) {
    %c0_i32 = arith.constant 0 : i32
    %c0_i32_0 = arith.constant 0 : i32
    %c0_i32_1 = arith.constant 0 : i32
    %c0_i32_2 = arith.constant 0 : i32
    return %c0_i32, %c0_i32_0, %c0_i32_1 : i32, i32, i32
  }
  func.func @transform_2(%arg0: i32) -> (i32, i32) {
    %c0_i32 = arith.constant 0 : i32
    %c0_i32_0 = arith.constant 0 : i32
    %c0_i32_1 = arith.constant 0 : i32
    return %c0_i32, %c0_i32_0 : i32, i32
  }
  func.func @transform_3(%arg0: i32) -> (i32, i32, i32) {
    %c0_i32 = arith.constant 0 : i32
    %c0_i32_0 = arith.constant 0 : i32
    %c0_i32_1 = arith.constant 0 : i32
    %c0_i32_2 = arith.constant 0 : i32
    return %c0_i32, %c0_i32_0, %c0_i32_1 : i32, i32, i32
  }
  func.func @transform_4(%arg0: i32) -> (i32, i32) {
    %c0_i32 = arith.constant 0 : i32
    %c0_i32_0 = arith.constant 0 : i32
    %c0_i32_1 = arith.constant 0 : i32
    return %c0_i32, %c0_i32_0 : i32, i32
  }
  func.func @transform_5(%arg0: i32) -> (i32, i32) {
    %c0_i32 = arith.constant 0 : i32
    %c0_i32_0 = arith.constant 0 : i32
    %c0_i32_1 = arith.constant 0 : i32
    return %c0_i32, %c0_i32_0 : i32, i32
  }
  func.func @transform_6(%arg0: i32) -> (i32, i32, i32) {
    %c0_i32 = arith.constant 0 : i32
    %c0_i32_0 = arith.constant 0 : i32
    %c0_i32_1 = arith.constant 0 : i32
    return %arg0, %c0_i32, %c0_i32_0 : i32, i32, i32
  }
  func.func @transform_7(%arg0: i32) -> (i32, i32, i32) {
    %c0_i32 = arith.constant 0 : i32
    %c0_i32_0 = arith.constant 0 : i32
    %c0_i32_1 = arith.constant 0 : i32
    return %arg0, %c0_i32, %c0_i32_0 : i32, i32, i32
  }
}

module attributes {stable_mosaic.version = 11 : i64} {
  func.func @_stem1_kernel(%arg0: i32, %arg1: memref<1x111x12xbf16, #tpu.memory_space<vmem>>, %arg2: memref<4x12x16xbf16, #tpu.memory_space<vmem>>, %arg3: memref<1x16xf32, #tpu.memory_space<vmem>>, %arg4: memref<101x1xf32, #tpu.memory_space<vmem>>, %arg5: memref<1x101x16xbf16, #tpu.memory_space<vmem>>) attributes {dimension_semantics = [#tpu.dimension_semantics<parallel>], iteration_bounds = array<i64: 2>, scalar_prefetch = 0 : i64, scratch_operands = 0 : i64, tpu.core_type = #tpu.core_type<tc>, window_params = [{transform_indices = @transform_0, window_bounds = array<i64: 1, 111, 12>}, {pipeline_mode = #tpu.pipeline_mode<synchronous>, transform_indices = @transform_1, window_bounds = array<i64: 4, 12, 16>}, {pipeline_mode = #tpu.pipeline_mode<synchronous>, transform_indices = @transform_2, window_bounds = array<i64: 1, 16>}, {pipeline_mode = #tpu.pipeline_mode<synchronous>, transform_indices = @transform_3, window_bounds = array<i64: 101, 1>}, {transform_indices = @transform_4, window_bounds = array<i64: 1, 101, 16>}]} {
    %cst = arith.constant 0.000000e+00 : f32
    %0 = vector.broadcast %cst : f32 to vector<101x16xf32>
    %c0 = arith.constant 0 : index
    %c0_0 = arith.constant 0 : index
    %c0_1 = arith.constant 0 : index
    %1 = vector.load %arg1[%c0, %c0_0, %c0_1] : memref<1x111x12xbf16, #tpu.memory_space<vmem>>, vector<1x101x12xbf16>
    %2 = vector.shape_cast %1 : vector<1x101x12xbf16> to vector<101x12xbf16>
    %c0_2 = arith.constant 0 : index
    %c0_3 = arith.constant 0 : index
    %c0_4 = arith.constant 0 : index
    %3 = vector.load %arg2[%c0_2, %c0_3, %c0_4] : memref<4x12x16xbf16, #tpu.memory_space<vmem>>, vector<1x12x16xbf16>
    %4 = vector.shape_cast %3 : vector<1x12x16xbf16> to vector<12x16xbf16>
    %cst_5 = arith.constant dense<0.000000e+00> : vector<101x16xf32>
    %5 = tpu.matmul %2, %4, %cst_5 {dimension_numbers = #tpu.dot_dimension_numbers<[1], [0], [0], [1], [0, 0, 1, 1], [], []>} : vector<101x12xbf16>, vector<12x16xbf16>, vector<101x16xf32> -> vector<101x16xf32>
    %6 = arith.addf %0, %5 : vector<101x16xf32>
    %c0_6 = arith.constant 0 : index
    %c1 = arith.constant 1 : index
    %c0_7 = arith.constant 0 : index
    %7 = vector.load %arg1[%c0_6, %c1, %c0_7] : memref<1x111x12xbf16, #tpu.memory_space<vmem>>, vector<1x101x12xbf16>
    %8 = vector.shape_cast %7 : vector<1x101x12xbf16> to vector<101x12xbf16>
    %c1_8 = arith.constant 1 : index
    %c0_9 = arith.constant 0 : index
    %c0_10 = arith.constant 0 : index
    %9 = vector.load %arg2[%c1_8, %c0_9, %c0_10] : memref<4x12x16xbf16, #tpu.memory_space<vmem>>, vector<1x12x16xbf16>
    %10 = vector.shape_cast %9 : vector<1x12x16xbf16> to vector<12x16xbf16>
    %cst_11 = arith.constant dense<0.000000e+00> : vector<101x16xf32>
    %11 = tpu.matmul %8, %10, %cst_11 {dimension_numbers = #tpu.dot_dimension_numbers<[1], [0], [0], [1], [0, 0, 1, 1], [], []>} : vector<101x12xbf16>, vector<12x16xbf16>, vector<101x16xf32> -> vector<101x16xf32>
    %12 = arith.addf %6, %11 : vector<101x16xf32>
    %c0_12 = arith.constant 0 : index
    %c9 = arith.constant 9 : index
    %c0_13 = arith.constant 0 : index
    %13 = vector.load %arg1[%c0_12, %c9, %c0_13] : memref<1x111x12xbf16, #tpu.memory_space<vmem>>, vector<1x101x12xbf16>
    %14 = vector.shape_cast %13 : vector<1x101x12xbf16> to vector<101x12xbf16>
    %c2 = arith.constant 2 : index
    %c0_14 = arith.constant 0 : index
    %c0_15 = arith.constant 0 : index
    %15 = vector.load %arg2[%c2, %c0_14, %c0_15] : memref<4x12x16xbf16, #tpu.memory_space<vmem>>, vector<1x12x16xbf16>
    %16 = vector.shape_cast %15 : vector<1x12x16xbf16> to vector<12x16xbf16>
    %cst_16 = arith.constant dense<0.000000e+00> : vector<101x16xf32>
    %17 = tpu.matmul %14, %16, %cst_16 {dimension_numbers = #tpu.dot_dimension_numbers<[1], [0], [0], [1], [0, 0, 1, 1], [], []>} : vector<101x12xbf16>, vector<12x16xbf16>, vector<101x16xf32> -> vector<101x16xf32>
    %18 = arith.addf %12, %17 : vector<101x16xf32>
    %c0_17 = arith.constant 0 : index
    %c10 = arith.constant 10 : index
    %c0_18 = arith.constant 0 : index
    %19 = vector.load %arg1[%c0_17, %c10, %c0_18] : memref<1x111x12xbf16, #tpu.memory_space<vmem>>, vector<1x101x12xbf16>
    %20 = vector.shape_cast %19 : vector<1x101x12xbf16> to vector<101x12xbf16>
    %c3 = arith.constant 3 : index
    %c0_19 = arith.constant 0 : index
    %c0_20 = arith.constant 0 : index
    %21 = vector.load %arg2[%c3, %c0_19, %c0_20] : memref<4x12x16xbf16, #tpu.memory_space<vmem>>, vector<1x12x16xbf16>
    %22 = vector.shape_cast %21 : vector<1x12x16xbf16> to vector<12x16xbf16>
    %cst_21 = arith.constant dense<0.000000e+00> : vector<101x16xf32>
    %23 = tpu.matmul %20, %22, %cst_21 {dimension_numbers = #tpu.dot_dimension_numbers<[1], [0], [0], [1], [0, 0, 1, 1], [], []>} : vector<101x12xbf16>, vector<12x16xbf16>, vector<101x16xf32> -> vector<101x16xf32>
    %24 = arith.addf %18, %23 : vector<101x16xf32>
    %c0_22 = arith.constant 0 : index
    %c0_23 = arith.constant 0 : index
    %25 = vector.load %arg3[%c0_22, %c0_23] : memref<1x16xf32, #tpu.memory_space<vmem>>, vector<1x16xf32>
    %26 = vector.broadcast %25 : vector<1x16xf32> to vector<101x16xf32>
    %27 = arith.addf %24, %26 : vector<101x16xf32>
    %cst_24 = arith.constant 0.000000e+00 : f32
    %28 = vector.broadcast %cst_24 : f32 to vector<101x16xf32>
    %29 = arith.subf %28, %27 : vector<101x16xf32>
    %30 = math.exp %29 : vector<101x16xf32>
    %cst_25 = arith.constant 1.000000e+00 : f32
    %31 = vector.broadcast %cst_25 : f32 to vector<101x16xf32>
    %32 = arith.addf %31, %30 : vector<101x16xf32>
    %33 = tpu.reciprocal %32 {approx = true} : vector<101x16xf32> -> vector<101x16xf32>
    %34 = arith.mulf %27, %33 : vector<101x16xf32>
    %c0_26 = arith.constant 0 : index
    %c0_27 = arith.constant 0 : index
    %35 = vector.load %arg4[%c0_26, %c0_27] : memref<101x1xf32, #tpu.memory_space<vmem>>, vector<101x1xf32>
    %36 = vector.broadcast %35 : vector<101x1xf32> to vector<101x16xf32>
    %37 = arith.mulf %34, %36 : vector<101x16xf32>
    %38 = arith.truncf %37 : vector<101x16xf32> to vector<101x16xbf16>
    %c0_28 = arith.constant 0 : index
    %c0_29 = arith.constant 0 : index
    %c0_30 = arith.constant 0 : index
    %39 = vector.load %arg5[%c0_28, %c0_29, %c0_30] : memref<1x101x16xbf16, #tpu.memory_space<vmem>>, vector<1x101x16xbf16>
    %40 = vector.shape_cast %39 : vector<1x101x16xbf16> to vector<101x16xbf16>
    %41 = vector.shape_cast %38 : vector<101x16xbf16> to vector<1x101x16xbf16>
    tpu.vector_store %arg5[%c0_28, %c0_29, %c0_30], %41 {strides = array<i32>} : memref<1x101x16xbf16, #tpu.memory_space<vmem>>, vector<1x101x16xbf16>,
    return
  }
  func.func @transform_0(%arg0: i32) -> (i32, i32, i32) {
    %c0_i32 = arith.constant 0 : i32
    %c0_i32_0 = arith.constant 0 : i32
    %c0_i32_1 = arith.constant 0 : i32
    return %arg0, %c0_i32, %c0_i32_0 : i32, i32, i32
  }
  func.func @transform_1(%arg0: i32) -> (i32, i32, i32) {
    %c0_i32 = arith.constant 0 : i32
    %c0_i32_0 = arith.constant 0 : i32
    %c0_i32_1 = arith.constant 0 : i32
    %c0_i32_2 = arith.constant 0 : i32
    return %c0_i32, %c0_i32_0, %c0_i32_1 : i32, i32, i32
  }
  func.func @transform_2(%arg0: i32) -> (i32, i32) {
    %c0_i32 = arith.constant 0 : i32
    %c0_i32_0 = arith.constant 0 : i32
    %c0_i32_1 = arith.constant 0 : i32
    return %c0_i32, %c0_i32_0 : i32, i32
  }
  func.func @transform_3(%arg0: i32) -> (i32, i32) {
    %c0_i32 = arith.constant 0 : i32
    %c0_i32_0 = arith.constant 0 : i32
    %c0_i32_1 = arith.constant 0 : i32
    return %c0_i32, %c0_i32_0 : i32, i32
  }
  func.func @transform_4(%arg0: i32) -> (i32, i32, i32) {
    %c0_i32 = arith.constant 0 : i32
    %c0_i32_0 = arith.constant 0 : i32
    %c0_i32_1 = arith.constant 0 : i32
    return %arg0, %c0_i32, %c0_i32_0 : i32, i32, i32
  }
}

module attributes {stable_mosaic.version = 11 : i64} {
  func.func @_stem34_kernel(%arg0: i32, %arg1: memref<1x31x64xbf16, #tpu.memory_space<vmem>>, %arg2: memref<1x31x64xbf16, #tpu.memory_space<vmem>>, %arg3: memref<4x64x16xbf16, #tpu.memory_space<vmem>>, %arg4: memref<4x64x16xbf16, #tpu.memory_space<vmem>>, %arg5: memref<1x16xf32, #tpu.memory_space<vmem>>, %arg6: memref<16x32xbf16, #tpu.memory_space<vmem>>, %arg7: memref<1x32xf32, #tpu.memory_space<vmem>>, %arg8: memref<1x25x32xf32, #tpu.memory_space<vmem>>) attributes {dimension_semantics = [#tpu.dimension_semantics<parallel>], iteration_bounds = array<i64: 2>, scalar_prefetch = 0 : i64, scratch_operands = 0 : i64, tpu.core_type = #tpu.core_type<tc>, window_params = [{transform_indices = @transform_0, window_bounds = array<i64: 1, 31, 64>}, {transform_indices = @transform_1, window_bounds = array<i64: 1, 31, 64>}, {pipeline_mode = #tpu.pipeline_mode<synchronous>, transform_indices = @transform_2, window_bounds = array<i64: 4, 64, 16>}, {pipeline_mode = #tpu.pipeline_mode<synchronous>, transform_indices = @transform_3, window_bounds = array<i64: 4, 64, 16>}, {pipeline_mode = #tpu.pipeline_mode<synchronous>, transform_indices = @transform_4, window_bounds = array<i64: 1, 16>}, {pipeline_mode = #tpu.pipeline_mode<synchronous>, transform_indices = @transform_5, window_bounds = array<i64: 16, 32>}, {pipeline_mode = #tpu.pipeline_mode<synchronous>, transform_indices = @transform_6, window_bounds = array<i64: 1, 32>}, {transform_indices = @transform_7, window_bounds = array<i64: 1, 25, 32>}]} {
    %cst = arith.constant 0.000000e+00 : f32
    %0 = vector.broadcast %cst : f32 to vector<25x16xf32>
    %c0 = arith.constant 0 : index
    %c0_0 = arith.constant 0 : index
    %c0_1 = arith.constant 0 : index
    %1 = vector.load %arg1[%c0, %c0_0, %c0_1] : memref<1x31x64xbf16, #tpu.memory_space<vmem>>, vector<1x25x64xbf16>
    %2 = vector.shape_cast %1 : vector<1x25x64xbf16> to vector<25x64xbf16>
    %c0_2 = arith.constant 0 : index
    %c0_3 = arith.constant 0 : index
    %c0_4 = arith.constant 0 : index
    %3 = vector.load %arg3[%c0_2, %c0_3, %c0_4] : memref<4x64x16xbf16, #tpu.memory_space<vmem>>, vector<1x64x16xbf16>
    %4 = vector.shape_cast %3 : vector<1x64x16xbf16> to vector<64x16xbf16>
    %cst_5 = arith.constant dense<0.000000e+00> : vector<25x16xf32>
    %5 = tpu.matmul %2, %4, %cst_5 {dimension_numbers = #tpu.dot_dimension_numbers<[1], [0], [0], [1], [0, 0, 1, 1], [], []>} : vector<25x64xbf16>, vector<64x16xbf16>, vector<25x16xf32> -> vector<25x16xf32>
    %6 = arith.addf %0, %5 : vector<25x16xf32>
    %c0_6 = arith.constant 0 : index
    %c0_7 = arith.constant 0 : index
    %c0_8 = arith.constant 0 : index
    %7 = vector.load %arg2[%c0_6, %c0_7, %c0_8] : memref<1x31x64xbf16, #tpu.memory_space<vmem>>, vector<1x25x64xbf16>
    %8 = vector.shape_cast %7 : vector<1x25x64xbf16> to vector<25x64xbf16>
    %c0_9 = arith.constant 0 : index
    %c0_10 = arith.constant 0 : index
    %c0_11 = arith.constant 0 : index
    %9 = vector.load %arg4[%c0_9, %c0_10, %c0_11] : memref<4x64x16xbf16, #tpu.memory_space<vmem>>, vector<1x64x16xbf16>
    %10 = vector.shape_cast %9 : vector<1x64x16xbf16> to vector<64x16xbf16>
    %cst_12 = arith.constant dense<0.000000e+00> : vector<25x16xf32>
    %11 = tpu.matmul %8, %10, %cst_12 {dimension_numbers = #tpu.dot_dimension_numbers<[1], [0], [0], [1], [0, 0, 1, 1], [], []>} : vector<25x64xbf16>, vector<64x16xbf16>, vector<25x16xf32> -> vector<25x16xf32>
    %12 = arith.addf %6, %11 : vector<25x16xf32>
    %c0_13 = arith.constant 0 : index
    %c1 = arith.constant 1 : index
    %c0_14 = arith.constant 0 : index
    %13 = vector.load %arg1[%c0_13, %c1, %c0_14] : memref<1x31x64xbf16, #tpu.memory_space<vmem>>, vector<1x25x64xbf16>
    %14 = vector.shape_cast %13 : vector<1x25x64xbf16> to vector<25x64xbf16>
    %c1_15 = arith.constant 1 : index
    %c0_16 = arith.constant 0 : index
    %c0_17 = arith.constant 0 : index
    %15 = vector.load %arg3[%c1_15, %c0_16, %c0_17] : memref<4x64x16xbf16, #tpu.memory_space<vmem>>, vector<1x64x16xbf16>
    %16 = vector.shape_cast %15 : vector<1x64x16xbf16> to vector<64x16xbf16>
    %cst_18 = arith.constant dense<0.000000e+00> : vector<25x16xf32>
    %17 = tpu.matmul %14, %16, %cst_18 {dimension_numbers = #tpu.dot_dimension_numbers<[1], [0], [0], [1], [0, 0, 1, 1], [], []>} : vector<25x64xbf16>, vector<64x16xbf16>, vector<25x16xf32> -> vector<25x16xf32>
    %18 = arith.addf %12, %17 : vector<25x16xf32>
    %c0_19 = arith.constant 0 : index
    %c1_20 = arith.constant 1 : index
    %c0_21 = arith.constant 0 : index
    %19 = vector.load %arg2[%c0_19, %c1_20, %c0_21] : memref<1x31x64xbf16, #tpu.memory_space<vmem>>, vector<1x25x64xbf16>
    %20 = vector.shape_cast %19 : vector<1x25x64xbf16> to vector<25x64xbf16>
    %c1_22 = arith.constant 1 : index
    %c0_23 = arith.constant 0 : index
    %c0_24 = arith.constant 0 : index
    %21 = vector.load %arg4[%c1_22, %c0_23, %c0_24] : memref<4x64x16xbf16, #tpu.memory_space<vmem>>, vector<1x64x16xbf16>
    %22 = vector.shape_cast %21 : vector<1x64x16xbf16> to vector<64x16xbf16>
    %cst_25 = arith.constant dense<0.000000e+00> : vector<25x16xf32>
    %23 = tpu.matmul %20, %22, %cst_25 {dimension_numbers = #tpu.dot_dimension_numbers<[1], [0], [0], [1], [0, 0, 1, 1], [], []>} : vector<25x64xbf16>, vector<64x16xbf16>, vector<25x16xf32> -> vector<25x16xf32>
    %24 = arith.addf %18, %23 : vector<25x16xf32>
    %c0_26 = arith.constant 0 : index
    %c5 = arith.constant 5 : index
    %c0_27 = arith.constant 0 : index
    %25 = vector.load %arg1[%c0_26, %c5, %c0_27] : memref<1x31x64xbf16, #tpu.memory_space<vmem>>, vector<1x25x64xbf16>
    %26 = vector.shape_cast %25 : vector<1x25x64xbf16> to vector<25x64xbf16>
    %c2 = arith.constant 2 : index
    %c0_28 = arith.constant 0 : index
    %c0_29 = arith.constant 0 : index
    %27 = vector.load %arg3[%c2, %c0_28, %c0_29] : memref<4x64x16xbf16, #tpu.memory_space<vmem>>, vector<1x64x16xbf16>
    %28 = vector.shape_cast %27 : vector<1x64x16xbf16> to vector<64x16xbf16>
    %cst_30 = arith.constant dense<0.000000e+00> : vector<25x16xf32>
    %29 = tpu.matmul %26, %28, %cst_30 {dimension_numbers = #tpu.dot_dimension_numbers<[1], [0], [0], [1], [0, 0, 1, 1], [], []>} : vector<25x64xbf16>, vector<64x16xbf16>, vector<25x16xf32> -> vector<25x16xf32>
    %30 = arith.addf %24, %29 : vector<25x16xf32>
    %c0_31 = arith.constant 0 : index
    %c5_32 = arith.constant 5 : index
    %c0_33 = arith.constant 0 : index
    %31 = vector.load %arg2[%c0_31, %c5_32, %c0_33] : memref<1x31x64xbf16, #tpu.memory_space<vmem>>, vector<1x25x64xbf16>
    %32 = vector.shape_cast %31 : vector<1x25x64xbf16> to vector<25x64xbf16>
    %c2_34 = arith.constant 2 : index
    %c0_35 = arith.constant 0 : index
    %c0_36 = arith.constant 0 : index
    %33 = vector.load %arg4[%c2_34, %c0_35, %c0_36] : memref<4x64x16xbf16, #tpu.memory_space<vmem>>, vector<1x64x16xbf16>
    %34 = vector.shape_cast %33 : vector<1x64x16xbf16> to vector<64x16xbf16>
    %cst_37 = arith.constant dense<0.000000e+00> : vector<25x16xf32>
    %35 = tpu.matmul %32, %34, %cst_37 {dimension_numbers = #tpu.dot_dimension_numbers<[1], [0], [0], [1], [0, 0, 1, 1], [], []>} : vector<25x64xbf16>, vector<64x16xbf16>, vector<25x16xf32> -> vector<25x16xf32>
    %36 = arith.addf %30, %35 : vector<25x16xf32>
    %c0_38 = arith.constant 0 : index
    %c6 = arith.constant 6 : index
    %c0_39 = arith.constant 0 : index
    %37 = vector.load %arg1[%c0_38, %c6, %c0_39] : memref<1x31x64xbf16, #tpu.memory_space<vmem>>, vector<1x25x64xbf16>
    %38 = vector.shape_cast %37 : vector<1x25x64xbf16> to vector<25x64xbf16>
    %c3 = arith.constant 3 : index
    %c0_40 = arith.constant 0 : index
    %c0_41 = arith.constant 0 : index
    %39 = vector.load %arg3[%c3, %c0_40, %c0_41] : memref<4x64x16xbf16, #tpu.memory_space<vmem>>, vector<1x64x16xbf16>
    %40 = vector.shape_cast %39 : vector<1x64x16xbf16> to vector<64x16xbf16>
    %cst_42 = arith.constant dense<0.000000e+00> : vector<25x16xf32>
    %41 = tpu.matmul %38, %40, %cst_42 {dimension_numbers = #tpu.dot_dimension_numbers<[1], [0], [0], [1], [0, 0, 1, 1], [], []>} : vector<25x64xbf16>, vector<64x16xbf16>, vector<25x16xf32> -> vector<25x16xf32>
    %42 = arith.addf %36, %41 : vector<25x16xf32>
    %c0_43 = arith.constant 0 : index
    %c6_44 = arith.constant 6 : index
    %c0_45 = arith.constant 0 : index
    %43 = vector.load %arg2[%c0_43, %c6_44, %c0_45] : memref<1x31x64xbf16, #tpu.memory_space<vmem>>, vector<1x25x64xbf16>
    %44 = vector.shape_cast %43 : vector<1x25x64xbf16> to vector<25x64xbf16>
    %c3_46 = arith.constant 3 : index
    %c0_47 = arith.constant 0 : index
    %c0_48 = arith.constant 0 : index
    %45 = vector.load %arg4[%c3_46, %c0_47, %c0_48] : memref<4x64x16xbf16, #tpu.memory_space<vmem>>, vector<1x64x16xbf16>
    %46 = vector.shape_cast %45 : vector<1x64x16xbf16> to vector<64x16xbf16>
    %cst_49 = arith.constant dense<0.000000e+00> : vector<25x16xf32>
    %47 = tpu.matmul %44, %46, %cst_49 {dimension_numbers = #tpu.dot_dimension_numbers<[1], [0], [0], [1], [0, 0, 1, 1], [], []>} : vector<25x64xbf16>, vector<64x16xbf16>, vector<25x16xf32> -> vector<25x16xf32>
    %48 = arith.addf %42, %47 : vector<25x16xf32>
    %c0_50 = arith.constant 0 : index
    %c0_51 = arith.constant 0 : index
    %49 = vector.load %arg5[%c0_50, %c0_51] : memref<1x16xf32, #tpu.memory_space<vmem>>, vector<1x16xf32>
    %50 = vector.broadcast %49 : vector<1x16xf32> to vector<25x16xf32>
    %51 = arith.addf %48, %50 : vector<25x16xf32>
    %cst_52 = arith.constant 0.000000e+00 : f32
    %52 = vector.broadcast %cst_52 : f32 to vector<25x16xf32>
    %53 = arith.subf %52, %51 : vector<25x16xf32>
    %54 = math.exp %53 : vector<25x16xf32>
    %cst_53 = arith.constant 1.000000e+00 : f32
    %55 = vector.broadcast %cst_53 : f32 to vector<25x16xf32>
    %56 = arith.addf %55, %54 : vector<25x16xf32>
    %57 = tpu.reciprocal %56 {approx = true} : vector<25x16xf32> -> vector<25x16xf32>
    %58 = arith.mulf %51, %57 : vector<25x16xf32>
    %59 = arith.truncf %58 : vector<25x16xf32> to vector<25x16xbf16>
    %c0_54 = arith.constant 0 : index
    %c0_55 = arith.constant 0 : index
    %60 = vector.load %arg6[%c0_54, %c0_55] : memref<16x32xbf16, #tpu.memory_space<vmem>>, vector<16x32xbf16>
    %cst_56 = arith.constant dense<0.000000e+00> : vector<25x32xf32>
    %61 = tpu.matmul %59, %60, %cst_56 {dimension_numbers = #tpu.dot_dimension_numbers<[1], [0], [0], [1], [0, 0, 1, 1], [], []>} : vector<25x16xbf16>, vector<16x32xbf16>, vector<25x32xf32> -> vector<25x32xf32>
    %c0_57 = arith.constant 0 : index
    %c0_58 = arith.constant 0 : index
    %62 = vector.load %arg7[%c0_57, %c0_58] : memref<1x32xf32, #tpu.memory_space<vmem>>, vector<1x32xf32>
    %63 = vector.broadcast %62 : vector<1x32xf32> to vector<25x32xf32>
    %64 = arith.addf %61, %63 : vector<25x32xf32>
    %cst_59 = arith.constant 0.000000e+00 : f32
    %65 = vector.broadcast %cst_59 : f32 to vector<25x32xf32>
    %66 = arith.subf %65, %64 : vector<25x32xf32>
    %67 = math.exp %66 : vector<25x32xf32>
    %cst_60 = arith.constant 1.000000e+00 : f32
    %68 = vector.broadcast %cst_60 : f32 to vector<25x32xf32>
    %69 = arith.addf %68, %67 : vector<25x32xf32>
    %70 = tpu.reciprocal %69 {approx = true} : vector<25x32xf32> -> vector<25x32xf32>
    %71 = arith.mulf %64, %70 : vector<25x32xf32>
    %c0_61 = arith.constant 0 : index
    %c0_62 = arith.constant 0 : index
    %c0_63 = arith.constant 0 : index
    %72 = vector.load %arg8[%c0_61, %c0_62, %c0_63] : memref<1x25x32xf32, #tpu.memory_space<vmem>>, vector<1x25x32xf32>
    %73 = vector.shape_cast %72 : vector<1x25x32xf32> to vector<25x32xf32>
    %74 = vector.shape_cast %71 : vector<25x32xf32> to vector<1x25x32xf32>
    tpu.vector_store %arg8[%c0_61, %c0_62, %c0_63], %74 {strides = array<i32>} : memref<1x25x32xf32, #tpu.memory_space<vmem>>, vector<1x25x32xf32>,
    return
  }
  func.func @transform_0(%arg0: i32) -> (i32, i32, i32) {
    %c0_i32 = arith.constant 0 : i32
    %c0_i32_0 = arith.constant 0 : i32
    %c0_i32_1 = arith.constant 0 : i32
    return %arg0, %c0_i32, %c0_i32_0 : i32, i32, i32
  }
  func.func @transform_1(%arg0: i32) -> (i32, i32, i32) {
    %c0_i32 = arith.constant 0 : i32
    %c0_i32_0 = arith.constant 0 : i32
    %c0_i32_1 = arith.constant 0 : i32
    return %arg0, %c0_i32, %c0_i32_0 : i32, i32, i32
  }
  func.func @transform_2(%arg0: i32) -> (i32, i32, i32) {
    %c0_i32 = arith.constant 0 : i32
    %c0_i32_0 = arith.constant 0 : i32
    %c0_i32_1 = arith.constant 0 : i32
    %c0_i32_2 = arith.constant 0 : i32
    return %c0_i32, %c0_i32_0, %c0_i32_1 : i32, i32, i32
  }
  func.func @transform_3(%arg0: i32) -> (i32, i32, i32) {
    %c0_i32 = arith.constant 0 : i32
    %c0_i32_0 = arith.constant 0 : i32
    %c0_i32_1 = arith.constant 0 : i32
    %c0_i32_2 = arith.constant 0 : i32
    return %c0_i32, %c0_i32_0, %c0_i32_1 : i32, i32, i32
  }
  func.func @transform_4(%arg0: i32) -> (i32, i32) {
    %c0_i32 = arith.constant 0 : i32
    %c0_i32_0 = arith.constant 0 : i32
    %c0_i32_1 = arith.constant 0 : i32
    return %c0_i32, %c0_i32_0 : i32, i32
  }
  func.func @transform_5(%arg0: i32) -> (i32, i32) {
    %c0_i32 = arith.constant 0 : i32
    %c0_i32_0 = arith.constant 0 : i32
    %c0_i32_1 = arith.constant 0 : i32
    return %c0_i32, %c0_i32_0 : i32, i32
  }
  func.func @transform_6(%arg0: i32) -> (i32, i32) {
    %c0_i32 = arith.constant 0 : i32
    %c0_i32_0 = arith.constant 0 : i32
    %c0_i32_1 = arith.constant 0 : i32
    return %c0_i32, %c0_i32_0 : i32, i32
  }
  func.func @transform_7(%arg0: i32) -> (i32, i32, i32) {
    %c0_i32 = arith.constant 0 : i32
    %c0_i32_0 = arith.constant 0 : i32
    %c0_i32_1 = arith.constant 0 : i32
    return %arg0, %c0_i32, %c0_i32_0 : i32, i32, i32
  }
}

</mosaic_0001>

<bundles_post_ra>
// kernel: hgstem_forward.3
= control target key start
LH: loop header
LB: loop body
LE: loop exit
PB: predicated region body
PF: predicated region fallthrough
CT: control target
= control target key end

     0   :  { %s1239_s15 = smov 0   ;;  %s1451_s0 = inlined_call_operand.vmem [shape: bf16[2,111,12], index: 0, kind: input, shape index: {}]   ;;  %s1452_s1 = inlined_call_operand.vmem [shape: bf16[4,12,16], index: 1, kind: input, shape index: {}]   ;;  %s1453_s2 = inlined_call_operand.vmem [shape: f32[1,16], index: 2, kind: input, shape index: {}]   ;;  %s1454_s3 = inlined_call_operand.vmem [shape: f32[101,1], index: 3, kind: input, shape index: {}]   ;;  %s1455_s4 = inlined_call_operand.vmem [shape: bf16[2,101,16], index: 4, kind: output, shape index: {}]  }
   0x1 LB: > { %s1017_s16 = sadd.s32 4294967295, %s1211_s15   ;;  %p1021_p0 = scmp.ge.s32.totalorder %s1211_s15, 1  ;;  %s1211_s15 = sphi %s1239_s15, %s14_s15  }
   0x2   : > { %p162_p1 = scmp.lt.s32.totalorder %s1211_s15, 3 }
   0x4   : > { %p163_p2 = pnand %p1021_p0, %p162_p1 }
   0x5   : > { %p188_p3 = scmp.lt.s32.totalorder (!%p163_p2), %s1017_s16, 1 }
   0x6   : > { %166 = sbr.rel (%p163_p2) target bundleno = 288 (0x120), region = 36 }
   0xb   : > { %v1063_v0 = vld [vmem:[%s1452_s1] sm:$0xf]  ;;  %v1126_v1 = vld [vmem:[%s1452_s1] sm:$0x30]  ;;  %vm333_vm0 = vcmask 1045504   ;;  %s1457_s16 = smov (!%p188_p3, %s1017_s16), 1 }
   0xc   : > { %v1064_v2 = vor.u32 %v1126_v1, %v1063_v0  ;;  %v1109_v3 = vld [vmem:[%s1452_s1 + $0x18] sm:$0xf]  ;;  %v1134_v4 = vld [vmem:[%s1452_s1 + $0x18] sm:$0x30]  ;;  %v1052_v5 = vld [vmem:[%s1452_s1 + $0x8] sm:$0xf] }
   0xd   : > { %v1110_v6 = vor.u32 %v1134_v4, %v1109_v3  ;;  %v1127_v7 = vld [vmem:[%s1452_s1 + $0x8] sm:$0x30]  ;;  %v1096_v10 = vld [vmem:[%s1452_s1 + $0x10] sm:$0xf]  ;;  %v1133_v11 = vld [vmem:[%s1452_s1 + $0x10] sm:$0x30] }
   0xe   : > { %v400_v8 = vsel %vm333_vm0, %v1064_v2, 0  ;;  %v1053_v9 = vor.u32 %v1127_v7, %v1052_v5  ;;  %s1135_s7 = smul.u32 56, %s1457_s16  ;;  %v1097_v13 = vor.u32 %v1133_v11, %v1096_v10  ;;  %vm311_vm1 = vcmask 97280   ;;  %v839_v55 = vld [vmem:[%s1454_s3] sm:$0xff]  ;;  %v840_v61 = vld [vmem:[%s1454_s3 + $0x8] sm:$0xff] }
   0xf   : > { %409 = vmatpush.bf16.msra.mxu1 %v400_v8  ;;  %v686_v12 = vsel %vm333_vm0, %v1110_v6, 0  ;;  %vm645_vm2 = vcmask 1046528   ;;  %vm250_vm3 = vsmask.f32 7424  ;;  %v1213_v41 = vmov 0   ;;  %s1136_s17 = smul.u32 52, %s1457_s16 }
  0x10   : > { %695 = vmatpush.bf16.msra.mxu3 %v686_v12  ;;  %v335_v14 = vsel %vm333_vm0, %v1053_v9, 0  ;;  %s1280_s10 = scalar_lea.vmem %s1451_s0, %s1135_s7  ;;  %v576_v15 = vsel %vm333_vm0, %v1097_v13, 0  ;;  %1146 = vset.pattern.permute.xlu0 %v1213_v41  ;;  %vm943_vm4 = vcmask 125952   ;;  %vm956_vm5 = vcmask 124928  }
  0x11   : > { %344 = vmatpush.bf16.msra.mxu0 %v335_v14  ;;  %v1120_v16 = vld [vmem:[%s1280_s10] sm:$0xff]  ;;  %v1202_v18 = vld [vmem:[%s1280_s10 + $0x4] sm:$0xf0]  ;;  %v1128_v19 = vld [vmem:[%s1280_s10 + $0xc] sm:$0xff]  ;;  %585 = vmatpush.bf16.msra.mxu2 %v576_v15  ;;  %s1408_s20 = scalar_lea.vmem %s1455_s4, %s1136_s17  ;;  %vm957_vm6 = vsmask.f32 2304 }
  0x12   : > { %v446_v17 = vld [vmem:[%s1280_s10 + $0x4] sm:$0xff]   ;;  %v254_v22 = vshll.u32 %v1120_v16, 16  ;;  %1065 = vmatmul.msk.bf16.vlgmr.msra.gmra.mxu1 %vm311_vm1, %v1120_v16  ;;  %v252_v23 = vshrl.u32 %v1120_v16, 16  ;;  %v502_v25 = vshll.u32 %v1128_v19, 16  ;;  %v647_v27 = vrot.slane %v1128_v19, 1  ;;  %v1122_v39 = vld [vmem:[%s1280_s10 + $0x10] sm:$0xff]  ;;  %1147 = vset.pattern.permute.xlu1 %v1213_v41  ;;  %vm958_vm7 = vmand %vm956_vm5, %vm957_vm6 }
  0x13   : > { %v1203_v20 = vld [vmem:[%s1280_s10 + $0x4] sm:$0xe]  ;;  %v1121_v21 = vld [vmem:[%s1280_s10 + $0x8] sm:$0xff]  ;;  %v495_v30 = vshrl.u32 %v446_v17, 16  ;;  %v497_v31 = vshll.u32 %v446_v17, 16  ;;  %v1129_v42 = vld [vmem:[%s1280_s10 + $0x14] sm:$0xff]  ;;  %1148 = vset.pattern.permute.xlu2 %v1213_v41  ;;  %854 = vperm.xlu0 %1146, %v839_v55  }
  0x14   : > { %v259_v24 = vshll.u32 %v1121_v21, 16  ;;  %v1204_v26 = vor.u32 %v1203_v20, %v1202_v18  ;;  %v256_v28 = vrot.slane %v254_v22, 1  ;;  %v504_v35 = vrot.slane %v502_v25, 1  ;;  %v1123_v56 = vld [vmem:[%s1280_s10 + $0x18] sm:$0xff]  ;;  %v1310_v57 = vld [vmem:[%s1280_s10 + $0x20] sm:$0xff]  ;;  %v1132_v5 = vld [vmem:[%s1280_s10 + $0x2c] sm:$0xff] }
  0x15   : > { %v499_v34 = vrot.slane %v497_v31, 1  ;;  %v263_v43 = vshrl.u32 %v1121_v21, 16  ;;  %v267_v44 = vshll.u32 %v1122_v39, 16  ;;  %v506_v45 = vshrl.u32 %v1128_v19, 16  ;;  %v1130_v58 = vld [vmem:[%s1280_s10 + $0x1c] sm:$0xff]  ;;  %v1131_v63 = vld [vmem:[%s1280_s10 + $0x24] sm:$0xff] }
  0x16   : > { %v261_v29 = vrot.slane %v259_v24, 1  ;;  %v646_v32 = vrot.slane %v1204_v26, 1  ;;  %v257_v33 = vor.u32 %v256_v28, %v252_v23  ;;  %v510_v46 = vshll.u32 %v1129_v42, 16  ;;  %v1321_v6 = vld [vmem:[%s1280_s10 + $0x28] sm:$0xff]  ;;  %v841_v24 = vld [vmem:[%s1454_s3 + $0x10] sm:$0xff] }
  0x17   : > { %v500_v38 = vor.u32 %v499_v34, %v495_v30  ;;  %v649_v47 = vrot.slane %v1129_v42, 1  ;;  %v269_v49 = vrot.slane %v267_v44, 1  ;;  %v508_v50 = vor.u32 %v506_v45, %v504_v35  ;;  %864 = vperm.xlu1 %1147, %v841_v24   ;;  %v842_v30 = vld [vmem:[%s1454_s3 + $0x18] sm:$0xff]  ;;  %v211_v31 = vld [vmem:[%s1280_s10 + $0x30] sm:$0x7] }
  0x18   : > { %v648_v36 = vsel %vm645_vm2, %v646_v32, %v647_v27  ;;  %v262_v37 = vsel %vm250_vm3, %v257_v33, %v261_v29  ;;  %v265_v48 = vor.u32 %v263_v43, %v261_v29  ;;  %v512_v51 = vrot.slane %v510_v46, 1  ;;  %v635_v33 = vld [vmem:[%s1280_s10 + $0x34] sm:$0xf] }
  0x19   : > { %1111 = vmatmul.msk.bf16.vlgmr.msra.gmra.mxu3 %vm311_vm1, %v648_v36  ;;  %1054 = vmatmul.msk.bf16.vlgmr.msra.gmra.mxu0 %vm311_vm1, %v262_v37  ;;  %v505_v40 = vsel %vm250_vm3, %v500_v38, %v504_v35  ;;  %v650_v52 = vsel %vm645_vm2, %v647_v27, %v649_v47  ;;  %v271_v59 = vshrl.u32 %v1122_v39, 16  ;;  %v275_v60 = vshll.u32 %v1123_v56, 16  ;;  %v457_v38 = vld [vmem:[%s1280_s10 + $0x34] sm:$0x7] }
  0x1a   : > { %1098 = vmatmul.msk.bf16.vlgmr.msra.gmra.mxu2 %vm311_vm1, %v505_v40  ;;  %v270_v53 = vsel %vm250_vm3, %v265_v48, %v269_v49  ;;  %v513_v54 = vsel %vm250_vm3, %v508_v50, %v512_v51  ;;  %v514_v62 = vshrl.u32 %v1129_v42, 16  ;;  %v518_v0 = vshll.u32 %v1130_v58, 16 }
  0x1b   : > { %v283_v1 = vshll.u32 %v1310_v57, 16  ;;  %v651_v2 = vrot.slane %v1130_v58, 1  ;;  %v273_v3 = vor.u32 %v271_v59, %v269_v49  ;;  %v277_v4 = vrot.slane %v275_v60, 1  ;;  %859 = vperm.xlu0 %1146, %v840_v61   ;;  %v845_v59 = vld [vmem:[%s1454_s3 + $0x30] sm:$0xff]  ;;  %v851_v60 = vld [vmem:[%s1454_s3 + $0x60] sm:$0x1f] }
  0x1c   : > { %v516_v7 = vor.u32 %v514_v62, %v512_v51  ;;  %v653_v8 = vrot.slane %v1131_v63, 1  ;;  %v526_v9 = vshll.u32 %v1131_v63, 16  ;;  %v655_v10 = vrot.slane %v1132_v5, 1  ;;  %v847_v61 = vld [vmem:[%s1454_s3 + $0x40] sm:$0xff]  ;;  %v848_v62 = vld [vmem:[%s1454_s3 + $0x48] sm:$0xff] }
  0x1d   : > { %v520_v11 = vrot.slane %v518_v0, 1  ;;  %v285_v12 = vrot.slane %v283_v1, 1  ;;  %v287_v13 = vshrl.u32 %v1310_v57, 16  ;;  %v291_v14 = vshll.u32 %v1321_v6, 16  ;;  %v850_v0 = vld [vmem:[%s1454_s3 + $0x58] sm:$0xff] }
  0x1e   : > { %v652_v15 = vsel %vm645_vm2, %v649_v47, %v651_v2  ;;  %v278_v16 = vsel %vm250_vm3, %v273_v3, %v277_v4  ;;  %v656_v17 = vsel %vm645_vm2, %v653_v8, %v655_v10  ;;  %v528_v20 = vrot.slane %v526_v9, 1 }
  0x1f   : > { %v289_v18 = vor.u32 %v287_v13, %v285_v12  ;;  %v293_v19 = vrot.slane %v291_v14, 1  ;;  %v534_v22 = vshll.u32 %v1132_v5, 16  ;;  %v521_v23 = vsel %vm250_vm3, %v516_v7, %v520_v11  ;;  %869 = vperm.xlu1 %1147, %v842_v30  }
  0x20   : > { %v279_v29 = vshrl.u32 %v1123_v56, 16  ;;  %v522_v32 = vshrl.u32 %v1130_v58, 16  ;;  %v242_v34 = vunpack.c.l.b16 %v211_v31  ;;  %v642_v36 = vunpack.c.l.b16 %v635_v33 }
  0x21   : > { %v294_v25 = vsel %vm250_vm3, %v289_v18, %v293_v19  ;;  %v536_v27 = vrot.slane %v534_v22, 1  ;;  %v486_v40 = vunpack.c.l.b16 %v457_v38  ;;  %v295_v42 = vshrl.u32 %v1321_v6, 16 }
  0x22   : > { %1066 = vmatmul.msk.bf16.gmra.mxu1 %vm311_vm1, %v1121_v21  ;;  %v530_v21 = vshrl.u32 %v1131_v63, 16  ;;  %v281_v35 = vor.u32 %v279_v29, %v277_v4  ;;  %v249_v37 = vpack.c.b16 %v242_v34, %v242_v34  ;;  %v524_v41 = vor.u32 %v522_v32, %v520_v11  ;;  %v844_v63 = vld [vmem:[%s1454_s3 + $0x28] sm:$0xff]  ;;  %v846_v4 = vld [vmem:[%s1454_s3 + $0x38] sm:$0xff] }
  0x23   : > { %v654_v44 = vsel %vm645_vm2, %v651_v2, %v653_v8  ;;  %v493_v47 = vpack.c.b16 %v486_v40, %v486_v40  ;;  %v297_v48 = vor.u32 %v295_v42, %v293_v19  ;;  %v538_v51 = vshrl.u32 %v1132_v5, 16  ;;  %914 = vperm.xlu0 %1146, %v851_v60  }
  0x24   : > { %v532_v26 = vor.u32 %v530_v21, %v528_v20  ;;  %v299_v43 = vshll.u32 %v249_v37, 16  ;;  %v286_v45 = vsel %vm250_vm3, %v281_v35, %v285_v12  ;;  %v303_v1 = vshrl.u32 %v249_v37, 16 }
  0x25   : > { %v540_v55 = vor.u32 %v538_v51, %v536_v27  ;;  %v546_v2 = vshrl.u32 %v493_v47, 16 }
  0x26   : > { %v537_v28 = vsel %vm250_vm3, %v532_v26, %v536_v27  ;;  %v301_v49 = vrot.slane %v299_v43, 1 }
  0x27   : > { %884 = vperm.xlu1 %1147, %v845_v59  }
  0x28   : > { %v305_v3 = vor.u32 %v303_v1, %v301_v49 }
  0x29   : > { %1112 = vmatmul.msk.bf16.gmra.mxu3 %vm311_vm1, %v650_v52  ;;  %1055 = vmatmul.msk.bf16.gmra.mxu0 %vm311_vm1, %v270_v53  ;;  %v542_v52 = vshll.u32 %v493_v47, 16  ;;  %v529_v53 = vsel %vm250_vm3, %v524_v41, %v528_v20 }
  0x2a   : > { %1099 = vmatmul.msk.bf16.gmra.mxu2 %vm311_vm1, %v513_v54  ;;  %v302_v54 = vsel %vm250_vm3, %v297_v48, %v301_v49 }
  0x2b   : > { %894 = vperm.xlu0 %1146, %v847_v61  }
  0x2f   : > { %899 = vperm.xlu1 %1147, %v848_v62  }
  0x32   : > { %1067 = vmatmul.msk.bf16.gmra.mxu1 %vm311_vm1, %v1122_v39  ;;  %v644_v39 = vpack.c.b16 %v642_v36, %v642_v36 }
  0x33   : > { %909 = vperm.xlu0 %1146, %v850_v0  }
  0x34   : > { %v657_v46 = vrot.slane %v644_v39, 1 }
  0x36   : > { %v658_v50 = vsel %vm645_vm2, %v655_v10, %v657_v46 }
  0x39   : > { %1113 = vmatmul.msk.bf16.gmra.mxu3 %vm311_vm1, %v652_v15  ;;  %1056 = vmatmul.msk.bf16.gmra.mxu0 %vm311_vm1, %v278_v16  ;;  %v1398_v16 = vld [vmem:[%s1453_s2] ss:$0 sm:$0xff] }
  0x3a   : > { %1100 = vmatmul.msk.bf16.gmra.mxu2 %vm311_vm1, %v521_v23 }
  0x42   : > { %1068 = vmatmul.msk.bf16.gmra.mxu1 %vm311_vm1, %v1123_v56  ;;  %v544_v56 = vrot.slane %v542_v52, 1 }
  0x44   : > { %v545_v58 = vsel %vm250_vm3, %v540_v55, %v544_v56  ;;  %v548_v5 = vor.u32 %v546_v2, %v544_v56 }
  0x49   : > { %1114 = vmatmul.msk.bf16.gmra.mxu3 %vm311_vm1, %v654_v44  ;;  %1057 = vmatmul.msk.bf16.gmra.mxu0 %vm311_vm1, %v286_v45 }
  0x4a   : > { %1101 = vmatmul.msk.bf16.gmra.mxu2 %vm311_vm1, %v529_v53 }
  0x52   : > { %1069 = vmatmul.msk.bf16.gmra.mxu1 %vm311_vm1, %v1310_v57  ;;  %v843_v57 = vld [vmem:[%s1454_s3 + $0x20] sm:$0xff] }
  0x53   : > { %874 = vperm.xlu2 %1148, %v843_v57  }
  0x59   : > { %1115 = vmatmul.msk.bf16.gmra.mxu3 %vm311_vm1, %v656_v17  ;;  %1058 = vmatmul.msk.bf16.gmra.mxu0 %vm311_vm1, %v294_v25 }
  0x5a   : > { %1102 = vmatmul.msk.bf16.gmra.mxu2 %vm311_vm1, %v537_v28 }
  0x5b   : > { %879 = vperm.xlu2 %1148, %v844_v63  }
  0x62   : > { %1070 = vmatmul.msk.bf16.gmra.mxu1 %vm311_vm1, %v1321_v6  ;;  %v849_v6 = vld [vmem:[%s1454_s3 + $0x50] sm:$0xff] }
  0x63   : > { %889 = vperm.xlu2 %1148, %v846_v4  }
  0x69   : > { %1116 = vmatmul.msk.bf16.gmra.mxu3 %vm311_vm1, %v658_v50  ;;  %1059 = vmatmul.msk.bf16.gmra.mxu0 %vm311_vm1, %v302_v54 }
  0x6a   : > { %1103 = vmatmul.msk.bf16.gmra.mxu2 %vm311_vm1, %v545_v58 }
  0x6b   : > { %904 = vperm.xlu2 %1148, %v849_v6  }
  0x72   : > { %1071 = vmatmul.msk.bf16.gmra.mxu1 %vm311_vm1, %v249_v37 }
  0x79   : > { %1117 = vmatmul.msk.bf16.gmra.mxu3 %vm311_vm1, %v657_v46  ;;  %1060 = vmatmul.msk.bf16.gmra.mxu0 %vm311_vm1, %v305_v3 }
  0x7a   : > { %1104 = vmatmul.msk.bf16.gmra.mxu2 %vm311_vm1, %v548_v5 }
  0x85   : > { %v855_v44 = vpop.permute.xlu0 %854 }
  0x8d   : > { %v860_v4 = vpop.permute.xlu0 %859 }
  0x8f   : > { %v411_v7 = vpop.f32.mrf.mxu1 }
  0x96   : > { %v346_v8 = vpop.f32.mrf.mxu0 }
  0x97   : > { %v413_v9 = vpop.f32.mrf.mxu1  ;;  %v412_v10 = vadd.f32 %v411_v7, %v346_v8 }
  0x9c   : > { %v697_v11 = vpop.f32.mrf.mxu3 }
  0x9d   : > { %v587_v13 = vpop.f32.mrf.mxu2 }
  0x9e   : > { %v348_v12 = vpop.f32.mrf.mxu0  ;;  %v621_v15 = vadd.f32 %v587_v13, %v412_v10 }
  0x9f   : > { %v416_v14 = vpop.f32.mrf.mxu1  ;;  %v414_v20 = vadd.f32 %v413_v9, %v348_v12 }
  0xa0   : > { %v731_v17 = vadd.f32 %v697_v11, %v621_v15 }
  0xa2   : > { %v748_v19 = vadd.f32 %v1398_v16, %v731_v17 }
  0xa4   : > { %v699_v18 = vpop.f32.mrf.mxu3  ;;  %v761_v22 = vsub.f32 0.0, %v748_v19 }
  0xa5   : > { %v589_v23 = vpop.f32.mrf.mxu2 }
  0xa6   : > { %v351_v21 = vpop.f32.mrf.mxu0  ;;  %v622_v25 = vadd.f32 %v589_v23, %v414_v20  ;;  %v774_v26 = vmul.f32 1.442695, %v761_v22 }
  0xa7   : > { %v418_v24 = vpop.f32.mrf.mxu1  ;;  %v417_v28 = vadd.f32 %v416_v14, %v351_v21  ;;  %v865_v14 = vpop.permute.xlu1 %864 }
  0xa8   : > { %v732_v27 = vadd.f32 %v699_v18, %v622_v25  ;;  %1150 = vpow2.f32 %v774_v26 }
  0xaa   : > { %v749_v30 = vadd.f32 %v1398_v16, %v732_v27 }
  0xac   : > { %v702_v29 = vpop.f32.mrf.mxu3  ;;  %v762_v32 = vsub.f32 0.0, %v749_v30 }
  0xad   : > { %v592_v33 = vpop.f32.mrf.mxu2 }
  0xae   : > { %v353_v31 = vpop.f32.mrf.mxu0  ;;  %v1151_v35 = vpop.eup %1150  ;;  %v623_v36 = vadd.f32 %v592_v33, %v417_v28  ;;  %v776_v37 = vmul.f32 1.442695, %v762_v32 }
  0xaf   : > { %v421_v34 = vpop.f32.mrf.mxu1  ;;  %v800_v38 = vadd.f32 1.0, %v1151_v35  ;;  %v419_v42 = vadd.f32 %v418_v24, %v353_v31 }
  0xb0   : > { %v733_v39 = vadd.f32 %v702_v29, %v623_v36  ;;  %1152 = vpow2.f32 %v776_v37 }
  0xb1   : > { %1154 = vrcp.f32 %v800_v38 }
  0xb2   : > { %v750_v41 = vadd.f32 %v1398_v16, %v733_v39  ;;  %v870_v39 = vpop.permute.xlu1 %869 }
  0xb4   : > { %v704_v40 = vpop.f32.mrf.mxu3  ;;  %v763_v45 = vsub.f32 0.0, %v750_v41 }
  0xb5   : > { %v594_v46 = vpop.f32.mrf.mxu2 }
  0xb6   : > { %v356_v43 = vpop.f32.mrf.mxu0  ;;  %v1153_v48 = vpop.eup %1152  ;;  %v624_v49 = vadd.f32 %v594_v46, %v419_v42  ;;  %v778_v50 = vmul.f32 1.442695, %v763_v45 }
  0xb7   : > { %v423_v47 = vpop.f32.mrf.mxu1  ;;  %v1155_v51 = vpop.eup %1154  ;;  %v801_v52 = vadd.f32 1.0, %v1153_v48  ;;  %v422_v55 = vadd.f32 %v421_v34, %v356_v43 }
  0xb8   : > { %v734_v53 = vadd.f32 %v704_v40, %v624_v49  ;;  %v826_v54 = vmul.f32 %v1155_v51, %v748_v19  ;;  %1156 = vpow2.f32 %v778_v50  ;;  %v875_v49 = vpop.permute.xlu2 %874 }
  0xb9   : > { %1158 = vrcp.f32 %v801_v52 }
  0xba   : > { %v917_v56 = vmul.f32 %v855_v44, %v826_v54  ;;  %v751_v59 = vadd.f32 %v1398_v16, %v734_v53 }
  0xbc   : > { %v707_v58 = vpop.f32.mrf.mxu3  ;;  %v930_v60 = vpack.c.bf16 %v917_v56, %v917_v56  ;;  %v764_v61 = vsub.f32 0.0, %v751_v59 }
  0xbd   : > { %v597_v62 = vpop.f32.mrf.mxu2 }
  0xbe   : > { %v358_v57 = vpop.f32.mrf.mxu0  ;;  %v1157_v0 = vpop.eup %1156  ;;  %944 = vst.msk [vmem:[%s1408_s20] sm:$0xf] %vm943_vm4, %v930_v60  ;;  %v625_v1 = vadd.f32 %v597_v62, %v422_v55  ;;  %v780_v2 = vmul.f32 1.442695, %v764_v61 }
  0xbf   : > { %v426_v63 = vpop.f32.mrf.mxu1  ;;  %v1159_v3 = vpop.eup %1158  ;;  %v802_v5 = vadd.f32 1.0, %v1157_v0  ;;  %v424_v11 = vadd.f32 %v423_v47, %v358_v57 }
  0xc0   : > { %v735_v6 = vadd.f32 %v707_v58, %v625_v1  ;;  %v827_v7 = vmul.f32 %v1159_v3, %v749_v30  ;;  %1160 = vpow2.f32 %v780_v2 }
  0xc1   : > { %1162 = vrcp.f32 %v802_v5 }
  0xc2   : > { %v918_v8 = vmul.f32 %v860_v4, %v827_v7  ;;  %v752_v10 = vadd.f32 %v1398_v16, %v735_v6 }
  0xc4   : > { %v709_v9 = vpop.f32.mrf.mxu3  ;;  %v931_v12 = vpack.c.bf16 %v918_v8, %v918_v8  ;;  %v765_v15 = vsub.f32 0.0, %v752_v10 }
  0xc5   : > { %v599_v17 = vpop.f32.mrf.mxu2 }
  0xc6   : > { %v361_v13 = vpop.f32.mrf.mxu0  ;;  %v1161_v19 = vpop.eup %1160  ;;  %945 = vst.msk [vmem:[%s1408_s20 + $0x4] sm:$0xf] %vm943_vm4, %v931_v12  ;;  %v626_v20 = vadd.f32 %v599_v17, %v424_v11  ;;  %v782_v21 = vmul.f32 1.442695, %v765_v15 }
  0xc7   : > { %v428_v18 = vpop.f32.mrf.mxu1  ;;  %v1163_v22 = vpop.eup %1162  ;;  %v803_v23 = vadd.f32 1.0, %v1161_v19  ;;  %v427_v26 = vadd.f32 %v426_v63, %v361_v13 }
  0xc8   : > { %v736_v24 = vadd.f32 %v709_v9, %v626_v20  ;;  %v828_v25 = vmul.f32 %v1163_v22, %v750_v41  ;;  %1164 = vpow2.f32 %v782_v21  ;;  %v880_v9 = vpop.permute.xlu2 %879 }
  0xc9   : > { %1166 = vrcp.f32 %v803_v23 }
  0xca   : > { %v919_v27 = vmul.f32 %v865_v14, %v828_v25  ;;  %v753_v29 = vadd.f32 %v1398_v16, %v736_v24 }
  0xcc   : > { %v712_v28 = vpop.f32.mrf.mxu3  ;;  %v932_v30 = vpack.c.bf16 %v919_v27, %v919_v27  ;;  %v766_v32 = vsub.f32 0.0, %v753_v29  ;;  %v885_v27 = vpop.permute.xlu1 %884 }
  0xcd   : > { %v602_v33 = vpop.f32.mrf.mxu2 }
  0xce   : > { %v363_v31 = vpop.f32.mrf.mxu0  ;;  %v1165_v35 = vpop.eup %1164  ;;  %946 = vst.msk [vmem:[%s1408_s20 + $0x8] sm:$0xf] %vm943_vm4, %v932_v30  ;;  %v627_v36 = vadd.f32 %v602_v33, %v427_v26  ;;  %v784_v37 = vmul.f32 1.442695, %v766_v32 }
  0xcf   : > { %v431_v34 = vpop.f32.mrf.mxu1  ;;  %v1167_v38 = vpop.eup %1166  ;;  %v804_v40 = vadd.f32 1.0, %v1165_v35  ;;  %v429_v46 = vadd.f32 %v428_v18, %v363_v31 }
  0xd0   : > { %v737_v41 = vadd.f32 %v712_v28, %v627_v36  ;;  %v829_v42 = vmul.f32 %v1167_v38, %v751_v59  ;;  %1168 = vpow2.f32 %v784_v37 }
  0xd1   : > { %1170 = vrcp.f32 %v804_v40 }
  0xd2   : > { %v920_v43 = vmul.f32 %v870_v39, %v829_v42  ;;  %v754_v45 = vadd.f32 %v1398_v16, %v737_v41 }
  0xd4   : > { %v714_v44 = vpop.f32.mrf.mxu3  ;;  %v933_v47 = vpack.c.bf16 %v920_v43, %v920_v43  ;;  %v767_v50 = vsub.f32 0.0, %v754_v45 }
  0xd5   : > { %v604_v51 = vpop.f32.mrf.mxu2 }
  0xd6   : > { %v366_v48 = vpop.f32.mrf.mxu0  ;;  %v1169_v53 = vpop.eup %1168  ;;  %947 = vst.msk [vmem:[%s1408_s20 + $0xc] sm:$0xf] %vm943_vm4, %v933_v47  ;;  %v628_v54 = vadd.f32 %v604_v51, %v429_v46  ;;  %v786_v55 = vmul.f32 1.442695, %v767_v50 }
  0xd7   : > { %v433_v52 = vpop.f32.mrf.mxu1  ;;  %v1171_v56 = vpop.eup %1170  ;;  %v805_v58 = vadd.f32 1.0, %v1169_v53  ;;  %v432_v57 = vadd.f32 %v431_v34, %v366_v48 }
  0xd8   : > { %v738_v59 = vadd.f32 %v714_v44, %v628_v54  ;;  %v830_v60 = vmul.f32 %v1171_v56, %v752_v10  ;;  %1172 = vpow2.f32 %v786_v55  ;;  %v1430_v44 = vpop.permute.xlu0 %914 }
  0xd9   : > { %1174 = vrcp.f32 %v805_v58 }
  0xda   : > { %v921_v61 = vmul.f32 %v875_v49, %v830_v60  ;;  %v755_v63 = vadd.f32 %v1398_v16, %v738_v59 }
  0xdc   : > { %v717_v62 = vpop.f32.mrf.mxu3  ;;  %v934_v0 = vpack.c.bf16 %v921_v61, %v921_v61  ;;  %v768_v2 = vsub.f32 0.0, %v755_v63 }
  0xdd   : > { %v607_v3 = vpop.f32.mrf.mxu2 }
  0xde   : > { %v368_v1 = vpop.f32.mrf.mxu0  ;;  %v1173_v5 = vpop.eup %1172  ;;  %948 = vst.msk [vmem:[%s1408_s20 + $0x10] sm:$0xf] %vm943_vm4, %v934_v0  ;;  %v629_v6 = vadd.f32 %v607_v3, %v432_v57  ;;  %v788_v7 = vmul.f32 1.442695, %v768_v2 }
  0xdf   : > { %v436_v4 = vpop.f32.mrf.mxu1  ;;  %v1175_v8 = vpop.eup %1174  ;;  %v806_v10 = vadd.f32 1.0, %v1173_v5  ;;  %v434_v17 = vadd.f32 %v433_v52, %v368_v1 }
  0xe0   : > { %v739_v11 = vadd.f32 %v717_v62, %v629_v6  ;;  %v831_v12 = vmul.f32 %v1175_v8, %v753_v29  ;;  %1176 = vpow2.f32 %v788_v7  ;;  %v895_v1 = vpop.permute.xlu0 %894 }
  0xe1   : > { %1178 = vrcp.f32 %v806_v10 }
  0xe2   : > { %v922_v13 = vmul.f32 %v880_v9, %v831_v12  ;;  %v756_v15 = vadd.f32 %v1398_v16, %v739_v11 }
  0xe4   : > { %v719_v14 = vpop.f32.mrf.mxu3  ;;  %v935_v18 = vpack.c.bf16 %v922_v13, %v922_v13  ;;  %v769_v20 = vsub.f32 0.0, %v756_v15 }
  0xe5   : > { %v609_v21 = vpop.f32.mrf.mxu2 }
  0xe6   : > { %v371_v19 = vpop.f32.mrf.mxu0  ;;  %v1177_v23 = vpop.eup %1176  ;;  %949 = vst.msk [vmem:[%s1408_s20 + $0x14] sm:$0xf] %vm943_vm4, %v935_v18  ;;  %v630_v24 = vadd.f32 %v609_v21, %v434_v17  ;;  %v790_v25 = vmul.f32 1.442695, %v769_v20 }
  0xe7   : > { %v438_v22 = vpop.f32.mrf.mxu1  ;;  %v1179_v26 = vpop.eup %1178  ;;  %v807_v28 = vadd.f32 1.0, %v1177_v23  ;;  %v437_v31 = vadd.f32 %v436_v4, %v371_v19 }
  0xe8   : > { %v740_v29 = vadd.f32 %v719_v14, %v630_v24  ;;  %v832_v30 = vmul.f32 %v1179_v26, %v754_v45  ;;  %1180 = vpow2.f32 %v790_v25  ;;  %v890_v45 = vpop.permute.xlu2 %889  ;;  %v900_v14 = vpop.permute.xlu1 %899 }
  0xe9   : > { %1182 = vrcp.f32 %v807_v28 }
  0xea   : > { %v923_v32 = vmul.f32 %v885_v27, %v832_v30  ;;  %v757_v34 = vadd.f32 %v1398_v16, %v740_v29 }
  0xec   : > { %v722_v33 = vpop.f32.mrf.mxu3  ;;  %v936_v35 = vpack.c.bf16 %v923_v32, %v923_v32  ;;  %v770_v37 = vsub.f32 0.0, %v757_v34 }
  0xed   : > { %v612_v38 = vpop.f32.mrf.mxu2 }
  0xee   : > { %v373_v36 = vpop.f32.mrf.mxu0  ;;  %v1181_v40 = vpop.eup %1180  ;;  %950 = vst.msk [vmem:[%s1408_s20 + $0x18] sm:$0xf] %vm943_vm4, %v936_v35  ;;  %v631_v41 = vadd.f32 %v612_v38, %v437_v31  ;;  %v792_v42 = vmul.f32 1.442695, %v770_v37 }
  0xef   : > { %v441_v39 = vpop.f32.mrf.mxu1  ;;  %v1183_v43 = vpop.eup %1182  ;;  %v808_v46 = vadd.f32 1.0, %v1181_v40  ;;  %v439_v52 = vadd.f32 %v438_v22, %v373_v36 }
  0xf0   : > { %v741_v47 = vadd.f32 %v722_v33, %v631_v41  ;;  %v833_v48 = vmul.f32 %v1183_v43, %v755_v63  ;;  %1184 = vpow2.f32 %v792_v42  ;;  %v905_v30 = vpop.permute.xlu2 %904  ;;  %v910_v36 = vpop.permute.xlu0 %909  ;;  %v959_v42 = vld [vmem:[%s1408_s20 + $0x30] sm:$0x7] }
  0xf1   : > { %1186 = vrcp.f32 %v808_v46 }
  0xf2   : > { %v924_v49 = vmul.f32 %v890_v45, %v833_v48  ;;  %v758_v51 = vadd.f32 %v1398_v16, %v741_v47 }
  0xf4   : > { %v724_v50 = vpop.f32.mrf.mxu3  ;;  %v937_v53 = vpack.c.bf16 %v924_v49, %v924_v49  ;;  %v771_v55 = vsub.f32 0.0, %v758_v51 }
  0xf5   : > { %v614_v56 = vpop.f32.mrf.mxu2 }
  0xf6   : > { %v376_v54 = vpop.f32.mrf.mxu0  ;;  %v1185_v59 = vpop.eup %1184  ;;  %951 = vst.msk [vmem:[%s1408_s20 + $0x1c] sm:$0xf] %vm943_vm4, %v937_v53  ;;  %v632_v60 = vadd.f32 %v614_v56, %v439_v52  ;;  %v794_v57 = vmul.f32 1.442695, %v771_v55 }
  0xf7   : > { %v443_v58 = vpop.f32.mrf.mxu1  ;;  %v1187_v61 = vpop.eup %1186  ;;  %v809_v62 = vadd.f32 1.0, %v1185_v59  ;;  %v442_v3 = vadd.f32 %v441_v39, %v376_v54 }
  0xf8   : > { %v834_v63 = vmul.f32 %v1187_v61, %v756_v15  ;;  %v742_v0 = vadd.f32 %v724_v50, %v632_v60  ;;  %1188 = vpow2.f32 %v794_v57 }
  0xf9   : > { %1190 = vrcp.f32 %v809_v62 }
  0xfa   : > { %v925_v2 = vmul.f32 %v895_v1, %v834_v63  ;;  %v759_v5 = vadd.f32 %v1398_v16, %v742_v0 }
  0xfc   : > { %v727_v4 = vpop.f32.mrf.mxu3  ;;  %v938_v6 = vpack.c.bf16 %v925_v2, %v925_v2  ;;  %v772_v7 = vsub.f32 0.0, %v759_v5 }
  0xfd   : > { %v617_v9 = vpop.f32.mrf.mxu2 }
  0xfe   : > { %v378_v8 = vpop.f32.mrf.mxu0  ;;  %v1189_v10 = vpop.eup %1188  ;;  %952 = vst.msk [vmem:[%s1408_s20 + $0x20] sm:$0xf] %vm943_vm4, %v938_v6  ;;  %v796_v11 = vmul.f32 1.442695, %v772_v7  ;;  %v633_v12 = vadd.f32 %v617_v9, %v442_v3 }
  0xff   : > { %v1191_v13 = vpop.eup %1190  ;;  %v810_v15 = vadd.f32 1.0, %v1189_v10 }
 0x100   : > { %1192 = vpow2.f32 %v796_v11  ;;  %v743_v17 = vadd.f32 %v727_v4, %v633_v12  ;;  %v835_v18 = vmul.f32 %v1191_v13, %v757_v34 }
 0x101   : > { %1194 = vrcp.f32 %v810_v15 }
 0x102   : > { %v760_v19 = vadd.f32 %v1398_v16, %v743_v17  ;;  %v926_v20 = vmul.f32 %v900_v14, %v835_v18 }
 0x104   : > { %v729_v21 = vpop.f32.mrf.mxu3  ;;  %v773_v22 = vsub.f32 0.0, %v760_v19  ;;  %v939_v23 = vpack.c.bf16 %v926_v20, %v926_v20 }
 0x105   : > { %v619_v24 = vpop.f32.mrf.mxu2 }
 0x106   : > { %v1193_v25 = vpop.eup %1192  ;;  %v798_v26 = vmul.f32 1.442695, %v773_v22  ;;  %953 = vst.msk [vmem:[%s1408_s20 + $0x24] sm:$0xf] %vm943_vm4, %v939_v23 }
 0x107   : > { %v1195_v27 = vpop.eup %1194  ;;  %v811_v28 = vadd.f32 1.0, %v1193_v25 }
 0x108   : > { %1196 = vpow2.f32 %v798_v26  ;;  %v836_v29 = vmul.f32 %v1195_v27, %v758_v51 }
 0x109   : > { %1198 = vrcp.f32 %v811_v28 }
 0x10a   : > { %v927_v31 = vmul.f32 %v905_v30, %v836_v29 }
 0x10c   : > { %v940_v32 = vpack.c.bf16 %v927_v31, %v927_v31 }
 0x10e   : > { %v1197_v16 = vpop.eup %1196  ;;  %954 = vst.msk [vmem:[%s1408_s20 + $0x28] sm:$0xf] %vm943_vm4, %v940_v32 }
 0x10f   : > { %v1199_v33 = vpop.eup %1198  ;;  %v812_v34 = vadd.f32 1.0, %v1197_v16 }
 0x110   : > { %v837_v35 = vmul.f32 %v1199_v33, %v759_v5 }
 0x111   : > { %1200 = vrcp.f32 %v812_v34 }
 0x112   : > { %v928_v37 = vmul.f32 %v910_v36, %v837_v35 }
 0x114   : > { %v941_v38 = vpack.c.bf16 %v928_v37, %v928_v37 }
 0x116   : > { %955 = vst.msk [vmem:[%s1408_s20 + $0x2c] sm:$0xf] %vm943_vm4, %v941_v38 }
 0x117   : > { %v1201_v39 = vpop.eup %1200 }
 0x118   : > { %v838_v40 = vmul.f32 %v1201_v39, %v760_v19 }
 0x11a   : > { %v929_v41 = vmul.f32 %v1430_v44, %v838_v40 }
 0x11c   : > { %v942_v43 = vpack.c.bf16 %v929_v41, %v929_v41 }
 0x11e   : > { %v960_v45 = vsel %vm958_vm7, %v942_v43, %v959_v42 }
 0x11f   : > { %961 = vst [vmem:[%s1408_s20 + $0x30] sm:$0x7] %v960_v45 }
 0x120 PF: > { %s14_s15 = sadd.s32 1, %s1211_s15  }
 0x121   : > { %p11_p4 = scmp.ge.s32.totalorder %s14_s15, 4  }
 0x123   :  { %13 = sbr.rel (!%p11_p4) target bundleno = 1 (0x1), region = 69 }

// kernel: hgstem_forward.4
= control target key start
LH: loop header
LB: loop body
LE: loop exit
PB: predicated region body
PF: predicated region fallthrough
CT: control target
= control target key end

     0   :  { %s2255_s24 = smov 0   ;;  %s2866_s0 = inlined_call_operand.vmem [shape: bf16[2,101,16], index: 0, kind: input, shape index: {}]   ;;  %s2867_s1 = inlined_call_operand.vmem [shape: bf16[4,16,8], index: 1, kind: input, shape index: {}]   ;;  %s2868_s2 = inlined_call_operand.vmem [shape: f32[1,8], index: 2, kind: input, shape index: {}]   ;;  %s2869_s3 = inlined_call_operand.vmem [shape: bf16[4,8,16], index: 3, kind: input, shape index: {}]   ;;  %s2870_s4 = inlined_call_operand.vmem [shape: f32[1,16], index: 4, kind: input, shape index: {}]   ;;  %s2871_s5 = inlined_call_operand.vmem [shape: f32[101,1], index: 5, kind: input, shape index: {}]   ;;  %s2872_s6 = inlined_call_operand.vmem [shape: bf16[2,81,16], index: 6, kind: output, shape index: {0}]   ;;  %s2873_s7 = inlined_call_operand.vmem [shape: bf16[2,81,16], index: 7, kind: output, shape index: {1}]  }
   0x1 LB: > { %s1886_s25 = sadd.s32 4294967295, %s2212_s24   ;;  %p1890_p0 = scmp.ge.s32.totalorder %s2212_s24, 1  ;;  %s2212_s24 = sphi %s2255_s24, %s18_s24  }
   0x2   : > { %p240_p1 = scmp.lt.s32.totalorder %s2212_s24, 3 }
   0x4   : > { %p241_p2 = pnand %p1890_p0, %p240_p1 }
   0x5   : > { %p277_p3 = scmp.lt.s32.totalorder (!%p241_p2), %s1886_s25, 1 }
   0x6   : > { %244 = sbr.rel (%p241_p2) target bundleno = 481 (0x1e1), region = 44 }
   0xb   : > { %v2051_v0 = vld [vmem:[%s2867_s1] sm:$0xff]  ;;  %v2058_v1 = vld [vmem:[%s2867_s1 + $0x18] sm:$0xff]  ;;  %v2052_v2 = vld [vmem:[%s2867_s1 + $0x8] sm:$0xff]  ;;  %s2877_s25 = smov (!%p277_p3, %s1886_s25), 1  ;;  %v2214_v6 = vmov 0   ;;  %vm394_vm0 = vcmask 130048  }
   0xc   : > { %v2057_v3 = vld [vmem:[%s2867_s1 + $0x10] sm:$0xff]  ;;  %v2278_v4 = vld [vmem:[%s2871_s5 + $0x8] sm:$0xff]  ;;  %477 = vmatpush.bf16.msra.mxu1 %v2051_v0  ;;  %730 = vmatpush.bf16.msra.mxu3 %v2058_v1  ;;  %v2285_v5 = vld [vmem:[%s2871_s5 + $0x18] sm:$0xff]  ;;  %s2092_s15 = smul.u32 52, %s2877_s25  ;;  %vm687_vm1 = vcmask 1046528   ;;  %vm1094_vm3 = vcmask 1043456  }
   0xd   : > { %420 = vmatpush.bf16.msra.mxu0 %v2052_v2  ;;  %632 = vmatpush.bf16.msra.mxu2 %v2057_v3  ;;  %v2305_v17 = vld [vmem:[%s2871_s5 + $0x10] sm:$0xff]  ;;  %v2310_v18 = vld [vmem:[%s2871_s5 + $0x20] sm:$0xff]  ;;  %vm340_vm2 = vsmask.f32 7424  ;;  %v2326_v35 = vld [vmem:[%s2871_s5 + $0x38] sm:$0xff]  ;;  %vm1719_vm4 = vcmask 1045504  }
   0xe   : > { %2103 = vset.pattern.permute.xlu0 %v2214_v6  ;;  %2104 = vset.pattern.permute.xlu1 %v2214_v6  ;;  %s2293_s18 = scalar_lea.vmem %s2866_s0, %s2092_s15  ;;  %v868_v34 = vld [vmem:[%s2871_s5 + $0x30] sm:$0xff]  ;;  %v976_v36 = vld [vmem:[%s2871_s5] sm:$0xff]  ;;  %v871_v45 = vld [vmem:[%s2871_s5 + $0x48] sm:$0xff]  ;;  %s2093_s10 = smul.u32 44, %s2877_s25  ;;  %vm1595_vm5 = vcmask 125952   ;;  %vm958_vm6 = vcmask 60416  }
   0xf   : > { %881 = vperm.xlu0 %2103, %v2278_v4   ;;  %891 = vperm.xlu1 %2104, %v2285_v5   ;;  %v2045_v7 = vld [vmem:[%s2293_s18] sm:$0xff]  ;;  %v2200_v9 = vld [vmem:[%s2293_s18 + $0x4] sm:$0xf0]  ;;  %v2053_v10 = vld [vmem:[%s2293_s18 + $0xc] sm:$0xff]  ;;  %vm1606_vm7 = vcmask 122880   ;;  %vm1075_vm10 = vcmask 64512  }
  0x10   : > { %2105 = vset.pattern.permute.xlu2 %v2214_v6  ;;  %v510_v8 = vld [vmem:[%s2293_s18 + $0x4] sm:$0xff]   ;;  %v344_v13 = vshll.u32 %v2045_v7, 16  ;;  %1934 = vmatmul.msk.bf16.vlgmr.msra.gmra.mxu1 %vm394_vm0, %v2045_v7  ;;  %v342_v14 = vshrl.u32 %v2045_v7, 16  ;;  %v562_v16 = vshll.u32 %v2053_v10, 16  ;;  %v689_v20 = vrot.slane %v2053_v10, 1  ;;  %v2047_v32 = vld [vmem:[%s2293_s18 + $0x10] sm:$0xff]  ;;  %s2510_s13 = scalar_lea.vmem %s2872_s6, %s2093_s10  ;;  %s2810_s17 = scalar_lea.vmem %s2873_s7, %s2093_s10 }
  0x11   : > { %v2201_v11 = vld [vmem:[%s2293_s18 + $0x4] sm:$0xe]  ;;  %v2046_v12 = vld [vmem:[%s2293_s18 + $0x8] sm:$0xff]  ;;  %v555_v23 = vshrl.u32 %v510_v8, 16  ;;  %v557_v24 = vshll.u32 %v510_v8, 16  ;;  %876 = vperm.xlu2 %2105, %v976_v36   ;;  %v2054_v37 = vld [vmem:[%s2293_s18 + $0x14] sm:$0xff] }
  0x12   : > { %v349_v15 = vshll.u32 %v2046_v12, 16  ;;  %v2202_v19 = vor.u32 %v2201_v11, %v2200_v9  ;;  %v346_v21 = vrot.slane %v344_v13, 1  ;;  %v564_v28 = vrot.slane %v562_v16, 1  ;;  %v872_v46 = vld [vmem:[%s2871_s5 + $0x50] sm:$0xff]  ;;  %v2048_v52 = vld [vmem:[%s2293_s18 + $0x18] sm:$0xff]  ;;  %v981_v53 = vld [vmem:[%s2871_s5 + $0x28] sm:$0xff] }
  0x13   : > { %v559_v27 = vrot.slane %v557_v24, 1  ;;  %v353_v38 = vshrl.u32 %v2046_v12, 16  ;;  %v357_v39 = vshll.u32 %v2047_v32, 16  ;;  %v566_v40 = vshrl.u32 %v2053_v10, 16  ;;  %v2055_v54 = vld [vmem:[%s2293_s18 + $0x1c] sm:$0xff]  ;;  %v2056_v7 = vld [vmem:[%s2293_s18 + $0x24] sm:$0xff] }
  0x14   : > { %v351_v22 = vrot.slane %v349_v15, 1  ;;  %v688_v25 = vrot.slane %v2202_v19, 1  ;;  %v347_v26 = vor.u32 %v346_v21, %v342_v14  ;;  %v570_v41 = vshll.u32 %v2054_v37, 16  ;;  %v986_v62 = vld [vmem:[%s2871_s5 + $0x50] sm:$0x1]  ;;  %v984_v6 = vld [vmem:[%s2871_s5 + $0x40] sm:$0xff] }
  0x15   : > { %v560_v31 = vor.u32 %v559_v27, %v555_v23  ;;  %v691_v42 = vrot.slane %v2054_v37, 1  ;;  %v359_v44 = vrot.slane %v357_v39, 1  ;;  %v568_v47 = vor.u32 %v566_v40, %v564_v28  ;;  %v677_v21 = vld [vmem:[%s2293_s18 + $0x30] sm:$0x7]  ;;  %v1918_v23 = vld [vmem:[%s2293_s18 + $0x28] sm:$0xf] }
  0x16   : > { %v690_v29 = vsel %vm687_vm1, %v688_v25, %v689_v20  ;;  %v352_v30 = vsel %vm340_vm2, %v347_v26, %v351_v22  ;;  %v355_v43 = vor.u32 %v353_v38, %v351_v22  ;;  %v572_v48 = vrot.slane %v570_v41, 1  ;;  %v520_v22 = vld [vmem:[%s2293_s18 + $0x30] sm:$0x3]  ;;  %v2050_v24 = vld [vmem:[%s2293_s18 + $0x28] sm:$0x30] }
  0x17   : > { %886 = vperm.xlu0 %2103, %v2305_v17   ;;  %896 = vperm.xlu1 %2104, %v2310_v18   ;;  %v565_v33 = vsel %vm340_vm2, %v560_v31, %v564_v28  ;;  %v692_v49 = vsel %vm687_vm1, %v689_v20, %v691_v42  ;;  %v361_v55 = vshrl.u32 %v2047_v32, 16  ;;  %v365_v56 = vshll.u32 %v2048_v52, 16  ;;  %v519_v20 = vld [vmem:[%s2293_s18 + $0x2c] sm:$0xf]  ;;  %v2013_v31 = vld [vmem:[%s2869_s3 + $0x8] sm:$0xf] }
  0x18   : > { %1974 = vmatmul.msk.bf16.vlgmr.msra.gmra.mxu3 %vm394_vm0, %v690_v29  ;;  %1924 = vmatmul.msk.bf16.vlgmr.msra.gmra.mxu0 %vm394_vm0, %v352_v30  ;;  %v360_v50 = vsel %vm340_vm2, %v355_v43, %v359_v44  ;;  %v573_v51 = vsel %vm340_vm2, %v568_v47, %v572_v48  ;;  %v574_v57 = vshrl.u32 %v2054_v37, 16  ;;  %v578_v58 = vshll.u32 %v2055_v54, 16  ;;  %v873_v29 = vld [vmem:[%s2871_s5 + $0x58] sm:$0x7]  ;;  %v1980_v38 = vld [vmem:[%s2869_s3 + $0x4] sm:$0xf] }
  0x19   : > { %1962 = vmatmul.msk.bf16.vlgmr.msra.gmra.mxu2 %vm394_vm0, %v565_v33  ;;  %901 = vperm.xlu2 %2105, %v981_v53   ;;  %v693_v59 = vrot.slane %v2055_v54, 1  ;;  %v363_v60 = vor.u32 %v361_v55, %v359_v44  ;;  %v367_v61 = vrot.slane %v365_v56, 1  ;;  %v369_v8 = vshrl.u32 %v2048_v52, 16  ;;  %v998_v39 = vld [vmem:[%s2869_s3] sm:$0xf] }
  0x1a   : > { %v576_v63 = vor.u32 %v574_v57, %v572_v48  ;;  %v580_v0 = vrot.slane %v578_v58, 1  ;;  %v582_v9 = vshrl.u32 %v2055_v54, 16  ;;  %v586_v10 = vshll.u32 %v2056_v7, 16 }
  0x1b   : > { %v694_v1 = vsel %vm687_vm1, %v691_v42, %v693_v59  ;;  %v368_v2 = vsel %vm340_vm2, %v363_v60, %v367_v61  ;;  %v695_v11 = vrot.slane %v2056_v7, 1  ;;  %v546_v26 = vunpack.c.l.b16 %v519_v20 }
  0x1c   : > { %v581_v3 = vsel %vm340_vm2, %v576_v63, %v580_v0  ;;  %v584_v14 = vor.u32 %v582_v9, %v580_v0  ;;  %v588_v15 = vrot.slane %v586_v10, 1  ;;  %v684_v27 = vunpack.c.l.b16 %v677_v21  ;;  %v2431_v9 = vld [vmem:[%s2868_s2] ss:$0 sm:$0xff] }
  0x1d   : > { %v696_v16 = vsel %vm687_vm1, %v693_v59, %v695_v11  ;;  %v547_v28 = vunpack.c.l.b16 %v520_v22  ;;  %v1919_v30 = vor.u32 %v2050_v24, %v1918_v23  ;;  %v1096_v42 = vsel %vm1094_vm3, %v1980_v38, 0  ;;  %v2446_v24 = vld [vmem:[%s2293_s18 + $0x18] sm:$0xff]  }
  0x1e   : > { %v589_v25 = vsel %vm340_vm2, %v584_v14, %v588_v15  ;;  %v686_v33 = vpack.c.b16 %v684_v27, %v546_v26  ;;  %v1149_v43 = vsel %vm1094_vm3, %v998_v39, 0  ;;  %1105 = vmatpush.bf16.msrb.mxu0 %v1096_v42  ;;  %v590_v44 = vshrl.u32 %v2056_v7, 16 }
  0x1f   : > { %906 = vperm.xlu0 %2103, %v868_v34   ;;  %911 = vperm.xlu1 %2104, %v2326_v35   ;;  %v381_v41 = vshll.u32 %v1919_v30, 16  ;;  %v385_v54 = vshrl.u32 %v1919_v30, 16  ;;  %vm1607_vm8 = vsmask.f32 256  ;;  %vm970_vm11 = vcmask 58368  }
  0x20   : > { %1935 = vmatmul.msk.bf16.gmra.mxu1 %vm394_vm0, %v2046_v12  ;;  %v371_v12 = vor.u32 %v369_v8, %v367_v61  ;;  %vm2566_vm9 = vmand %vm1606_vm7, %vm1607_vm8  ;;  %vm971_vm12 = vsmask.f32 1280 }
  0x21   : > { %916 = vperm.xlu2 %2105, %v984_v6   ;;  %1158 = vmatpush.bf16.msrb.mxu1 %v1149_v43  ;;  %v383_v48 = vrot.slane %v381_v41, 1  ;;  %v1713_v41 = vld [vmem:[%s2293_s18 + $0x4] sm:$0xe]  ;;  %vm972_vm13 = vmand %vm970_vm11, %vm971_vm12 }
  0x23   : > { %v387_v55 = vor.u32 %v385_v54, %v383_v48 }
  0x27   : > { %921 = vperm.xlu0 %2103, %v871_v45   ;;  %926 = vperm.xlu1 %2104, %v872_v46   ;;  %v697_v46 = vrot.slane %v686_v33, 1 }
  0x28   : > { %1975 = vmatmul.msk.bf16.gmra.mxu3 %vm394_vm0, %v692_v49  ;;  %1925 = vmatmul.msk.bf16.gmra.mxu0 %vm394_vm0, %v360_v50  ;;  %v592_v49 = vor.u32 %v590_v44, %v588_v15  ;;  %v2069_v15 = vld [vmem:[%s2293_s18] sm:$0xff]  }
  0x29   : > { %1963 = vmatmul.msk.bf16.gmra.mxu2 %vm394_vm0, %v573_v51  ;;  %931 = vperm.xlu2 %2105, %v873_v29   ;;  %v698_v51 = vsel %vm687_vm1, %v695_v11, %v697_v46  ;;  %v2070_v20 = vunpack.c.l.bf16 %v2069_v15  ;;  %v2071_v21 = vunpack.c.h.bf16 %v2069_v15  ;;  %v2455_v29 = vunpack.c.l.bf16 %v2446_v24 }
  0x2f   : > { %1520 = vperm.xlu0 %2103, %v976_v36   ;;  %1525 = vperm.xlu1 %2104, %v2278_v4   ;;  %v2049_v4 = vld [vmem:[%s2293_s18 + $0x20] sm:$0xff]  ;;  %v1295_v36 = vsel %vm1094_vm3, %v2013_v31, 0 }
  0x30   : > { %1936 = vmatmul.msk.bf16.gmra.mxu1 %vm394_vm0, %v2047_v32  ;;  %v2036_v32 = vld [vmem:[%s2869_s3 + $0xc] sm:$0xf]  ;;  %v377_v40 = vshrl.u32 %v2049_v4, 16  ;;  %1304 = vmatpush.bf16.msrb.mxu2 %v1295_v36  ;;  %v1646_v36 = vrot.slane %v2070_v20, 1 }
  0x31   : > { %v1386_v37 = vsel %vm1094_vm3, %v2036_v32, 0  ;;  %1530 = vperm.xlu2 %2105, %v2305_v17  }
  0x32   : > { %1395 = vmatpush.bf16.msrb.mxu3 %v1386_v37  ;;  %v1647_v37 = vrot.slane %v2071_v21, 1 }
  0x37   : > { %1535 = vperm.xlu0 %2103, %v2285_v5   ;;  %1570 = vperm.xlu1 %2104, %v986_v62   ;;  %v373_v5 = vshll.u32 %v2049_v4, 16 }
  0x38   : > { %1976 = vmatmul.msk.bf16.gmra.mxu3 %vm394_vm0, %v694_v1  ;;  %1926 = vmatmul.msk.bf16.gmra.mxu0 %vm394_vm0, %v368_v2 }
  0x39   : > { %1964 = vmatmul.msk.bf16.gmra.mxu2 %vm394_vm0, %v581_v3  ;;  %v375_v13 = vrot.slane %v373_v5, 1  ;;  %1540 = vperm.xlu2 %2105, %v2310_v18  }
  0x3b   : > { %v376_v19 = vsel %vm340_vm2, %v371_v12, %v375_v13  ;;  %v379_v47 = vor.u32 %v377_v40, %v375_v13 }
  0x3f   : > { %1545 = vperm.xlu0 %2103, %v981_v53   ;;  %1550 = vperm.xlu1 %2104, %v868_v34   ;;  %v553_v34 = vpack.c.b16 %v547_v28, %v546_v26 }
  0x40   : > { %1937 = vmatmul.msk.bf16.gmra.mxu1 %vm394_vm0, %v2048_v52  ;;  %v384_v52 = vsel %vm340_vm2, %v379_v47, %v383_v48  ;;  %v1715_v47 = vunpack.c.l.bf16 %v1713_v41 }
  0x41   : > { %1555 = vperm.xlu2 %2105, %v2326_v35   ;;  %v598_v17 = vshrl.u32 %v553_v34, 16 }
  0x42   : > { %v1720_v54 = vrot.slane %v1715_v47, 2  ;;  %v1714_v47 = vld [vmem:[%s2293_s18 + $0x2c] sm:$0x3] }
  0x47   : > { %1560 = vperm.xlu0 %2103, %v984_v6   ;;  %1565 = vperm.xlu1 %2104, %v871_v45   ;;  %v594_v45 = vshll.u32 %v553_v34, 16 }
  0x48   : > { %1977 = vmatmul.msk.bf16.gmra.mxu3 %vm394_vm0, %v696_v16  ;;  %1927 = vmatmul.msk.bf16.gmra.mxu0 %vm394_vm0, %v376_v19  ;;  %v2088_v16 = vld [vmem:[%s2293_s18 + $0x8] sm:$0xff]   ;;  %v2089_v19 = vld [vmem:[%s2293_s18 + $0x10] sm:$0xff]  }
  0x49   : > { %1965 = vmatmul.msk.bf16.gmra.mxu2 %vm394_vm0, %v589_v25  ;;  %v596_v50 = vrot.slane %v594_v45, 1  ;;  %v2441_v22 = vunpack.c.h.bf16 %v2088_v16  ;;  %v2443_v23 = vunpack.c.l.bf16 %v2089_v19  ;;  %v2449_v25 = vld [vmem:[%s2293_s18 + $0x20] sm:$0xff]   ;;  %v2452_v28 = vunpack.c.h.bf16 %v2089_v19 }
  0x4a   : > { %v2460_v34 = vunpack.c.l.bf16 %v2088_v16  ;;  %v1648_v45 = vsel %vm687_vm1, %v1646_v36, %v1647_v37 }
  0x4b   : > { %v597_v53 = vsel %vm340_vm2, %v592_v49, %v596_v50  ;;  %v600_v56 = vor.u32 %v598_v17, %v596_v50  ;;  %v1651_v42 = vrot.slane %v2441_v22, 1  ;;  %v1653_v44 = vrot.slane %v2443_v23, 1 }
  0x4c   : > { %v1655_v48 = vrot.slane %v2452_v28, 1  ;;  %v1678_v50 = vmax.f32 %v2070_v20, %v1648_v45  ;;  %v1721_v17 = vrot.slane %v2460_v34, 2 }
  0x50   : > { %1938 = vmatmul.msk.bf16.gmra.mxu1 %vm394_vm0, %v2049_v4 }
  0x58   : > { %1978 = vmatmul.msk.bf16.gmra.mxu3 %vm394_vm0, %v698_v51  ;;  %1928 = vmatmul.msk.bf16.gmra.mxu0 %vm394_vm0, %v384_v52  ;;  %v2473_v51 = vsel %vm687_vm1, %v1651_v42, %v1653_v44  ;;  %v1622_v52 = vld [vmem:[%s2293_s18 + $0x28] sm:$0x1] }
  0x59   : > { %1966 = vmatmul.msk.bf16.gmra.mxu2 %vm394_vm0, %v597_v53 }
  0x60   : > { %1939 = vmatmul.msk.bf16.gmra.mxu1 %vm394_vm0, %v1919_v30  ;;  %v2458_v30 = vunpack.c.l.bf16 %v2449_v25 }
  0x68   : > { %1979 = vmatmul.msk.bf16.gmra.mxu3 %vm394_vm0, %v697_v46  ;;  %1929 = vmatmul.msk.bf16.gmra.mxu0 %vm394_vm0, %v387_v55  ;;  %v1649_v46 = vrot.slane %v2460_v34, 1  ;;  %v2481_v55 = vsel %vm687_vm1, %v1653_v44, %v1655_v48 }
  0x69   : > { %1967 = vmatmul.msk.bf16.gmra.mxu2 %vm394_vm0, %v600_v56  ;;  %v1690_v56 = vld [vmem:[%s2293_s18 + $0x2c] sm:$0x1] }
  0x6a   : > { %v1650_v53 = vsel %vm687_vm1, %v1647_v37, %v1649_v46  ;;  %v1692_v16 = vunpack.c.l.bf16 %v1690_v56 }
  0x6b   : > { %v2418_v61 = vpop.permute.xlu2 %876 }
  0x73   : > { %v2424_v3 = vpop.permute.xlu2 %901 }
  0x7b   : > { %v2466_v43 = vpop.permute.xlu2 %916 }
  0x81   : > { %v2410_v57 = vpop.permute.xlu0 %881  ;;  %v2412_v58 = vpop.permute.xlu1 %891 }
  0x89   : > { %v2414_v18 = vpop.permute.xlu0 %886  ;;  %v2416_v59 = vpop.permute.xlu1 %896 }
  0x8d   : > { %v479_v60 = vpop.f32.mrf.mxu1 }
  0x91   : > { %v2420_v35 = vpop.permute.xlu0 %906  ;;  %v2422_v0 = vpop.permute.xlu1 %911 }
  0x95   : > { %v422_v62 = vpop.f32.mrf.mxu0  ;;  %v481_v63 = vpop.f32.mrf.mxu1 }
  0x96   : > { %v480_v1 = vadd.f32 %v479_v60, %v422_v62 }
  0x99   : > { %v2426_v6 = vpop.permute.xlu0 %921  ;;  %v2433_v11 = vpop.permute.xlu1 %926 }
  0x9b   : > { %v732_v2 = vpop.f32.mrf.mxu3 }
  0x9c   : > { %v634_v7 = vpop.f32.mrf.mxu2 }
  0x9d   : > { %v424_v4 = vpop.f32.mrf.mxu0  ;;  %v484_v8 = vpop.f32.mrf.mxu1  ;;  %v664_v5 = vadd.f32 %v634_v7, %v480_v1  ;;  %v1725_v7 = vrot.slane %v2443_v23, 2 }
  0x9e   : > { %v482_v12 = vadd.f32 %v481_v63, %v424_v4  ;;  %v1702_v63 = vmax.f32 %v1678_v50, %v1650_v53  ;;  %v1722_v4 = vsel %vm1719_vm4, %v1720_v54, %v1721_v17 }
  0x9f   : > { %v762_v10 = vadd.f32 %v732_v2, %v664_v5  ;;  %v1681_v2 = vmax.f32 %v2441_v22, %v2473_v51  ;;  %v1633_v5 = vunpack.c.l.bf16 %v1622_v52 }
  0xa1   : > { %v2436_v14 = vadd.f32 %v2431_v9, %v762_v10  ;;  %v2462_v40 = vpop.permute.xlu0 %1520  ;;  %v2487_v1 = vpop.permute.xlu1 %1525  ;;  %v1705_v15 = vmax.f32 %v1681_v2, %v2481_v55  ;;  %v2502_v36 = vrot.slane %v1633_v5, 1  ;;  %v2532_v2 = vrot.slane %v1692_v16, 1 }
  0xa3   : > { %v734_v13 = vpop.f32.mrf.mxu3  ;;  %v790_v27 = vsub.f32 0.0, %v2436_v14  ;;  %v1688_v54 = vmax.f32 %v1633_v5, %v2502_v36  ;;  %v1729_v5 = vrot.slane %v2455_v29, 2 }
  0xa4   : > { %v636_v32 = vpop.f32.mrf.mxu2 }
  0xa5   : > { %v427_v26 = vpop.f32.mrf.mxu0  ;;  %v486_v33 = vpop.f32.mrf.mxu1  ;;  %v665_v38 = vadd.f32 %v636_v32, %v482_v12  ;;  %v802_v39 = vmul.f32 1.442695, %v790_v27  ;;  %v1679_v27 = vmax.f32 %v2071_v21, %v1650_v53  ;;  %v2513_v21 = vsel %vm687_vm1, %v1649_v46, %v1651_v42 }
  0xa6   : > { %v485_v31 = vadd.f32 %v484_v8, %v427_v26  ;;  %v1727_v8 = vrot.slane %v2452_v28, 2  ;;  %v2520_v53 = vpop.permute.xlu2 %931  ;;  %v1712_v16 = vmax.f32 %v1688_v54, %v2532_v2 }
  0xa7   : > { %v763_v49 = vadd.f32 %v734_v13, %v665_v38  ;;  %2108 = vpow2.f32 %v802_v39  ;;  %v1752_v13 = vmax.f32 %v1702_v63, %v1722_v4  ;;  %v1703_v50 = vmax.f32 %v1679_v27, %v2513_v21 }
  0xa8   : > { %v1728_v32 = vsel %vm1719_vm4, %v1725_v7, %v1727_v8  ;;  %v1716_v4 = vunpack.c.l.bf16 %v1714_v47 }
  0xa9   : > { %v2485_v60 = vadd.f32 %v2431_v9, %v763_v49  ;;  %v1763_v41 = vmul.f32 %v1752_v13, %v2462_v40  ;;  %v1755_v45 = vmax.f32 %v1705_v15, %v1728_v32  ;;  %v2518_v52 = vpop.permute.xlu0 %1535  ;;  %v2541_v27 = vpop.permute.xlu1 %1570 }
  0xaa   : > { %v2544_v32 = vrot.slane %v1716_v4, 2  ;;  %v1795_v4 = vld [vmem:[%s2510_s13 + $0x28] sm:$0x1] }
  0xab   : > { %v737_v62 = vpop.f32.mrf.mxu3  ;;  %v791_v10 = vsub.f32 0.0, %v2485_v60  ;;  %v1774_v49 = vpack.c.bf16 %v1763_v41, %v1763_v41  ;;  %v1766_v46 = vmul.f32 %v1755_v45, %v2518_v52 }
  0xac   : > { %v639_v20 = vpop.f32.mrf.mxu2 }
  0xad   : > { %v429_v12 = vpop.f32.mrf.mxu0  ;;  %v489_v26 = vpop.f32.mrf.mxu1  ;;  %v804_v38 = vmul.f32 1.442695, %v791_v10  ;;  %v666_v39 = vadd.f32 %v639_v20, %v485_v31  ;;  %1785 = vst.msk [vmem:[%s2510_s13] sm:$0xf] %vm1595_vm5, %v1774_v49  ;;  %v1777_v10 = vpack.c.bf16 %v1766_v46, %v1766_v46 }
  0xae   : > { %v487_v19 = vadd.f32 %v486_v33, %v429_v12  ;;  %v2109_v37 = vpop.eup %2108  ;;  %v1723_v33 = vrot.slane %v2441_v22, 2  ;;  %v2535_v12 = vunpack.c.h.bf16 %v2446_v24 }
  0xaf   : > { %v826_v44 = vadd.f32 1.0, %v2109_v37  ;;  %2110 = vpow2.f32 %v804_v38  ;;  %v764_v31 = vadd.f32 %v737_v62, %v666_v39  ;;  %1788 = vst.msk [vmem:[%s2510_s13 + $0xc] sm:$0xf] %vm1595_vm5, %v1777_v10 }
  0xb0   : > { %v1724_v42 = vsel %vm1719_vm4, %v1721_v17, %v1723_v33  ;;  %v1657_v17 = vrot.slane %v2455_v29, 1  ;;  %v1731_v46 = vrot.slane %v2535_v12, 2 }
  0xb1   : > { %2112 = vrcp.f32 %v826_v44  ;;  %v2528_v56 = vadd.f32 %v2431_v9, %v764_v31  ;;  %v1753_v63 = vmax.f32 %v1703_v50, %v1724_v42  ;;  %v1659_v50 = vrot.slane %v2535_v12, 1 }
  0xb2   : > { %v2553_v24 = vsel %vm687_vm1, %v1655_v48, %v1657_v17 }
  0xb3   : > { %v739_v62 = vpop.f32.mrf.mxu3  ;;  %v792_v13 = vsub.f32 0.0, %v2528_v56  ;;  %v1764_v20 = vmul.f32 %v1753_v63, %v2487_v1  ;;  %v1683_v42 = vmax.f32 %v2452_v28, %v2553_v24  ;;  %v1660_v10 = vsel %vm687_vm1, %v1657_v17, %v1659_v50 }
  0xb4   : > { %v641_v38 = vpop.f32.mrf.mxu2  ;;  %v1684_v17 = vmax.f32 %v2455_v29, %v1660_v10 }
  0xb5   : > { %v432_v15 = vpop.f32.mrf.mxu0  ;;  %v2546_v39 = vpop.f32.mrf.mxu1  ;;  %v806_v44 = vmul.f32 1.442695, %v792_v13  ;;  %v667_v45 = vadd.f32 %v641_v38, %v487_v19  ;;  %v1775_v47 = vpack.c.bf16 %v1764_v20, %v1764_v20  ;;  %v1707_v38 = vmax.f32 %v1683_v42, %v1660_v10 }
  0xb6   : > { %v490_v37 = vadd.f32 %v489_v26, %v432_v15  ;;  %v2111_v41 = vpop.eup %2110  ;;  %v1762_v26 = vmax.f32 %v1712_v16, %v2544_v32 }
  0xb7   : > { %v2113_v31 = vpop.eup %2112  ;;  %v827_v49 = vadd.f32 1.0, %v2111_v41  ;;  %2114 = vpow2.f32 %v806_v44  ;;  %v765_v48 = vadd.f32 %v739_v62, %v667_v45  ;;  %1786 = vst.msk [vmem:[%s2510_s13 + $0x4] sm:$0xf] %vm1595_vm5, %v1775_v47  ;;  %v1661_v62 = vrot.slane %v2458_v30, 1  ;;  %v2580_v41 = vpop.permute.xlu2 %1530 }
  0xb8   : > { %v850_v54 = vmul.f32 %v2113_v31, %v2436_v14  ;;  %v1773_v19 = vmul.f32 %v1762_v26, %v2541_v27  ;;  %v1732_v14 = vsel %vm1719_vm4, %v1729_v5, %v1731_v46  ;;  %v1733_v45 = vrot.slane %v2458_v30, 2 }
  0xb9   : > { %2116 = vrcp.f32 %v827_v49  ;;  %v2578_v15 = vadd.f32 %v2431_v9, %v765_v48  ;;  %v2583_v44 = vsel %vm687_vm1, %v1659_v50, %v1661_v62  ;;  %v1680_v47 = vmax.f32 %v2460_v34, %v2513_v21  ;;  %v2593_v48 = vpop.permute.xlu0 %1545 }
  0xba   : > { %v934_v13 = vmul.f32 %v2418_v61, %v850_v54  ;;  %v1784_v16 = vpack.c.bf16 %v1773_v19, %v1773_v19  ;;  %v1757_v42 = vmax.f32 %v1707_v38, %v1732_v14  ;;  %v1708_v50 = vmax.f32 %v1684_v17, %v2583_v44 }
  0xbb   : > { %v742_v20 = vpop.f32.mrf.mxu3  ;;  %v793_v26 = vsub.f32 0.0, %v2578_v15  ;;  %v1734_v19 = vsel %vm1719_vm4, %v1731_v46, %v1733_v45  ;;  %v1704_v34 = vmax.f32 %v1680_v47, %v2473_v51  ;;  %v2610_v47 = vunpack.c.h.bf16 %v2449_v25 }
  0xbc   : > { %v946_v61 = vpack.c.bf16 %v934_v13, %v934_v13  ;;  %v1796_v49 = vsel %vm2566_vm9, %v1784_v16, %v1795_v4  ;;  %v644_v54 = vpop.f32.mrf.mxu2  ;;  %v1768_v14 = vmul.f32 %v1757_v42, %v2593_v48  ;;  %v1726_v16 = vsel %vm1719_vm4, %v1723_v33, %v1725_v7 }
  0xbd   : > { %v434_v31 = vpop.f32.mrf.mxu0  ;;  %1797 = vst [vmem:[%s2510_s13 + $0x28] sm:$0x1] %v1796_v49  ;;  %v2115_v21 = vpop.eup %2114  ;;  %v808_v10 = vmul.f32 1.442695, %v793_v26  ;;  %v668_v13 = vadd.f32 %v644_v54, %v490_v37  ;;  %v1758_v46 = vmax.f32 %v1708_v50, %v1734_v19  ;;  %v1754_v51 = vmax.f32 %v1704_v34, %v1726_v16  ;;  %v1689_v37 = vld [vmem:[%s2293_s18 + $0x28] sm:$0xf] }
  0xbe   : > { %959 = vst.msk [vmem:[#allocation2] sm:$0xf] %vm958_vm6, %v946_v61  ;;  %v494_v4 = vpop.f32.mrf.mxu1  ;;  %v828_v17 = vadd.f32 1.0, %v2115_v21  ;;  %v2607_v49 = vpop.permute.xlu1 %1550  ;;  %v1779_v42 = vpack.c.bf16 %v1768_v14, %v1768_v14  ;;  %v1663_v33 = vrot.slane %v2610_v47, 1  ;;  %v492_v50 = vadd.f32 %v2546_v39, %v434_v31 }
  0xbf   : > { %v2117_v38 = vpop.eup %2116  ;;  %2118 = vpow2.f32 %v808_v10  ;;  %v766_v26 = vadd.f32 %v742_v20, %v668_v13  ;;  %v1769_v22 = vmul.f32 %v1758_v46, %v2607_v49  ;;  %v1765_v7 = vmul.f32 %v1754_v51, %v2580_v41  ;;  %v2628_v16 = vpop.permute.xlu2 %1540 }
  0xc0   : > { %v851_v61 = vmul.f32 %v2117_v38, %v2485_v60  ;;  %2120 = vrcp.f32 %v828_v17  ;;  %1790 = vst.msk [vmem:[%s2510_s13 + $0x14] sm:$0xf] %vm1595_vm5, %v1779_v42  ;;  %v1691_v60 = vunpack.c.l.bf16 %v1689_v37  ;;  %v1664_v21 = vsel %vm687_vm1, %v1661_v62, %v1663_v33 }
  0xc1   : > { %v2620_v25 = vadd.f32 %v2431_v9, %v766_v26  ;;  %v1780_v20 = vpack.c.bf16 %v1769_v22, %v1769_v22  ;;  %v1776_v34 = vpack.c.bf16 %v1765_v7, %v1765_v7  ;;  %v1735_v10 = vrot.slane %v2610_v47, 2 }
  0xc2   : > { %v935_v54 = vmul.f32 %v2410_v57, %v851_v61  ;;  %v1686_v39 = vmax.f32 %v2458_v30, %v1664_v21  ;;  %v1695_v31 = vrot.slane %v1691_v60, 1  ;;  %v1737_v46 = vrot.slane %v1691_v60, 2 }
  0xc3   : > { %v744_v19 = vpop.f32.mrf.mxu3  ;;  %v794_v14 = vsub.f32 0.0, %v2620_v25  ;;  %1791 = vst.msk [vmem:[%s2510_s13 + $0x18] sm:$0xf] %vm1595_vm5, %v1780_v20  ;;  %v1666_v62 = vsel %vm687_vm1, %v1663_v33, %v2502_v36  ;;  %v1682_v51 = vmax.f32 %v2443_v23, %v2481_v55  ;;  %v1736_v28 = vsel %vm1719_vm4, %v1733_v45, %v1735_v10 }
  0xc4   : > { %v947_v13 = vpack.c.bf16 %v935_v54, %v935_v54  ;;  %v646_v17 = vpop.f32.mrf.mxu2  ;;  %v1696_v42 = vsel %vm687_vm1, %v1663_v33, %v1695_v31  ;;  %v1687_v22 = vmax.f32 %v2610_v47, %v1666_v62  ;;  %1787 = vst.msk [vmem:[%s2510_s13 + $0x8] sm:$0xf] %vm1595_vm5, %v1776_v34  ;;  %v1738_v60 = vsel %vm1719_vm4, %v1735_v10, %v1737_v46 }
  0xc5   : > { %v437_v57 = vpop.f32.mrf.mxu0  ;;  %v2119_v37 = vpop.eup %2118  ;;  %v810_v61 = vmul.f32 1.442695, %v794_v14  ;;  %v669_v26 = vadd.f32 %v646_v17, %v492_v50  ;;  %v1710_v54 = vmax.f32 %v1686_v39, %v1696_v42  ;;  %v1698_v36 = vsel %vm687_vm1, %v1695_v31, %v2532_v2 }
  0xc6   : > { %v495_v38 = vadd.f32 %v494_v4, %v437_v57  ;;  %960 = vst.msk [vmem:[#allocation2 + $0x4] sm:$0xf] %vm958_vm6, %v947_v13  ;;  %v2121_v4 = vpop.eup %2120  ;;  %v829_v7 = vadd.f32 1.0, %v2119_v37  ;;  %v496_v20 = vpop.f32.mrf.mxu1  ;;  %v1711_v33 = vmax.f32 %v1687_v22, %v1698_v36  ;;  %v1740_v34 = vsel %vm1719_vm4, %v1737_v46, %v2544_v32 }
  0xc7   : > { %v852_v23 = vmul.f32 %v2121_v4, %v2528_v56  ;;  %2122 = vpow2.f32 %v810_v61  ;;  %v767_v55 = vadd.f32 %v744_v19, %v669_v26  ;;  %v2645_v50 = vpop.permute.xlu0 %1560  ;;  %v1760_v47 = vmax.f32 %v1710_v54, %v1738_v60  ;;  %v2647_v13 = vpop.permute.xlu1 %1565 }
  0xc8   : > { %2124 = vrcp.f32 %v829_v7  ;;  %v1706_v14 = vmax.f32 %v1682_v51, %v2553_v24  ;;  %v1761_v19 = vmax.f32 %v1711_v33, %v1740_v34  ;;  %v1730_v39 = vsel %vm1719_vm4, %v1727_v8, %v1729_v5  ;;  %v2673_v42 = vpop.permute.xlu2 %1555 }
  0xc9   : > { %v936_v57 = vmul.f32 %v2414_v18, %v852_v23  ;;  %v2654_v2 = vadd.f32 %v2431_v9, %v767_v55  ;;  %v1771_v31 = vmul.f32 %v1760_v47, %v2645_v50  ;;  %v1685_v32 = vmax.f32 %v2535_v12, %v2583_v44 }
  0xca   : > { %v1756_v17 = vmax.f32 %v1706_v14, %v1730_v39  ;;  %v1772_v62 = vmul.f32 %v1761_v19, %v2647_v13 }
  0xcb   : > { %v747_v56 = vpop.f32.mrf.mxu3  ;;  %v948_v24 = vpack.c.bf16 %v936_v57, %v936_v57  ;;  %v795_v18 = vsub.f32 0.0, %v2654_v2  ;;  %v1782_v29 = vpack.c.bf16 %v1771_v31, %v1771_v31  ;;  %v1709_v37 = vmax.f32 %v1685_v32, %v1664_v21 }
  0xcc   : > { %v649_v8 = vpop.f32.mrf.mxu2  ;;  %v1767_v51 = vmul.f32 %v1756_v17, %v2628_v16  ;;  %v1783_v26 = vpack.c.bf16 %v1772_v62, %v1772_v62 }
  0xcd   : > { %v439_v46 = vpop.f32.mrf.mxu0  ;;  %v2669_v5 = vld [vmem:[#allocation2] sm:$0xff]  ;;  %v2123_v12 = vpop.eup %2122  ;;  %961 = vst.msk [vmem:[#allocation2 + $0x8] sm:$0xf] %vm958_vm6, %v948_v24  ;;  %v812_v44 = vmul.f32 1.442695, %v795_v18  ;;  %v670_v61 = vadd.f32 %v649_v8, %v495_v38  ;;  %v1759_v10 = vmax.f32 %v1709_v37, %v1736_v28 }
  0xce   : > { %v2125_v30 = vpop.eup %2124  ;;  %v830_v22 = vadd.f32 1.0, %v2123_v12  ;;  %1793 = vst.msk [vmem:[%s2510_s13 + $0x20] sm:$0xf] %vm1595_vm5, %v1782_v29  ;;  %2007 = vmatmul.msk.bf16.vlgmr.msrb.gmra.mxu1 %vm1075_vm10, %v2669_v5  ;;  %v1778_v45 = vpack.c.bf16 %v1767_v51, %v1767_v51  ;;  %v499_v36 = vpop.f32.mrf.mxu1  ;;  %v1032_v32 = vshll.u32 %v2669_v5, 16 }
  0xcf   : > { %v853_v21 = vmul.f32 %v2125_v30, %v2578_v15  ;;  %2126 = vpow2.f32 %v812_v44  ;;  %v768_v4 = vadd.f32 %v747_v56, %v670_v61  ;;  %1794 = vst.msk [vmem:[%s2510_s13 + $0x24] sm:$0xf] %vm1595_vm5, %v1783_v26  ;;  %v1770_v38 = vmul.f32 %v1759_v10, %v2673_v42  ;;  %v2204_v44 = vld [vmem:[#allocation2 + $0x4] sm:$0xe] }
  0xd0   : > { %2128 = vrcp.f32 %v830_v22  ;;  %1789 = vst.msk [vmem:[%s2510_s13 + $0x10] sm:$0xf] %vm1595_vm5, %v1778_v45  ;;  %v497_v15 = vadd.f32 %v496_v20, %v439_v46  ;;  %v1030_v45 = vshrl.u32 %v2669_v5, 16 }
  0xd1   : > { %v937_v7 = vmul.f32 %v2412_v58, %v853_v21  ;;  %v2687_v54 = vadd.f32 %v2431_v9, %v768_v4  ;;  %v1781_v23 = vpack.c.bf16 %v1770_v38, %v1770_v38 }
  0xd3   : > { %v749_v60 = vpop.f32.mrf.mxu3  ;;  %v949_v55 = vpack.c.bf16 %v937_v7, %v937_v7  ;;  %v796_v33 = vsub.f32 0.0, %v2687_v54  ;;  %1792 = vst.msk [vmem:[%s2510_s13 + $0x1c] sm:$0xf] %vm1595_vm5, %v1781_v23 }
  0xd4   : > { %v651_v34 = vpop.f32.mrf.mxu2  ;;  %v2693_v58 = vld [vmem:[#allocation2 + $0x4] sm:$0xff]  }
  0xd5   : > { %v442_v47 = vpop.f32.mrf.mxu0  ;;  %v2127_v14 = vpop.eup %2126  ;;  %962 = vst.msk [vmem:[#allocation2 + $0xc] sm:$0xf] %vm958_vm6, %v949_v55  ;;  %v814_v57 = vmul.f32 1.442695, %v796_v33  ;;  %v671_v56 = vadd.f32 %v651_v34, %v497_v15  ;;  %v2203_v19 = vld [vmem:[#allocation2 + $0x4] sm:$0xf0] }
  0xd6   : > { %v2129_v39 = vpop.eup %2128  ;;  %v831_v31 = vadd.f32 1.0, %v2127_v14  ;;  %v500_v18 = vadd.f32 %v499_v36, %v442_v47  ;;  %v501_v8 = vpop.f32.mrf.mxu1  ;;  %v2205_v55 = vor.u32 %v2204_v44, %v2203_v19 }
  0xd7   : > { %v854_v17 = vmul.f32 %v2129_v39, %v2620_v25  ;;  %2130 = vpow2.f32 %v814_v57  ;;  %v769_v20 = vadd.f32 %v749_v60, %v671_v56  ;;  %v1034_v25 = vrot.slane %v1032_v32, 1 }
  0xd8   : > { %2132 = vrcp.f32 %v831_v31  ;;  %v1233_v60 = vshll.u32 %v2693_v58, 16  ;;  %v1356_v31 = vrot.slane %v2205_v55, 1 }
  0xd9   : > { %v938_v24 = vmul.f32 %v2416_v59, %v854_v17  ;;  %v2699_v46 = vadd.f32 %v2431_v9, %v769_v20  ;;  %v1035_v38 = vor.u32 %v1034_v25, %v1030_v45 }
  0xda   : > { %v1235_v57 = vrot.slane %v1233_v60, 1 }
  0xdb   : > { %v752_v62 = vpop.f32.mrf.mxu3  ;;  %v950_v28 = vpack.c.bf16 %v938_v24, %v938_v24  ;;  %v797_v29 = vsub.f32 0.0, %v2699_v46 }
  0xdc   : > { %v654_v37 = vpop.f32.mrf.mxu2  ;;  %v2702_v12 = vld [vmem:[#allocation2 + $0x8] sm:$0xff] }
  0xdd   : > { %v444_v51 = vpop.f32.mrf.mxu0  ;;  %v2131_v61 = vpop.eup %2130  ;;  %963 = vst.msk [vmem:[#allocation2 + $0x10] sm:$0xf] %vm958_vm6, %v950_v28  ;;  %v816_v26 = vmul.f32 1.442695, %v797_v29  ;;  %v672_v59 = vadd.f32 %v654_v37, %v500_v18  ;;  %v1037_v10 = vshll.u32 %v2702_v12, 16  ;;  %v1231_v18 = vshrl.u32 %v2693_v58, 16 }
  0xde   : > { %v2133_v30 = vpop.eup %2132  ;;  %v832_v22 = vadd.f32 1.0, %v2131_v61  ;;  %2008 = vmatmul.msk.bf16.gmra.mxu1 %vm1075_vm10, %v2702_v12  ;;  %v502_v47 = vadd.f32 %v501_v8, %v444_v51  ;;  %v504_v20 = vpop.f32.mrf.mxu1 }
  0xdf   : > { %v855_v21 = vmul.f32 %v2133_v30, %v2654_v2  ;;  %2134 = vpow2.f32 %v816_v26  ;;  %v770_v4 = vadd.f32 %v752_v62, %v672_v59  ;;  %v1039_v7 = vrot.slane %v1037_v10, 1 }
  0xe0   : > { %2136 = vrcp.f32 %v832_v22  ;;  %v1236_v51 = vor.u32 %v1235_v57, %v1231_v18 }
  0xe1   : > { %v939_v36 = vmul.f32 %v2424_v3, %v855_v21  ;;  %v2713_v23 = vadd.f32 %v2431_v9, %v770_v4  ;;  %v1040_v5 = vsel %vm340_vm2, %v1035_v38, %v1039_v7  ;;  %v1041_v38 = vshrl.u32 %v2702_v12, 16 }
  0xe2   : > { %2001 = vmatmul.msk.bf16.vlgmr.msrb.gmra.mxu0 %vm1075_vm10, %v1040_v5 }
  0xe3   : > { %v754_v15 = vpop.f32.mrf.mxu3  ;;  %v951_v33 = vpack.c.bf16 %v939_v36, %v939_v36  ;;  %v798_v2 = vsub.f32 0.0, %v2713_v23 }
  0xe4   : > { %v656_v34 = vpop.f32.mrf.mxu2  ;;  %v2718_v14 = vld [vmem:[#allocation2 + $0xc] sm:$0xff] }
  0xe5   : > { %v2135_v56 = vpop.eup %2134  ;;  %964 = vst.msk [vmem:[#allocation2 + $0x14] sm:$0xf] %vm958_vm6, %v951_v33  ;;  %v818_v3 = vmul.f32 1.442695, %v798_v2  ;;  %v673_v39 = vadd.f32 %v656_v34, %v502_v47  ;;  %v447_v32 = vpop.f32.mrf.mxu0  ;;  %v1357_v24 = vrot.slane %v2718_v14, 1  ;;  %v1238_v62 = vshll.u32 %v2718_v14, 16 }
  0xe6   : > { %v2137_v19 = vpop.eup %2136  ;;  %v833_v17 = vadd.f32 1.0, %v2135_v56  ;;  %v505_v44 = vadd.f32 %v504_v20, %v447_v32  ;;  %v1043_v33 = vor.u32 %v1041_v38, %v1039_v7  ;;  %v1242_v18 = vshrl.u32 %v2718_v14, 16 }
  0xe7   : > { %v856_v28 = vmul.f32 %v2137_v19, %v2687_v54  ;;  %2138 = vpow2.f32 %v818_v3  ;;  %v771_v29 = vadd.f32 %v754_v15, %v673_v39  ;;  %v1358_v8 = vsel %vm687_vm1, %v1356_v31, %v1357_v24  ;;  %v506_v15 = vpop.f32.mrf.mxu1 }
  0xe8   : > { %2140 = vrcp.f32 %v833_v17  ;;  %v1240_v37 = vrot.slane %v1238_v62, 1  ;;  %2037 = vmatmul.msk.bf16.vlgmr.msrb.gmra.mxu3 %vm1075_vm10, %v1358_v8 }
  0xe9   : > { %v940_v25 = vmul.f32 %v2420_v35, %v856_v28  ;;  %v2728_v61 = vadd.f32 %v2431_v9, %v771_v29 }
  0xea   : > { %v1241_v58 = vsel %vm340_vm2, %v1236_v51, %v1240_v37  ;;  %v1244_v51 = vor.u32 %v1242_v18, %v1240_v37 }
  0xeb   : > { %v952_v26 = vpack.c.bf16 %v940_v25, %v940_v25  ;;  %v799_v54 = vsub.f32 0.0, %v2728_v61  ;;  %2030 = vmatmul.msk.bf16.vlgmr.msrb.gmra.mxu2 %vm1075_vm10, %v1241_v58  ;;  %v757_v59 = vpop.f32.mrf.mxu3 }
  0xec   : > { %v659_v30 = vpop.f32.mrf.mxu2  ;;  %v2734_v22 = vld [vmem:[#allocation2 + $0x10] sm:$0xff] }
  0xed   : > { %v2139_v45 = vpop.eup %2138  ;;  %965 = vst.msk [vmem:[#allocation2 + $0x18] sm:$0xf] %vm958_vm6, %v952_v26  ;;  %v820_v35 = vmul.f32 1.442695, %v799_v54  ;;  %v674_v10 = vadd.f32 %v659_v30, %v505_v44  ;;  %v1045_v60 = vshll.u32 %v2734_v22, 16  ;;  %v449_v5 = vpop.f32.mrf.mxu0 }
  0xee   : > { %v2141_v21 = vpop.eup %2140  ;;  %v834_v4 = vadd.f32 1.0, %v2139_v45  ;;  %2009 = vmatmul.msk.bf16.gmra.mxu1 %vm1075_vm10, %v2734_v22  ;;  %v507_v3 = vadd.f32 %v506_v15, %v449_v5 }
  0xef   : > { %v857_v36 = vmul.f32 %v2141_v21, %v2699_v46  ;;  %2142 = vpow2.f32 %v820_v35  ;;  %v772_v55 = vadd.f32 %v757_v59, %v674_v10  ;;  %v1047_v47 = vrot.slane %v1045_v60, 1 }
  0xf0   : > { %2144 = vrcp.f32 %v834_v4 }
  0xf1   : > { %v941_v2 = vmul.f32 %v2422_v0, %v857_v36  ;;  %v788_v34 = vadd.f32 %v2431_v9, %v772_v55  ;;  %v1048_v57 = vsel %vm340_vm2, %v1043_v33, %v1047_v47 }
  0xf2   : > { %2002 = vmatmul.msk.bf16.gmra.mxu0 %vm1075_vm10, %v1048_v57 }
  0xf3   : > { %v953_v56 = vpack.c.bf16 %v941_v2, %v941_v2  ;;  %v800_v12 = vsub.f32 0.0, %v788_v34  ;;  %v759_v32 = vpop.f32.mrf.mxu3 }
  0xf4   : > { %v661_v39 = vpop.f32.mrf.mxu2  ;;  %v2065_v46 = vld [vmem:[#allocation2 + $0x14] sm:$0xff] }
  0xf5   : > { %v2143_v31 = vpop.eup %2142  ;;  %966 = vst.msk [vmem:[#allocation2 + $0x1c] sm:$0xf] %vm958_vm6, %v953_v56  ;;  %v822_v19 = vmul.f32 1.442695, %v800_v12  ;;  %v675_v17 = vadd.f32 %v661_v39, %v507_v3  ;;  %v1359_v0 = vrot.slane %v2065_v46, 1  ;;  %v1246_v62 = vshll.u32 %v2065_v46, 16 }
  0xf6   : > { %v2145_v7 = vpop.eup %2144  ;;  %v835_v20 = vadd.f32 1.0, %v2143_v31  ;;  %v1250_v5 = vshrl.u32 %v2065_v46, 16 }
  0xf7   : > { %v858_v28 = vmul.f32 %v2145_v7, %v2713_v23  ;;  %2146 = vpow2.f32 %v822_v19  ;;  %v773_v29 = vadd.f32 %v759_v32, %v675_v17  ;;  %v1360_v8 = vsel %vm687_vm1, %v1357_v24, %v1359_v0  ;;  %v973_v7 = vld [vmem:[#allocation2 + $0x2c] sm:$0x3] }
  0xf8   : > { %2148 = vrcp.f32 %v835_v20  ;;  %v1248_v25 = vrot.slane %v1246_v62, 1  ;;  %2038 = vmatmul.msk.bf16.gmra.mxu3 %vm1075_vm10, %v1360_v8 }
  0xf9   : > { %v942_v44 = vmul.f32 %v2466_v43, %v858_v28  ;;  %v789_v58 = vadd.f32 %v2431_v9, %v773_v29  ;;  %v1049_v43 = vshrl.u32 %v2734_v22, 16 }
  0xfa   : > { %v1249_v26 = vsel %vm340_vm2, %v1244_v51, %v1248_v25  ;;  %v1252_v2 = vor.u32 %v1250_v5, %v1248_v25 }
  0xfb   : > { %v954_v54 = vpack.c.bf16 %v942_v44, %v942_v44  ;;  %v801_v14 = vsub.f32 0.0, %v789_v58  ;;  %2031 = vmatmul.msk.bf16.gmra.mxu2 %vm1075_vm10, %v1249_v26  ;;  %v1051_v35 = vor.u32 %v1049_v43, %v1047_v47 }
  0xfc   : > { %v2062_v23 = vld [vmem:[#allocation2 + $0x18] sm:$0xff] }
  0xfd   : > { %v2147_v59 = vpop.eup %2146  ;;  %967 = vst.msk [vmem:[#allocation2 + $0x20] sm:$0xf] %vm958_vm6, %v954_v54  ;;  %v824_v30 = vmul.f32 1.442695, %v801_v14  ;;  %v1053_v9 = vshll.u32 %v2062_v23, 16 }
  0xfe   : > { %v2149_v24 = vpop.eup %2148  ;;  %v836_v37 = vadd.f32 1.0, %v2147_v59  ;;  %2010 = vmatmul.msk.bf16.gmra.mxu1 %vm1075_vm10, %v2062_v23 }
  0xff   : > { %v859_v45 = vmul.f32 %v2149_v24, %v2728_v61  ;;  %2150 = vpow2.f32 %v824_v30  ;;  %v1055_v10 = vrot.slane %v1053_v9, 1 }
 0x100   : > { %2152 = vrcp.f32 %v836_v37 }
 0x101   : > { %v943_v21 = vmul.f32 %v2426_v6, %v859_v45  ;;  %v1056_v4 = vsel %vm340_vm2, %v1051_v35, %v1055_v10 }
 0x102   : > { %2003 = vmatmul.msk.bf16.gmra.mxu0 %vm1075_vm10, %v1056_v4 }
 0x103   : > { %v955_v38 = vpack.c.bf16 %v943_v21, %v943_v21 }
 0x104   : > { %v2066_v60 = vld [vmem:[#allocation2 + $0x1c] sm:$0xff] }
 0x105   : > { %v2151_v36 = vpop.eup %2150  ;;  %968 = vst.msk [vmem:[#allocation2 + $0x24] sm:$0xf] %vm958_vm6, %v955_v38  ;;  %v1361_v15 = vrot.slane %v2066_v60, 1  ;;  %v1254_v61 = vshll.u32 %v2066_v60, 16  ;;  %v1258_v8 = vshrl.u32 %v2066_v60, 16 }
 0x106   : > { %v2153_v55 = vpop.eup %2152  ;;  %v837_v22 = vadd.f32 1.0, %v2151_v36 }
 0x107   : > { %v860_v33 = vmul.f32 %v2153_v55, %v788_v34  ;;  %v1362_v47 = vsel %vm687_vm1, %v1359_v0, %v1361_v15  ;;  %v1256_v6 = vrot.slane %v1254_v61, 1  ;;  %v1057_v34 = vshrl.u32 %v2062_v23, 16 }
 0x108   : > { %2154 = vrcp.f32 %v837_v22  ;;  %2039 = vmatmul.msk.bf16.gmra.mxu3 %vm1075_vm10, %v1362_v47 }
 0x109   : > { %v944_v57 = vmul.f32 %v2433_v11, %v860_v33  ;;  %v1257_v56 = vsel %vm340_vm2, %v1252_v2, %v1256_v6  ;;  %v1059_v19 = vor.u32 %v1057_v34, %v1055_v10  ;;  %v2790_v34 = vld [vmem:[%s2870_s4] ss:$0 sm:$0xff] }
 0x10b   : > { %v956_v3 = vpack.c.bf16 %v944_v57, %v944_v57  ;;  %2032 = vmatmul.msk.bf16.gmra.mxu2 %vm1075_vm10, %v1257_v56 }
 0x10c   : > { %v2063_v12 = vld [vmem:[#allocation2 + $0x20] sm:$0xff] }
 0x10d   : > { %969 = vst.msk [vmem:[#allocation2 + $0x28] sm:$0xf] %vm958_vm6, %v956_v3  ;;  %v1061_v46 = vshll.u32 %v2063_v12, 16  ;;  %v1065_v59 = vshrl.u32 %v2063_v12, 16 }
 0x10e   : > { %v2155_v39 = vpop.eup %2154  ;;  %2011 = vmatmul.msk.bf16.gmra.mxu1 %vm1075_vm10, %v2063_v12 }
 0x10f   : > { %v861_v31 = vmul.f32 %v2155_v39, %v789_v58  ;;  %v1063_v11 = vrot.slane %v1061_v46, 1  ;;  %v1260_v58 = vor.u32 %v1258_v8, %v1256_v6 }
 0x111   : > { %v945_v17 = vmul.f32 %v2520_v53, %v861_v31  ;;  %v1064_v20 = vsel %vm340_vm2, %v1059_v19, %v1063_v11  ;;  %v1067_v43 = vor.u32 %v1065_v59, %v1063_v11 }
 0x112   : > { %2004 = vmatmul.msk.bf16.gmra.mxu0 %vm1075_vm10, %v1064_v20 }
 0x113   : > { %v957_v32 = vpack.c.bf16 %v945_v17, %v945_v17 }
 0x114   : > { %v2067_v0 = vld [vmem:[#allocation2 + $0x24] sm:$0xff] }
 0x115   : > { %v997_v18 = vld [vmem:[#allocation2 + $0x28] sm:$0x1]  ;;  %v974_v62 = vsel %vm972_vm13, %v957_v32, %v973_v7  ;;  %v1363_v29 = vrot.slane %v2067_v0, 1  ;;  %v1262_v51 = vshll.u32 %v2067_v0, 16  ;;  %v1266_v4 = vshrl.u32 %v2067_v0, 16 }
 0x116   : > { %v1022_v28 = vunpack.c.l.b16 %v997_v18  ;;  %975 = vst [vmem:[#allocation2 + $0x2c] sm:$0x3] %v974_v62 }
 0x117   : > { %v1364_v44 = vsel %vm687_vm1, %v1361_v15, %v1363_v29  ;;  %v1264_v53 = vrot.slane %v1262_v51, 1 }
 0x118   : > { %v1028_v25 = vpack.c.b16 %v1022_v28, %v1022_v28  ;;  %2040 = vmatmul.msk.bf16.gmra.mxu3 %vm1075_vm10, %v1364_v44 }
 0x119   : > { %v1265_v26 = vsel %vm340_vm2, %v1260_v58, %v1264_v53  ;;  %v1268_v36 = vor.u32 %v1266_v4, %v1264_v53 }
 0x11a   : > { %v1069_v54 = vshll.u32 %v1028_v25, 16  ;;  %v1073_v22 = vshrl.u32 %v1028_v25, 16 }
 0x11b   : > { %2033 = vmatmul.msk.bf16.gmra.mxu2 %vm1075_vm10, %v1265_v26 }
 0x11c   : > { %v1071_v30 = vrot.slane %v1069_v54, 1 }
 0x11d   : > { %v1347_v14 = vld [vmem:[#allocation2 + $0x2c] sm:$0x3] }
 0x11e   : > { %v1199_v23 = vld [vmem:[#allocation2 + $0x2c] sm:$0x1]  ;;  %2012 = vmatmul.msk.bf16.gmra.mxu1 %vm1075_vm10, %v1028_v25  ;;  %v1353_v24 = vunpack.c.l.b16 %v1347_v14  ;;  %v1072_v35 = vsel %vm340_vm2, %v1067_v43, %v1071_v30 }
 0x11f   : > { %v1223_v37 = vunpack.c.l.b16 %v1199_v23 }
 0x120   : > { %v1355_v9 = vpack.c.b16 %v1353_v24, %v1353_v24 }
 0x121   : > { %v1229_v45 = vpack.c.b16 %v1223_v37, %v1223_v37 }
 0x122   : > { %2005 = vmatmul.msk.bf16.gmra.mxu0 %vm1075_vm10, %v1072_v35  ;;  %v1365_v21 = vrot.slane %v1355_v9, 1 }
 0x123   : > { %v1270_v10 = vshll.u32 %v1229_v45, 16  ;;  %v1274_v15 = vshrl.u32 %v1229_v45, 16 }
 0x124   : > { %v1366_v60 = vsel %vm687_vm1, %v1363_v29, %v1365_v21 }
 0x125   : > { %v1272_v38 = vrot.slane %v1270_v10, 1 }
 0x127   : > { %v1273_v55 = vsel %vm340_vm2, %v1268_v36, %v1272_v38 }
 0x128   : > { %2041 = vmatmul.msk.bf16.gmra.mxu3 %vm1075_vm10, %v1366_v60 }
 0x12b   : > { %2034 = vmatmul.msk.bf16.gmra.mxu2 %vm1075_vm10, %v1273_v55 }
 0x132   : > { %2006 = vmatmul.msk.bf16.gmra.mxu0 %vm1075_vm10, %v1073_v22 }
 0x138   : > { %2042 = vmatmul.msk.bf16.gmra.mxu3 %vm1075_vm10, %v1365_v21 }
 0x13b   : > { %2035 = vmatmul.msk.bf16.gmra.mxu2 %vm1075_vm10, %v1274_v15 }
 0x14b   : > { %v1160_v5 = vpop.f32.mrf.mxu1 }
 0x153   : > { %v1162_v61 = vpop.f32.mrf.mxu1 }
 0x15b   : > { %v1165_v33 = vpop.f32.mrf.mxu1 }
 0x15f   : > { %v1107_v47 = vpop.f32.mrf.mxu0 }
 0x160   : > { %v1161_v3 = vadd.f32 %v1160_v5, %v1107_v47 }
 0x163   : > { %v1167_v2 = vpop.f32.mrf.mxu1 }
 0x167   : > { %v1109_v6 = vpop.f32.mrf.mxu0 }
 0x168   : > { %v1163_v7 = vadd.f32 %v1162_v61, %v1109_v6 }
 0x16b   : > { %v1170_v57 = vpop.f32.mrf.mxu1  ;;  %v1397_v56 = vpop.f32.mrf.mxu3 }
 0x16e   : > { %v1306_v12 = vpop.f32.mrf.mxu2 }
 0x16f   : > { %v1335_v39 = vadd.f32 %v1306_v12, %v1161_v3  ;;  %v1112_v46 = vpop.f32.mrf.mxu0 }
 0x170   : > { %v1166_v25 = vadd.f32 %v1165_v33, %v1112_v46 }
 0x171   : > { %v1426_v31 = vadd.f32 %v1397_v56, %v1335_v39 }
 0x173   : > { %v1441_v19 = vadd.f32 %v2790_v34, %v1426_v31  ;;  %v2793_v11 = vpop.f32.mrf.mxu1  ;;  %v1399_v17 = vpop.f32.mrf.mxu3 }
 0x175   : > { %v1452_v20 = vsub.f32 0.0, %v1441_v19 }
 0x176   : > { %v1308_v32 = vpop.f32.mrf.mxu2 }
 0x177   : > { %v1463_v0 = vmul.f32 1.442695, %v1452_v20  ;;  %v1336_v18 = vadd.f32 %v1308_v32, %v1163_v7  ;;  %v1114_v62 = vpop.f32.mrf.mxu0 }
 0x178   : > { %v1168_v43 = vadd.f32 %v1167_v2, %v1114_v62 }
 0x179   : > { %2156 = vpow2.f32 %v1463_v0  ;;  %v1427_v28 = vadd.f32 %v1399_v17, %v1336_v18 }
 0x17b   : > { %v1442_v29 = vadd.f32 %v2790_v34, %v1427_v28  ;;  %v2796_v8 = vpop.f32.mrf.mxu1  ;;  %v1402_v51 = vpop.f32.mrf.mxu3 }
 0x17d   : > { %v1453_v44 = vsub.f32 0.0, %v1442_v29 }
 0x17e   : > { %v1311_v58 = vpop.f32.mrf.mxu2 }
 0x17f   : > { %v2157_v53 = vpop.eup %2156  ;;  %v1465_v26 = vmul.f32 1.442695, %v1453_v44  ;;  %v1337_v54 = vadd.f32 %v1311_v58, %v1166_v25  ;;  %v1117_v23 = vpop.f32.mrf.mxu0 }
 0x180   : > { %v1485_v14 = vadd.f32 1.0, %v2157_v53  ;;  %v1171_v47 = vadd.f32 %v1170_v57, %v1117_v23 }
 0x181   : > { %2158 = vpow2.f32 %v1465_v26  ;;  %v1428_v59 = vadd.f32 %v1402_v51, %v1337_v54 }
 0x182   : > { %2160 = vrcp.f32 %v1485_v14 }
 0x183   : > { %v1443_v30 = vadd.f32 %v2790_v34, %v1428_v59  ;;  %v2799_v24 = vpop.f32.mrf.mxu1  ;;  %v1404_v37 = vpop.f32.mrf.mxu3 }
 0x185   : > { %v1454_v9 = vsub.f32 0.0, %v1443_v30 }
 0x186   : > { %v1313_v45 = vpop.f32.mrf.mxu2 }
 0x187   : > { %v2159_v35 = vpop.eup %2158  ;;  %v1467_v10 = vmul.f32 1.442695, %v1454_v9  ;;  %v1338_v21 = vadd.f32 %v1313_v45, %v1168_v43  ;;  %v1119_v60 = vpop.f32.mrf.mxu0 }
 0x188   : > { %v2161_v4 = vpop.eup %2160  ;;  %v1486_v38 = vadd.f32 1.0, %v2159_v35  ;;  %v1173_v0 = vadd.f32 %v2793_v11, %v1119_v60 }
 0x189   : > { %v1507_v36 = vmul.f32 %v2161_v4, %v1441_v19  ;;  %2162 = vpow2.f32 %v1467_v10  ;;  %v1429_v55 = vadd.f32 %v1404_v37, %v1338_v21 }
 0x18a   : > { %2164 = vrcp.f32 %v1486_v38 }
 0x18b   : > { %v1573_v22 = vmul.f32 %v2462_v40, %v1507_v36  ;;  %v1444_v15 = vadd.f32 %v2790_v34, %v1429_v55  ;;  %v2803_v5 = vpop.f32.mrf.mxu1  ;;  %v1407_v61 = vpop.f32.mrf.mxu3 }
 0x18d   : > { %v1584_v33 = vpack.c.bf16 %v1573_v22, %v1573_v22  ;;  %v1455_v2 = vsub.f32 0.0, %v1444_v15 }
 0x18e   : > { %v1316_v6 = vpop.f32.mrf.mxu2 }
 0x18f   : > { %v2163_v56 = vpop.eup %2162  ;;  %1596 = vst.msk [vmem:[%s2810_s17] sm:$0xf] %vm1595_vm5, %v1584_v33  ;;  %v1469_v40 = vmul.f32 1.442695, %v1455_v2  ;;  %v1339_v3 = vadd.f32 %v1316_v6, %v1171_v47  ;;  %v1122_v46 = vpop.f32.mrf.mxu0 }
 0x190   : > { %v2165_v12 = vpop.eup %2164  ;;  %v1487_v39 = vadd.f32 1.0, %v2163_v56  ;;  %v1176_v59 = vadd.f32 %v2796_v8, %v1122_v46 }
 0x191   : > { %v1508_v31 = vmul.f32 %v2165_v12, %v1442_v29  ;;  %2166 = vpow2.f32 %v1469_v40  ;;  %v1430_v19 = vadd.f32 %v1407_v61, %v1339_v3 }
 0x192   : > { %2168 = vrcp.f32 %v1487_v39 }
 0x193   : > { %v1574_v17 = vmul.f32 %v2487_v1, %v1508_v31  ;;  %v1445_v7 = vadd.f32 %v2790_v34, %v1430_v19  ;;  %v2816_v57 = vpop.f32.mrf.mxu1  ;;  %v1409_v20 = vpop.f32.mrf.mxu3 }
 0x195   : > { %v1585_v32 = vpack.c.bf16 %v1574_v17, %v1574_v17  ;;  %v1456_v18 = vsub.f32 0.0, %v1445_v7 }
 0x196   : > { %v1318_v62 = vpop.f32.mrf.mxu2 }
 0x197   : > { %v2167_v28 = vpop.eup %2166  ;;  %1597 = vst.msk [vmem:[%s2810_s17 + $0x4] sm:$0xf] %vm1595_vm5, %v1585_v32  ;;  %v1471_v51 = vmul.f32 1.442695, %v1456_v18  ;;  %v1340_v29 = vadd.f32 %v1318_v62, %v1173_v0  ;;  %v1124_v58 = vpop.f32.mrf.mxu0 }
 0x198   : > { %v2169_v25 = vpop.eup %2168  ;;  %v1488_v44 = vadd.f32 1.0, %v2167_v28  ;;  %v1178_v22 = vadd.f32 %v2799_v24, %v1124_v58 }
 0x199   : > { %v1509_v1 = vmul.f32 %v2169_v25, %v1443_v30  ;;  %2170 = vpow2.f32 %v1471_v51  ;;  %v1431_v53 = vadd.f32 %v1409_v20, %v1340_v29 }
 0x19a   : > { %2172 = vrcp.f32 %v1488_v44 }
 0x19b   : > { %v1575_v26 = vmul.f32 %v2580_v41, %v1509_v1  ;;  %v1446_v54 = vadd.f32 %v2790_v34, %v1431_v53  ;;  %v2823_v11 = vpop.f32.mrf.mxu1  ;;  %v1412_v14 = vpop.f32.mrf.mxu3 }
 0x19d   : > { %v1586_v23 = vpack.c.bf16 %v1575_v26, %v1575_v26  ;;  %v1457_v37 = vsub.f32 0.0, %v1446_v54 }
 0x19e   : > { %v1321_v43 = vpop.f32.mrf.mxu2 }
 0x19f   : > { %v2171_v9 = vpop.eup %2170  ;;  %1598 = vst.msk [vmem:[%s2810_s17 + $0x8] sm:$0xf] %vm1595_vm5, %v1586_v23  ;;  %v1473_v45 = vmul.f32 1.442695, %v1457_v37  ;;  %v1341_v30 = vadd.f32 %v1321_v43, %v1176_v59  ;;  %v1127_v21 = vpop.f32.mrf.mxu0 }
 0x1a0   : > { %v2173_v35 = vpop.eup %2172  ;;  %v1489_v10 = vadd.f32 1.0, %v2171_v9  ;;  %v1181_v31 = vadd.f32 %v2803_v5, %v1127_v21 }
 0x1a1   : > { %v1510_v41 = vmul.f32 %v2173_v35, %v1444_v15  ;;  %2174 = vpow2.f32 %v1473_v45  ;;  %v1432_v4 = vadd.f32 %v1412_v14, %v1341_v30 }
 0x1a2   : > { %2176 = vrcp.f32 %v1489_v10 }
 0x1a3   : > { %v1576_v38 = vmul.f32 %v2518_v52, %v1510_v41  ;;  %v1447_v60 = vadd.f32 %v2790_v34, %v1432_v4  ;;  %v1187_v8 = vpop.f32.mrf.mxu1  ;;  %v1414_v36 = vpop.f32.mrf.mxu3 }
 0x1a5   : > { %v1587_v55 = vpack.c.bf16 %v1576_v38, %v1576_v38  ;;  %v1458_v61 = vsub.f32 0.0, %v1447_v60 }
 0x1a6   : > { %v1323_v33 = vpop.f32.mrf.mxu2 }
 0x1a7   : > { %v2175_v47 = vpop.eup %2174  ;;  %1599 = vst.msk [vmem:[%s2810_s17 + $0xc] sm:$0xf] %vm1595_vm5, %v1587_v55  ;;  %v1475_v2 = vmul.f32 1.442695, %v1458_v61  ;;  %v1342_v6 = vadd.f32 %v1323_v33, %v1178_v22  ;;  %v1129_v40 = vpop.f32.mrf.mxu0 }
 0x1a8   : > { %v2177_v15 = vpop.eup %2176  ;;  %v1490_v56 = vadd.f32 1.0, %v2175_v47  ;;  %v1183_v44 = vadd.f32 %v2816_v57, %v1129_v40 }
 0x1a9   : > { %v1511_v3 = vmul.f32 %v2177_v15, %v1445_v7  ;;  %2178 = vpow2.f32 %v1475_v2  ;;  %v1433_v52 = vadd.f32 %v1414_v36, %v1342_v6 }
 0x1aa   : > { %2180 = vrcp.f32 %v1490_v56 }
 0x1ab   : > { %v1577_v12 = vmul.f32 %v2628_v16, %v1511_v3  ;;  %v1448_v39 = vadd.f32 %v2790_v34, %v1433_v52  ;;  %v1417_v24 = vpop.f32.mrf.mxu3 }
 0x1ad   : > { %v1588_v46 = vpack.c.bf16 %v1577_v12, %v1577_v12  ;;  %v1459_v19 = vsub.f32 0.0, %v1448_v39 }
 0x1ae   : > { %v1326_v17 = vpop.f32.mrf.mxu2 }
 0x1af   : > { %v2179_v20 = vpop.eup %2178  ;;  %1600 = vst.msk [vmem:[%s2810_s17 + $0x10] sm:$0xf] %vm1595_vm5, %v1588_v46  ;;  %v1477_v32 = vmul.f32 1.442695, %v1459_v19  ;;  %v1343_v0 = vadd.f32 %v1326_v17, %v1181_v31  ;;  %v1132_v62 = vpop.f32.mrf.mxu0  ;;  %v1609_v17 = vld [vmem:[%s2810_s17 + $0x28] sm:$0x1] }
 0x1b0   : > { %v2181_v7 = vpop.eup %2180  ;;  %v1491_v18 = vadd.f32 1.0, %v2179_v20  ;;  %v1186_v30 = vadd.f32 %v2823_v11, %v1132_v62 }
 0x1b1   : > { %v1512_v28 = vmul.f32 %v2181_v7, %v1446_v54  ;;  %2182 = vpow2.f32 %v1477_v32  ;;  %v1434_v16 = vadd.f32 %v1417_v24, %v1343_v0 }
 0x1b2   : > { %2184 = vrcp.f32 %v1491_v18 }
 0x1b3   : > { %v1578_v51 = vmul.f32 %v2593_v48, %v1512_v28  ;;  %v1449_v29 = vadd.f32 %v2790_v34, %v1434_v16  ;;  %v1419_v5 = vpop.f32.mrf.mxu3 }
 0x1b5   : > { %v1589_v25 = vpack.c.bf16 %v1578_v51, %v1578_v51  ;;  %v1460_v58 = vsub.f32 0.0, %v1449_v29 }
 0x1b6   : > { %v1328_v1 = vpop.f32.mrf.mxu2 }
 0x1b7   : > { %v2183_v53 = vpop.eup %2182  ;;  %1601 = vst.msk [vmem:[%s2810_s17 + $0x14] sm:$0xf] %vm1595_vm5, %v1589_v25  ;;  %v1479_v26 = vmul.f32 1.442695, %v1460_v58  ;;  %v1344_v14 = vadd.f32 %v1328_v1, %v1183_v44  ;;  %v1134_v59 = vpop.f32.mrf.mxu0 }
 0x1b8   : > { %v2185_v54 = vpop.eup %2184  ;;  %v1492_v23 = vadd.f32 1.0, %v2183_v53 }
 0x1b9   : > { %v1513_v37 = vmul.f32 %v2185_v54, %v1447_v60  ;;  %2186 = vpow2.f32 %v1479_v26  ;;  %v1435_v48 = vadd.f32 %v1419_v5, %v1344_v14 }
 0x1ba   : > { %2188 = vrcp.f32 %v1492_v23 }
 0x1bb   : > { %v1579_v43 = vmul.f32 %v2607_v49, %v1513_v37  ;;  %v1450_v9 = vadd.f32 %v2790_v34, %v1435_v48  ;;  %v1422_v57 = vpop.f32.mrf.mxu3 }
 0x1bd   : > { %v1590_v45 = vpack.c.bf16 %v1579_v43, %v1579_v43  ;;  %v1461_v35 = vsub.f32 0.0, %v1450_v9 }
 0x1be   : > { %v1331_v10 = vpop.f32.mrf.mxu2 }
 0x1bf   : > { %v2187_v21 = vpop.eup %2186  ;;  %1602 = vst.msk [vmem:[%s2810_s17 + $0x18] sm:$0xf] %vm1595_vm5, %v1590_v45  ;;  %v1481_v41 = vmul.f32 1.442695, %v1461_v35  ;;  %v1345_v4 = vadd.f32 %v1331_v10, %v1186_v30 }
 0x1c0   : > { %v2189_v38 = vpop.eup %2188  ;;  %v1493_v60 = vadd.f32 1.0, %v2187_v21 }
 0x1c1   : > { %v1514_v8 = vmul.f32 %v2189_v38, %v1448_v39  ;;  %2190 = vpow2.f32 %v1481_v41  ;;  %v1436_v36 = vadd.f32 %v1422_v57, %v1345_v4 }
 0x1c2   : > { %2192 = vrcp.f32 %v1493_v60 }
 0x1c3   : > { %v1580_v49 = vmul.f32 %v2673_v42, %v1514_v8  ;;  %v1451_v55 = vadd.f32 %v2790_v34, %v1436_v36  ;;  %v1424_v11 = vpop.f32.mrf.mxu3 }
 0x1c5   : > { %v1591_v22 = vpack.c.bf16 %v1580_v49, %v1580_v49  ;;  %v1462_v61 = vsub.f32 0.0, %v1451_v55 }
 0x1c6   : > { %v1333_v33 = vpop.f32.mrf.mxu2 }
 0x1c7   : > { %v2191_v47 = vpop.eup %2190  ;;  %1603 = vst.msk [vmem:[%s2810_s17 + $0x1c] sm:$0xf] %vm1595_vm5, %v1591_v22  ;;  %v1483_v2 = vmul.f32 1.442695, %v1462_v61 }
 0x1c8   : > { %v2193_v6 = vpop.eup %2192  ;;  %v1494_v15 = vadd.f32 1.0, %v2191_v47 }
 0x1c9   : > { %v1515_v56 = vmul.f32 %v2193_v6, %v1449_v29  ;;  %2194 = vpow2.f32 %v1483_v2 }
 0x1ca   : > { %2196 = vrcp.f32 %v1494_v15 }
 0x1cb   : > { %v1581_v42 = vmul.f32 %v2645_v50, %v1515_v56 }
 0x1cd   : > { %v1592_v40 = vpack.c.bf16 %v1581_v42, %v1581_v42 }
 0x1cf   : > { %v2195_v34 = vpop.eup %2194  ;;  %1604 = vst.msk [vmem:[%s2810_s17 + $0x20] sm:$0xf] %vm1595_vm5, %v1592_v40 }
 0x1d0   : > { %v2197_v3 = vpop.eup %2196  ;;  %v1495_v52 = vadd.f32 1.0, %v2195_v34 }
 0x1d1   : > { %v1516_v12 = vmul.f32 %v2197_v3, %v1450_v9 }
 0x1d2   : > { %2198 = vrcp.f32 %v1495_v52 }
 0x1d3   : > { %v1582_v39 = vmul.f32 %v2647_v13, %v1516_v12 }
 0x1d5   : > { %v1593_v24 = vpack.c.bf16 %v1582_v39, %v1582_v39 }
 0x1d7   : > { %1605 = vst.msk [vmem:[%s2810_s17 + $0x24] sm:$0xf] %vm1595_vm5, %v1593_v24 }
 0x1d8   : > { %v2199_v46 = vpop.eup %2198 }
 0x1d9   : > { %v1517_v31 = vmul.f32 %v2199_v46, %v1451_v55 }
 0x1db   : > { %v1583_v19 = vmul.f32 %v2541_v27, %v1517_v31 }
 0x1dd   : > { %v1594_v50 = vpack.c.bf16 %v1583_v19, %v1583_v19 }
 0x1df   : > { %v1610_v20 = vsel %vm2566_vm9, %v1594_v50, %v1609_v17 }
 0x1e0   : > { %1611 = vst [vmem:[%s2810_s17 + $0x28] sm:$0x1] %v1610_v20 }
 0x1e1 PF: > { %s18_s24 = sadd.s32 1, %s2212_s24  }
 0x1e2   : > { %p15_p4 = scmp.ge.s32.totalorder %s18_s24, 4  }
 0x1e4   :  { %17 = sbr.rel (!%p15_p4) target bundleno = 1 (0x1), region = 92 }

// kernel: hgstem_forward.5
= control target key start
LH: loop header
LB: loop body
LE: loop exit
PB: predicated region body
PF: predicated region fallthrough
CT: control target
= control target key end

     0   :  { %s1434_s24 = smov 0   ;;  %s1644_s0 = inlined_call_operand.vmem [shape: bf16[2,31,64], index: 0, kind: input, shape index: {}]   ;;  %s1645_s1 = inlined_call_operand.vmem [shape: bf16[2,31,64], index: 1, kind: input, shape index: {}]   ;;  %s1646_s2 = inlined_call_operand.vmem [shape: bf16[4,64,16], index: 2, kind: input, shape index: {}]   ;;  %s1647_s3 = inlined_call_operand.vmem [shape: bf16[4,64,16], index: 3, kind: input, shape index: {}]   ;;  %s1648_s4 = inlined_call_operand.vmem [shape: f32[1,16], index: 4, kind: input, shape index: {}]   ;;  %s1649_s5 = inlined_call_operand.vmem [shape: bf16[16,32], index: 5, kind: input, shape index: {}]   ;;  %s1650_s6 = inlined_call_operand.vmem [shape: f32[1,32], index: 6, kind: input, shape index: {}]   ;;  %s1651_s7 = inlined_call_operand.vmem [shape: f32[2,25,32], index: 7, kind: output, shape index: {}]  }
   0x1 LB: > { %s1085_s25 = sadd.s32 4294967295, %s1392_s24   ;;  %p1089_p0 = scmp.ge.s32.totalorder %s1392_s24, 1  ;;  %s1392_s24 = sphi %s1434_s24, %s17_s24  }
   0x2   : > { %p247_p1 = scmp.lt.s32.totalorder %s1392_s24, 3 }
   0x4   : > { %p248_p2 = pnand %p1089_p0, %p247_p1 }
   0x5   : > { %p284_p3 = scmp.lt.s32.totalorder (!%p248_p2), %s1085_s25, 1 }
   0x6   : > { %251 = sbr.rel (%p248_p2) target bundleno = 416 (0x1a0), region = 48 }
   0xb   : > { %v1306_v0 = vld [vmem:[%s1647_s3 + $0x18] sm:$0xff]  ;;  %v1305_v3 = vld [vmem:[%s1647_s3 + $0x10] sm:$0xff]  ;;  %s1653_s25 = smov (!%p284_p3, %s1085_s25), 1  ;;  %v1304_v6 = vld [vmem:[%s1647_s3 + $0x8] sm:$0xff]  ;;  %vm452_vm0 = vsmask.f32 7424 }
   0xc   : > { %v1310_v1 = vld [vmem:[%s1646_s2 + $0x38] sm:$0xff]  ;;  %1340 = vmatpush.bf16.msra.mxu1 %v1306_v0  ;;  %v1309_v4 = vld [vmem:[%s1646_s2 + $0x30] sm:$0xff]  ;;  %369 = vmatpush.bf16.msra.mxu0 %v1306_v0  ;;  %s1296_s15 = sshll.u32 %s1653_s25, 4  ;;  %v1308_v7 = vld [vmem:[%s1646_s2 + $0x28] sm:$0xff]  ;;  %vm358_vm1 = vcmask 523264   ;;  %vm786_vm3 = vcmask 1044480  }
   0xd   : > { %v1314_v2 = vld [vmem:[%s1647_s3 + $0x38] sm:$0xff]  ;;  %500 = vmatpush.bf16.msra.mxu2 %v1310_v1  ;;  %v1313_v5 = vld [vmem:[%s1647_s3 + $0x30] sm:$0xff]  ;;  %s1472_s22 = scalar_lea.vmem %s1644_s0, %s1296_s15  ;;  %s1477_s27 = scalar_lea.vmem %s1645_s1, %s1296_s15  ;;  %v1312_v8 = vld [vmem:[%s1647_s3 + $0x28] sm:$0xff]  ;;  %vm611_vm2 = vsmask.f32 5376  ;;  %vm962_vm4 = vcmask 130048  }
   0xe   : > { %575 = vmatpush.bf16.msra.mxu3 %v1314_v2  ;;  %v1483_v9 = vld [vmem:[%s1477_s27 + $0x8] sm:$0xff]   ;;  %v1488_v13 = vld [vmem:[%s1472_s22] sm:$0xff]   ;;  %v1302_v29 = vld [vmem:[%s1646_s2 + $0x18] sm:$0xff]  ;;  %s1298_s19 = sshll.u32 %s1653_s25, 5  ;;  %vm1012_vm5 = vcmask 261120   ;;  %vm1016_vm6 = vcmask 253952  }
   0xf   : > { %v315_v10 = vld [vmem:[%s1477_s27 + $0xc] sm:$0x1]  ;;  %v330_v11 = vunpack.c.l.b16 %v1483_v9  ;;  %v453_v18 = vshrl.u32 %v1488_v13, 16  ;;  %v455_v19 = vshll.u32 %v1488_v13, 16  ;;  %v1498_v20 = vld [vmem:[%s1477_s27] sm:$0xff]   ;;  %v1335_v31 = vunpack.c.h.b16 %v1488_v13  ;;  %v1318_v38 = vld [vmem:[%s1646_s2 + $0x58] sm:$0xff]  ;;  %s298_s23 = scalar_lea.vmem %s1651_s7, %s1298_s19 }
  0x10   : > { %1341 = vmatpush.bf16.msra.mxu1 %v1305_v3  ;;  %370 = vmatpush.bf16.msra.mxu0 %v1305_v3  ;;  %v331_v12 = vunpack.c.l.b16 %v315_v10  ;;  %v1491_v14 = vld [vmem:[%s1472_s22 + $0x8] sm:$0xff]   ;;  %v1303_v21 = vld [vmem:[%s1647_s3] sm:$0xff]  ;;  %v528_v26 = vshrl.u32 %v1498_v20, 16  ;;  %v530_v27 = vshll.u32 %v1498_v20, 16  ;;  %v1326_v43 = vld [vmem:[%s1646_s2 + $0x78] sm:$0xff] }
  0x11   : > { %501 = vmatpush.bf16.msra.mxu2 %v1309_v4  ;;  %v303_v15 = vld [vmem:[%s1472_s22 + $0xc] sm:$0x1]  ;;  %v390_v16 = vunpack.c.l.b16 %v1491_v14  ;;  %v1307_v23 = vld [vmem:[%s1646_s2 + $0x20] sm:$0xff]  ;;  %v457_v25 = vrot.slane %v455_v19, 1  ;;  %v1301_v44 = vld [vmem:[%s1646_s2 + $0x10] sm:$0xff] }
  0x12   : > { %576 = vmatpush.bf16.msra.mxu3 %v1313_v5  ;;  %v391_v17 = vunpack.c.l.b16 %v303_v15  ;;  %v1505_v22 = vpack.c.b16 %v331_v12, %v330_v11  ;;  %v594_v28 = vld [vmem:[%s1472_s22] sm:$0xc]  ;;  %v595_v32 = vld [vmem:[%s1472_s22 + $0xc] sm:$0x7]  ;;  %v532_v37 = vrot.slane %v530_v27, 1  ;;  %v1317_v49 = vld [vmem:[%s1646_s2 + $0x50] sm:$0xff] }
  0x13   : > { %v607_v33 = vunpack.c.l.b16 %v594_v28  ;;  %v1311_v34 = vld [vmem:[%s1647_s3 + $0x20] sm:$0xff]  ;;  %v458_v35 = vor.u32 %v457_v25, %v453_v18  ;;  %v608_v40 = vunpack.c.l.b16 %v595_v32  ;;  %v1330_v50 = vld [vmem:[%s1647_s3 + $0x78] sm:$0xff]  ;;  %v1325_v51 = vld [vmem:[%s1646_s2 + $0x70] sm:$0xff] }
  0x14   : > { %1342 = vmatpush.bf16.msra.mxu1 %v1304_v6  ;;  %v1510_v24 = vpack.c.b16 %v391_v17, %v390_v16  ;;  %371 = vmatpush.bf16.msra.mxu0 %v1304_v6  ;;  %v534_v30 = vshll.u32 %v1505_v22, 16  ;;  %v533_v42 = vor.u32 %v532_v37, %v528_v26  ;;  %v1300_v52 = vld [vmem:[%s1646_s2 + $0x8] sm:$0xff]  ;;  %v1329_v58 = vld [vmem:[%s1647_s3 + $0x70] sm:$0xff]  ;;  %v1299_v60 = vld [vmem:[%s1646_s2] sm:$0xff]  ;;  %v538_v6 = vshrl.u32 %v1505_v22, 16 }
  0x15   : > { %502 = vmatpush.bf16.msra.mxu2 %v1308_v7  ;;  %v609_v45 = vpack.c.b16 %v1335_v31, %v607_v33  ;;  %v610_v46 = vpack.c.b16 %v608_v40, %v390_v16  ;;  %v1316_v57 = vld [vmem:[%s1646_s2 + $0x48] sm:$0xff]  ;;  %v1322_v1 = vld [vmem:[%s1647_s3 + $0x58] sm:$0xff]  ;;  %v1315_v2 = vld [vmem:[%s1646_s2 + $0x40] sm:$0xff] }
  0x16   : > { %577 = vmatpush.bf16.msra.mxu3 %v1312_v8  ;;  %v459_v36 = vshll.u32 %v1510_v24, 16  ;;  %v1528_v39 = vrot.slane %v534_v30, 1  ;;  %v1324_v59 = vld [vmem:[%s1646_s2 + $0x68] sm:$0xff]  ;;  %v463_v3 = vshrl.u32 %v1510_v24, 16  ;;  %v1323_v5 = vld [vmem:[%s1646_s2 + $0x60] sm:$0xff]  ;;  %v1321_v10 = vld [vmem:[%s1647_s3 + $0x50] sm:$0xff] }
  0x17   : > { %v613_v53 = vshrl.u32 %v609_v45, 16  ;;  %v616_v54 = vshll.u32 %v609_v45, 16  ;;  %v621_v55 = vshrl.u32 %v610_v46, 16  ;;  %v624_v56 = vshll.u32 %v610_v46, 16  ;;  %v1328_v4 = vld [vmem:[%s1647_s3 + $0x68] sm:$0xff]  ;;  %v1327_v15 = vld [vmem:[%s1647_s3 + $0x60] sm:$0xff] }
  0x18   : > { %1343 = vmatpush.bf16.msra.mxu1 %v1303_v21  ;;  %v461_v41 = vrot.slane %v459_v36, 1  ;;  %372 = vmatpush.bf16.msra.mxu0 %v1303_v21  ;;  %v537_v48 = vsel %vm452_vm0, %v533_v42, %v1528_v39  ;;  %v540_v16 = vor.u32 %v538_v6, %v1528_v39  ;;  %v769_v18 = vld [vmem:[%s1472_s22] sm:$0x8]  ;;  %v1320_v19 = vld [vmem:[%s1647_s3 + $0x48] sm:$0xff]  ;;  %v861_v36 = vrot.slane %v1483_v9, 3 }
  0x19   : > { %503 = vmatpush.bf16.msra.mxu2 %v1307_v23  ;;  %v615_v61 = vrot.slane %v613_v53, 2  ;;  %v618_v62 = vrot.slane %v616_v54, 3  ;;  %v623_v63 = vrot.slane %v621_v55, 2  ;;  %v626_v0 = vrot.slane %v624_v56, 3  ;;  %v843_v21 = vld [vmem:[%s1477_s27] sm:$0x8] }
  0x1a   : > { %578 = vmatpush.bf16.msra.mxu3 %v1311_v34  ;;  %v462_v47 = vsel %vm452_vm0, %v458_v35, %v461_v41  ;;  %v465_v12 = vor.u32 %v463_v3, %v461_v41  ;;  %v1339_v23 = vunpack.c.h.b16 %v1498_v20  ;;  %v856_v25 = vunpack.c.l.b16 %v843_v21  ;;  %v1319_v26 = vld [vmem:[%s1647_s3 + $0x40] sm:$0xff]  ;;  %v683_v28 = vld [vmem:[%s1477_s27 + $0xc] sm:$0x7] }
  0x1b   : > { %1113 = vmatmul.msk.bf16.vlgmr.msra.gmra.mxu1 %vm358_vm1, %v1505_v22  ;;  %1112 = vmatmul.msk.bf16.vlgmr.msra.gmra.mxu0 %vm358_vm1, %v1498_v20  ;;  %v619_v7 = vor.u32 %v618_v62, %v615_v61  ;;  %v627_v8 = vor.u32 %v626_v0, %v623_v63  ;;  %v782_v22 = vunpack.c.l.b16 %v769_v18  ;;  %v696_v32 = vunpack.c.l.b16 %v683_v28  ;;  %v1331_v18 = vld [vmem:[%s1649_s5] sm:$0xff] }
  0x1c   : > { %428 = vmatpush.bf16.msrb.mxu1 %v1302_v29  ;;  %663 = vmatpush.bf16.msrb.mxu0 %v1318_v38  ;;  %v682_v29 = vld [vmem:[%s1477_s27] sm:$0xc]  ;;  %v858_v30 = vpack.c.b16 %v1339_v23, %v856_v25  ;;  %v788_v35 = vrot.slane %v1491_v14, 3 }
  0x1d   : > { %1156 = vmatmul.msk.bf16.vlgmr.msra.gmra.mxu2 %vm358_vm1, %v462_v47  ;;  %1182 = vmatmul.msk.bf16.vlgmr.msra.gmra.mxu3 %vm358_vm1, %v537_v48  ;;  %v628_v17 = vsel %vm611_vm2, %v619_v7, %v627_v8  ;;  %v784_v27 = vpack.c.b16 %v1335_v31, %v782_v22  ;;  %v695_v33 = vunpack.c.l.b16 %v682_v29  ;;  %v698_v37 = vpack.c.b16 %v696_v32, %v330_v11 }
  0x1e   : > { %824 = vmatpush.bf16.msrb.mxu2 %v1326_v43  ;;  %897 = vmatpush.bf16.msrb.mxu3 %v1330_v50  ;;  %v860_v20 = vrot.slane %v858_v30, 3 }
  0x1f   : > { %v787_v34 = vrot.slane %v784_v27, 3  ;;  %v697_v38 = vpack.c.b16 %v1339_v23, %v695_v33  ;;  %v708_v14 = vshrl.u32 %v698_v37, 16  ;;  %v711_v41 = vshll.u32 %v698_v37, 16 }
  0x20   : > { %429 = vmatpush.bf16.msrb.mxu1 %v1301_v44  ;;  %664 = vmatpush.bf16.msrb.mxu0 %v1317_v49 }
  0x21   : > { %v789_v39 = vsel %vm786_vm3, %v787_v34, %v788_v35  ;;  %v700_v31 = vshrl.u32 %v697_v38, 16  ;;  %v703_v40 = vshll.u32 %v697_v38, 16  ;;  %v710_v9 = vrot.slane %v708_v14, 2 }
  0x22   : > { %825 = vmatpush.bf16.msrb.mxu2 %v1325_v51  ;;  %898 = vmatpush.bf16.msrb.mxu3 %v1329_v58  ;;  %v713_v11 = vrot.slane %v711_v41, 3 }
  0x23   : > { %v702_v42 = vrot.slane %v700_v31, 2  ;;  %v705_v43 = vrot.slane %v703_v40, 3 }
  0x24   : > { %430 = vmatpush.bf16.msrb.mxu1 %v1300_v52  ;;  %665 = vmatpush.bf16.msrb.mxu0 %v1316_v57  ;;  %v714_v45 = vor.u32 %v713_v11, %v710_v9 }
  0x25   : > { %v706_v44 = vor.u32 %v705_v43, %v702_v42 }
  0x26   : > { %826 = vmatpush.bf16.msrb.mxu2 %v1324_v59  ;;  %899 = vmatpush.bf16.msrb.mxu3 %v1328_v4 }
  0x27   : > { %v715_v46 = vsel %vm611_vm2, %v706_v44, %v714_v45 }
  0x28   : > { %431 = vmatpush.bf16.msrb.mxu1 %v1299_v60  ;;  %666 = vmatpush.bf16.msrb.mxu0 %v1315_v2 }
  0x2a   : > { %827 = vmatpush.bf16.msrb.mxu2 %v1323_v5  ;;  %900 = vmatpush.bf16.msrb.mxu3 %v1327_v15 }
  0x2b   : > { %1130 = vmatmul.msk.bf16.vlgmr.msrb.gmra.mxu1 %vm358_vm1, %v1488_v13  ;;  %1208 = vmatmul.msk.bf16.vlgmr.msrb.gmra.mxu0 %vm358_vm1, %v628_v17  ;;  %v862_v13 = vsel %vm786_vm3, %v860_v20, %v861_v36  ;;  %v1352_v17 = vld [vmem:[%s1648_s4] ss:$0 sm:$0xff] }
  0x2c   : > { %750 = vmatpush.bf16.msra.mxu1 %v1322_v1  ;;  %976 = vmatpush.bf16.msra.mxu0 %v1331_v18 }
  0x2d   : > { %1157 = vmatmul.msk.bf16.gmra.mxu2 %vm358_vm1, %v465_v12  ;;  %1183 = vmatmul.msk.bf16.gmra.mxu3 %vm358_vm1, %v540_v16 }
  0x30   : > { %751 = vmatpush.bf16.msra.mxu1 %v1321_v10 }
  0x34   : > { %752 = vmatpush.bf16.msra.mxu1 %v1320_v19 }
  0x38   : > { %753 = vmatpush.bf16.msra.mxu1 %v1319_v26 }
  0x3b   : > { %1131 = vmatmul.msk.bf16.gmra.mxu1 %vm358_vm1, %v1510_v24  ;;  %1209 = vmatmul.msk.bf16.gmra.mxu0 %vm358_vm1, %v627_v8 }
  0x3d   : > { %1260 = vmatmul.msk.bf16.vlgmr.msrb.gmra.mxu2 %vm358_vm1, %v789_v39  ;;  %1286 = vmatmul.msk.bf16.vlgmr.msrb.gmra.mxu3 %vm358_vm1, %v862_v13 }
  0x4b   : > { %1234 = vmatmul.msk.bf16.vlgmr.msra.gmra.mxu1 %vm358_vm1, %v715_v46 }
  0x4d   : > { %1261 = vmatmul.msk.bf16.gmra.mxu2 %vm358_vm1, %v788_v35  ;;  %1287 = vmatmul.msk.bf16.gmra.mxu3 %vm358_vm1, %v861_v36 }
  0x5b   : > { %1235 = vmatmul.msk.bf16.gmra.mxu1 %vm358_vm1, %v714_v45 }
  0x98   : > { %v379_v24 = vpop.f32.mrf.mxu1  ;;  %v374_v53 = vpop.f32.mrf.mxu0 }
  0xa0   : > { %v505_v47 = vpop.f32.mrf.mxu2  ;;  %v381_v48 = vpop.f32.mrf.mxu1 }
  0xa1   : > { %v580_v49 = vpop.f32.mrf.mxu3  ;;  %v376_v57 = vpop.f32.mrf.mxu0 }
  0xa8   : > { %v507_v50 = vpop.f32.mrf.mxu2  ;;  %v433_v51 = vpop.f32.mrf.mxu1 }
  0xa9   : > { %v582_v52 = vpop.f32.mrf.mxu3  ;;  %v434_v60 = vadd.f32 %v433_v51, %v374_v53  ;;  %v668_v62 = vpop.f32.mrf.mxu0 }
  0xab   : > { %v515_v63 = vadd.f32 %v505_v47, %v434_v60 }
  0xad   : > { %v590_v1 = vadd.f32 %v580_v49, %v515_v63 }
  0xaf   : > { %v678_v5 = vadd.f32 %v668_v62, %v590_v1 }
  0xb0   : > { %v435_v54 = vpop.f32.mrf.mxu1  ;;  %v510_v55 = vpop.f32.mrf.mxu2 }
  0xb1   : > { %v585_v56 = vpop.f32.mrf.mxu3  ;;  %v436_v2 = vadd.f32 %v435_v54, %v376_v57  ;;  %v670_v7 = vpop.f32.mrf.mxu0 }
  0xb3   : > { %v516_v6 = vadd.f32 %v507_v50, %v436_v2 }
  0xb5   : > { %v591_v12 = vadd.f32 %v582_v52, %v516_v6 }
  0xb7   : > { %v679_v22 = vadd.f32 %v670_v7, %v591_v12  ;;  %v1353_v12 = vld [vmem:[%s1650_s6] ss:$0 sm:$0xff] }
  0xb8   : > { %v438_v58 = vpop.f32.mrf.mxu1  ;;  %v512_v59 = vpop.f32.mrf.mxu2 }
  0xb9   : > { %v587_v61 = vpop.f32.mrf.mxu3  ;;  %v439_v15 = vadd.f32 %v438_v58, %v379_v24  ;;  %v673_v30 = vpop.f32.mrf.mxu0 }
  0xbb   : > { %v517_v23 = vadd.f32 %v510_v55, %v439_v15 }
  0xbd   : > { %v592_v32 = vadd.f32 %v585_v56, %v517_v23 }
  0xbf   : > { %v680_v36 = vadd.f32 %v673_v30, %v592_v32 }
  0xc0   : > { %v440_v0 = vpop.f32.mrf.mxu1  ;;  %v829_v3 = vpop.f32.mrf.mxu2 }
  0xc1   : > { %v902_v4 = vpop.f32.mrf.mxu3  ;;  %v441_v33 = vadd.f32 %v440_v0, %v381_v48  ;;  %v675_v9 = vpop.f32.mrf.mxu0 }
  0xc3   : > { %v518_v37 = vadd.f32 %v512_v59, %v441_v33 }
  0xc5   : > { %v593_v41 = vadd.f32 %v587_v61, %v518_v37 }
  0xc7   : > { %v681_v45 = vadd.f32 %v675_v9, %v593_v41 }
  0xc8   : > { %v755_v8 = vpop.f32.mrf.mxu1  ;;  %v831_v21 = vpop.f32.mrf.mxu2 }
  0xc9   : > { %v765_v10 = vadd.f32 %v755_v8, %v678_v5  ;;  %v904_v26 = vpop.f32.mrf.mxu3 }
  0xcb   : > { %v839_v16 = vadd.f32 %v829_v3, %v765_v10 }
  0xcd   : > { %v912_v19 = vadd.f32 %v902_v4, %v839_v16 }
  0xcf   : > { %v920_v25 = vadd.f32 %v1352_v17, %v912_v19 }
  0xd0   : > { %v757_v27 = vpop.f32.mrf.mxu1  ;;  %v834_v39 = vpop.f32.mrf.mxu2 }
  0xd1   : > { %v924_v28 = vsub.f32 0.0, %v920_v25  ;;  %v766_v29 = vadd.f32 %v757_v27, %v679_v22  ;;  %v907_v14 = vpop.f32.mrf.mxu3 }
  0xd3   : > { %v928_v34 = vmul.f32 1.442695, %v924_v28  ;;  %v840_v35 = vadd.f32 %v831_v21, %v766_v29 }
  0xd5   : > { %v913_v20 = vadd.f32 %v904_v26, %v840_v35  ;;  %1354 = vpow2.f32 %v928_v34 }
  0xd7   : > { %v921_v38 = vadd.f32 %v1352_v17, %v913_v20 }
  0xd8   : > { %v760_v13 = vpop.f32.mrf.mxu1  ;;  %v836_v50 = vpop.f32.mrf.mxu2 }
  0xd9   : > { %v925_v31 = vsub.f32 0.0, %v921_v38  ;;  %v767_v40 = vadd.f32 %v760_v13, %v680_v36  ;;  %v909_v55 = vpop.f32.mrf.mxu3 }
  0xdb   : > { %v930_v42 = vmul.f32 1.442695, %v925_v31  ;;  %v841_v43 = vadd.f32 %v834_v39, %v767_v40  ;;  %v1355_v11 = vpop.eup %1354 }
  0xdc   : > { %v936_v24 = vadd.f32 1.0, %v1355_v11 }
  0xdd   : > { %1356 = vpow2.f32 %v930_v42  ;;  %v914_v44 = vadd.f32 %v907_v14, %v841_v43 }
  0xde   : > { %1358 = vrcp.f32 %v936_v24 }
  0xdf   : > { %v922_v46 = vadd.f32 %v1352_v17, %v914_v44 }
  0xe0   : > { %v762_v47 = vpop.f32.mrf.mxu1 }
  0xe1   : > { %v926_v48 = vsub.f32 0.0, %v922_v46  ;;  %v768_v49 = vadd.f32 %v762_v47, %v681_v45 }
  0xe3   : > { %v1357_v51 = vpop.eup %1356  ;;  %v932_v52 = vmul.f32 1.442695, %v926_v48  ;;  %v842_v53 = vadd.f32 %v836_v50, %v768_v49 }
  0xe4   : > { %v937_v54 = vadd.f32 1.0, %v1357_v51  ;;  %v1359_v59 = vpop.eup %1358 }
  0xe5   : > { %v915_v56 = vadd.f32 %v909_v55, %v842_v53  ;;  %v944_v63 = vmul.f32 %v1359_v59, %v920_v25 }
  0xe6   : > { %1360 = vrcp.f32 %v937_v54 }
  0xe7   : > { %1362 = vpow2.f32 %v932_v52  ;;  %v923_v57 = vadd.f32 %v1352_v17, %v915_v56 }
  0xe9   : > { %v927_v58 = vsub.f32 0.0, %v923_v57 }
  0xeb   : > { %v934_v60 = vmul.f32 1.442695, %v927_v58 }
  0xec   : > { %v1361_v61 = vpop.eup %1360 }
  0xed   : > { %v1363_v62 = vpop.eup %1362  ;;  %v945_v0 = vmul.f32 %v1361_v61, %v921_v38  ;;  %1364 = vpow2.f32 %v934_v60 }
  0xee   : > { %v938_v2 = vadd.f32 1.0, %v1363_v62 }
  0xef   : > { %v948_v1 = vpack.c.bf16 %v945_v0, %v944_v63 }
  0xf0   : > { %1366 = vrcp.f32 %v938_v2 }
  0xf1   : > { %1292 = vmatmul.msk.bf16.vlgmr.msra.gmra.mxu0 %vm962_vm4, %v948_v1 }
  0xf3   : > { %v1365_v3 = vpop.eup %1364 }
  0xf4   : > { %v939_v4 = vadd.f32 1.0, %v1365_v3 }
  0xf6   : > { %1368 = vrcp.f32 %v939_v4  ;;  %v1367_v5 = vpop.eup %1366 }
  0xf7   : > { %v946_v7 = vmul.f32 %v1367_v5, %v922_v46 }
  0xfc   : > { %v1369_v6 = vpop.eup %1368 }
  0xfd   : > { %v947_v8 = vmul.f32 %v1369_v6, %v923_v57 }
  0xff   : > { %v949_v10 = vpack.c.bf16 %v947_v8, %v946_v7 }
 0x101   : > { %1293 = vmatmul.msk.bf16.gmra.mxu0 %vm962_vm4, %v949_v10 }
 0x16e   : > { %v978_v15 = vpop.f32.mrf.mxu0 }
 0x16f   : > { %v979_v16 = vadd.f32 %v1353_v12, %v978_v15 }
 0x171   : > { %v988_v17 = vsub.f32 0.0, %v979_v16 }
 0x173   : > { %v992_v18 = vmul.f32 1.442695, %v988_v17 }
 0x175   : > { %1370 = vpow2.f32 %v992_v18 }
 0x176   : > { %v980_v19 = vpop.f32.mrf.mxu0 }
 0x177   : > { %v981_v21 = vadd.f32 %v1353_v12, %v980_v19 }
 0x179   : > { %v989_v22 = vsub.f32 0.0, %v981_v21 }
 0x17b   : > { %v1371_v23 = vpop.eup %1370  ;;  %v994_v25 = vmul.f32 1.442695, %v989_v22 }
 0x17c   : > { %v1000_v26 = vadd.f32 1.0, %v1371_v23 }
 0x17d   : > { %1372 = vpow2.f32 %v994_v25 }
 0x17e   : > { %1374 = vrcp.f32 %v1000_v26  ;;  %v983_v27 = vpop.f32.mrf.mxu0 }
 0x17f   : > { %v984_v28 = vadd.f32 %v1353_v12, %v983_v27 }
 0x181   : > { %v990_v29 = vsub.f32 0.0, %v984_v28 }
 0x183   : > { %v1373_v30 = vpop.eup %1372  ;;  %v996_v32 = vmul.f32 1.442695, %v990_v29 }
 0x184   : > { %v1375_v33 = vpop.eup %1374  ;;  %v1001_v34 = vadd.f32 1.0, %v1373_v30 }
 0x185   : > { %v1008_v35 = vmul.f32 %v1375_v33, %v979_v16  ;;  %1376 = vpow2.f32 %v996_v32 }
 0x186   : > { %1378 = vrcp.f32 %v1001_v34  ;;  %v985_v20 = vpop.f32.mrf.mxu0 }
 0x187   : > { %1013 = vst.msk [vmem:[%s298_s23] sm:$0xff] %vm1012_vm5, %v1008_v35  ;;  %v986_v36 = vadd.f32 %v1353_v12, %v985_v20 }
 0x189   : > { %v991_v37 = vsub.f32 0.0, %v986_v36 }
 0x18b   : > { %v1377_v38 = vpop.eup %1376  ;;  %v998_v39 = vmul.f32 1.442695, %v991_v37 }
 0x18c   : > { %v1379_v13 = vpop.eup %1378  ;;  %v1002_v31 = vadd.f32 1.0, %v1377_v38 }
 0x18d   : > { %v1009_v40 = vmul.f32 %v1379_v13, %v981_v21  ;;  %1380 = vpow2.f32 %v998_v39 }
 0x18e   : > { %1382 = vrcp.f32 %v1002_v31 }
 0x18f   : > { %1014 = vst.msk [vmem:[%s298_s23 + $0x8] sm:$0xff] %vm1012_vm5, %v1009_v40 }
 0x193   : > { %v1381_v14 = vpop.eup %1380 }
 0x194   : > { %v1383_v41 = vpop.eup %1382  ;;  %v1003_v42 = vadd.f32 1.0, %v1381_v14 }
 0x195   : > { %v1010_v43 = vmul.f32 %v1383_v41, %v984_v28 }
 0x196   : > { %1384 = vrcp.f32 %v1003_v42 }
 0x197   : > { %1015 = vst.msk [vmem:[%s298_s23 + $0x10] sm:$0xff] %vm1012_vm5, %v1010_v43 }
 0x19c   : > { %v1385_v9 = vpop.eup %1384 }
 0x19d   : > { %v1011_v11 = vmul.f32 %v1385_v9, %v986_v36 }
 0x19f   : > { %1017 = vst.msk [vmem:[%s298_s23 + $0x18] sm:$0x1] %vm1016_vm6, %v1011_v11 }
 0x1a0 PF: > { %s17_s24 = sadd.s32 1, %s1392_s24  }
 0x1a1   : > { %p14_p4 = scmp.ge.s32.totalorder %s17_s24, 4  }
 0x1a3   :  { %16 = sbr.rel (!%p14_p4) target bundleno = 1 (0x1), region = 87 }

</bundles_post_ra>
